<compile_context>
chip_gen: v7x
topology: tpu7x:2x2x1
jax: 0.10.0
libtpu: 0.0.40
codegen_flags: <defaults>
</compile_context>

<pallas_src>
import jax
import jax.numpy as jnp
from jax import lax
from jax.experimental import pallas as pl
from jax.experimental.pallas import tpu as pltpu

# ---- hyperparameters (synthetic "hp") -------------------------------------
E = 32                   # hp.E
NUM_HEADS = 4            # hp.num_heads
TOKEN_NUM = 8            # hp.token_num (!= 5, so embed has TOKEN_NUM rows)
D_Q = E // 2             # query_dim
D_K = E // NUM_HEADS     # key_dim
SPLIT = E // NUM_HEADS   # num_units // num_heads
HT = NUM_HEADS * TOKEN_NUM

P = 8                    # batch rows packed into the lane dim (8 -> 128/256/512-lane operands)


def _round_up(x, m):
    return ((x + m - 1) // m) * m


def _stl_kernel(x_ref, wqk_ref, w2_ref, out_ref):
    # x:   [tn, P*D_Q]     packed batch rows (lane-dense)
    # wqk: [P*D_Q, P*HT]   kron(I_P, Wq @ K_bd / sqrt(d_k))
    # w2:  [P*HT, 2*P*E]   [ kron(I_P, V_bd) | kron(I_P, SegOnes) ]
    # out: [tn, P*E]
    w = out_ref.shape[-1]                                       # P*E (multiple of 128)
    x = x_ref[...].astype(jnp.float32)
    s = jnp.dot(x, wqk_ref[...], preferred_element_type=jnp.float32,
                precision=lax.Precision.HIGHEST)                # [tn, P*HT]
    # Full-row max is a constant shift per original row (block-diag weights) -> softmax exact.
    s = s - jnp.max(s, axis=-1, keepdims=True)
    e = jnp.exp(s)
    y = jnp.dot(e, w2_ref[...], preferred_element_type=jnp.float32,
                precision=lax.Precision.HIGHEST)                # [tn, 2*P*E]
    num = y[:, :w]                                              # whole-vreg slices (128-aligned)
    den = y[:, w:]
    r = pl.reciprocal(den, approx=True)                         # EUP slot (otherwise idle)
    r = r * (2.0 - den * r)                                     # one Newton step -> ~1e-7 rel err
    out_ref[...] = (num * r).astype(out_ref.dtype)


def _pack_params(embed, wq, wk, wv, p):
    """Parameter-only precompute (hoisted out of the per-tile kernel body)."""
    keys = jnp.tanh(embed.astype(jnp.float32))                  # [T, D_K]
    k = keys @ wk.astype(jnp.float32)                           # [T, E]
    v = keys @ wv.astype(jnp.float32)                           # [T, E]
    kh = k.reshape(TOKEN_NUM, NUM_HEADS, SPLIT)                 # [T, H, S]
    vh = v.reshape(TOKEN_NUM, NUM_HEADS, SPLIT)                 # [T, H, S]
    eye_h = jnp.eye(NUM_HEADS, dtype=jnp.float32)

    # K_bd[(h,s),(g,t)] = k_h[t,s] * (h==g)   -> score column block g == head g
    kbd = jnp.einsum("ths,hg->hsgt", kh, eye_h).reshape(E, HT)
    # V_bd[(h,t),(g,s)] = v_h[t,s] * (h==g)   -> output column block g == head g (concat order)
    vbd = jnp.einsum("ths,hg->htgs", vh, eye_h).reshape(HT, E)
    # SegOnes[(h,t),(g,s)] = (h==g)           -> broadcasts each head's softmax denominator
    segb = jnp.kron(eye_h, jnp.ones((TOKEN_NUM, SPLIT), jnp.float32))

    scale = 1.0 / (D_K ** 0.5)
    wqk = (wq.astype(jnp.float32) @ kbd) * scale                # [D_Q, HT]

    # Batch-into-lanes expansion: block-diagonal over P packed rows.
    eye_p = jnp.eye(p, dtype=jnp.float32)
    wqk_big = jnp.kron(eye_p, wqk)                              # [P*D_Q, P*HT]
    vbd_big = jnp.kron(eye_p, vbd)                              # [P*HT,  P*E]
    segb_big = jnp.kron(eye_p, segb)                            # [P*HT,  P*E]
    w2_big = jnp.concatenate([vbd_big, segb_big], axis=1)       # [P*HT, 2*P*E] (fused num|den)
    return wqk_big, w2_big


def stl_forward(x, embed, wq, wk, wv, *, tn=512):
    """x: [N, E//2] -> [N, 1, E] (same semantics as torch STL.forward).

    tn is in PACKED rows (each packed row = P original rows), i.e. default 512*8 = 4096 rows.
    """
    n = x.shape[0]
    wqk_big, w2_big = _pack_params(embed, wq, wk, wv, P)

    # Pad batch to a multiple of P and pack P rows into the lane dimension (free reshape).
    n_rows = _round_up(max(n, 1), P)
    np_rows = n_rows // P                                       # packed rows

    tn = min(tn, _round_up(np_rows, 8))
    if np_rows > 16:
        # Keep >=2 grid steps so v7x's second TensorCore gets work (no effect on v5e/v6e).
        tn = min(tn, _round_up(-(-np_rows // 2), 8))
    np_pad = _round_up(np_rows, tn)

    x_p = jnp.pad(x, ((0, np_pad * P - n), (0, 0))).reshape(np_pad, P * D_Q)

    flops = np_pad * (2 * (P * D_Q) * (P * HT) + 2 * (P * HT) * (2 * P * E))
    bytes_accessed = 4 * (np_pad * (P * D_Q + P * E) + wqk_big.size + w2_big.size)
    cost = pl.CostEstimate(flops=flops,
                           transcendentals=np_pad * P * HT,
                           bytes_accessed=bytes_accessed)

    out2d = pl.pallas_call(
        _stl_kernel,
        out_shape=jax.ShapeDtypeStruct((np_pad, P * E), x.dtype),
        grid=(np_pad // tn,),
        in_specs=[
            pl.BlockSpec((tn, P * D_Q), lambda i: (i, 0)),       # x tile, pipelined over batch
            pl.BlockSpec((P * D_Q, P * HT), lambda i: (0, 0)),   # Wqk_big (constant across grid)
            pl.BlockSpec((P * HT, 2 * P * E), lambda i: (0, 0)), # [V_bd | SegOnes] fused weight
        ],
        out_specs=pl.BlockSpec((tn, P * E), lambda i: (i, 0)),
        compiler_params=pltpu.CompilerParams(
            dimension_semantics=("parallel",)),                  # batch axis across TCs (v7x)
        cost_estimate=cost,
    )(x_p, wqk_big, w2_big)

    # Free reshapes: [np_pad, P*E] -> [np_pad*P, E] -> [:n] -> [N, 1, E]
    return out2d.reshape(np_pad * P, E)[:n].reshape(n, 1, E)


def stl_reference(x, embed, wq, wk, wv):
    """Pure-JAX reference mirroring the torch module exactly."""
    n = x.shape[0]
    query = x[:, None, :]                                    # [N, 1, D_Q]
    keys = jnp.tanh(embed)[None].repeat(n, axis=0)           # [N, T, D_K]
    querys = query @ wq                                      # [N, 1, E]
    keys_p = keys @ wk                                       # [N, T, E]
    values = keys @ wv                                       # [N, T, E]
    qh = jnp.stack(jnp.split(querys, NUM_HEADS, axis=2), 0)  # [H, N, 1, S]
    kh = jnp.stack(jnp.split(keys_p, NUM_HEADS, axis=2), 0)  # [H, N, T, S]
    vh = jnp.stack(jnp.split(values, NUM_HEADS, axis=2), 0)  # [H, N, T, S]
    scores = qh @ jnp.swapaxes(kh, 2, 3) / (D_K ** 0.5)      # [H, N, 1, T]
    scores = jax.nn.softmax(scores, axis=3)
    out = scores @ vh                                        # [H, N, 1, S]
    out = jnp.concatenate(jnp.split(out, NUM_HEADS, axis=0), axis=3)[0]  # [N, 1, E]
    return out


if __name__ == "__main__":
    key = jax.random.PRNGKey(0)
    k_x, k_e, k_q, k_k, k_v = jax.random.split(key, 5)

    # Deterministic parameter init (embed ~ N(0, 0.5) as in init.normal_; linears ~ small normal)
    embed = 0.5 * jax.random.normal(k_e, (TOKEN_NUM, D_K), dtype=jnp.float32)
    wq = 0.1 * jax.random.normal(k_q, (D_Q, E), dtype=jnp.float32)   # W_query.weight.T
    wk = 0.1 * jax.random.normal(k_k, (D_K, E), dtype=jnp.float32)   # W_key.weight.T
    wv = 0.1 * jax.random.normal(k_v, (D_K, E), dtype=jnp.float32)   # W_value.weight.T

    # Primary small-shape check (N = 2)
    N = 2
    x = jax.random.normal(k_x, (N, D_Q), dtype=jnp.float32)
    out = stl_forward(x, embed, wq, wk, wv)
    jax.block_until_ready(out)
    ref = stl_reference(x, embed, wq, wk, wv)
    assert out.shape == (N, 1, E), out.shape
    assert jnp.allclose(out, ref, atol=1e-5, rtol=1e-5), float(jnp.max(jnp.abs(out - ref)))

    # Secondary check exercising batch padding / packing (N not a multiple of P or 8)
    N2 = 37
    x2 = jax.random.normal(jax.random.PRNGKey(1), (N2, D_Q), dtype=jnp.float32)
    out2 = stl_forward(x2, embed, wq, wk, wv)
    jax.block_until_ready(out2)
    ref2 = stl_reference(x2, embed, wq, wk, wv)
    assert out2.shape == (N2, 1, E), out2.shape
    assert jnp.allclose(out2, ref2, atol=1e-5, rtol=1e-5), float(jnp.max(jnp.abs(out2 - ref2)))

    print("KERNEL_OK")
</pallas_src>

<mosaic_0001>
module attributes {stable_mosaic.version = 11 : i64} {
  func.func @_stl_kernel(%arg0: i32, %arg1: memref<8x128xf32, #tpu.memory_space<vmem>>, %arg2: memref<128x256xf32, #tpu.memory_space<vmem>>, %arg3: memref<256x512xf32, #tpu.memory_space<vmem>>, %arg4: memref<8x256xf32, #tpu.memory_space<vmem>>) attributes {dimension_semantics = [#tpu.dimension_semantics<parallel>], iteration_bounds = array<i64: 1>, scalar_prefetch = 0 : i64, scratch_operands = 0 : i64, tpu.core_type = #tpu.core_type<tc>, window_params = [{transform_indices = @transform_0, window_bounds = array<i64: 8, 128>}, {pipeline_mode = #tpu.pipeline_mode<synchronous>, transform_indices = @transform_1, window_bounds = array<i64: 128, 256>}, {pipeline_mode = #tpu.pipeline_mode<synchronous>, transform_indices = @transform_2, window_bounds = array<i64: 256, 512>}, {transform_indices = @transform_3, window_bounds = array<i64: 8, 256>}]} {
    %c0 = arith.constant 0 : index
    %c0_0 = arith.constant 0 : index
    %0 = vector.load %arg1[%c0, %c0_0] : memref<8x128xf32, #tpu.memory_space<vmem>>, vector<8x128xf32>
    %c0_1 = arith.constant 0 : index
    %c0_2 = arith.constant 0 : index
    %1 = vector.load %arg2[%c0_1, %c0_2] : memref<128x256xf32, #tpu.memory_space<vmem>>, vector<128x256xf32>
    %cst = arith.constant dense<0.000000e+00> : vector<8x256xf32>
    %2 = tpu.matmul %0, %1, %cst {dimension_numbers = #tpu.dot_dimension_numbers<[1], [0], [0], [1], [0, 0, 1, 1], [], []>, precision = #tpu.contract_precision<fp32>} : vector<8x128xf32>, vector<128x256xf32>, vector<8x256xf32> -> vector<8x256xf32>
    %cst_3 = arith.constant dense<0xFF800000> : vector<8xf32>
    %3 = vector.multi_reduction <maximumf>, %2, %cst_3 [1] : vector<8x256xf32> to vector<8xf32>
    %4 = vector.shape_cast %3 : vector<8xf32> to vector<8x1xf32>
    %5 = vector.broadcast %4 : vector<8x1xf32> to vector<8x256xf32>
    %6 = arith.subf %2, %5 : vector<8x256xf32>
    %7 = math.exp %6 : vector<8x256xf32>
    %c0_4 = arith.constant 0 : index
    %c0_5 = arith.constant 0 : index
    %8 = vector.load %arg3[%c0_4, %c0_5] : memref<256x512xf32, #tpu.memory_space<vmem>>, vector<256x512xf32>
    %cst_6 = arith.constant dense<0.000000e+00> : vector<8x512xf32>
    %9 = tpu.matmul %7, %8, %cst_6 {dimension_numbers = #tpu.dot_dimension_numbers<[1], [0], [0], [1], [0, 0, 1, 1], [], []>, precision = #tpu.contract_precision<fp32>} : vector<8x256xf32>, vector<256x512xf32>, vector<8x512xf32> -> vector<8x512xf32>
    %10 = vector.extract_strided_slice %9 {offsets = [0, 0], sizes = [8, 256], strides = [1, 1]} : vector<8x512xf32> to vector<8x256xf32>
    %11 = vector.extract_strided_slice %9 {offsets = [0, 256], sizes = [8, 256], strides = [1, 1]} : vector<8x512xf32> to vector<8x256xf32>
    %12 = tpu.reciprocal %11 {approx = true} : vector<8x256xf32> -> vector<8x256xf32>
    %13 = arith.mulf %11, %12 : vector<8x256xf32>
    %cst_7 = arith.constant 2.000000e+00 : f32
    %14 = vector.broadcast %cst_7 : f32 to vector<8x256xf32>
    %15 = arith.subf %14, %13 : vector<8x256xf32>
    %16 = arith.mulf %12, %15 : vector<8x256xf32>
    %17 = arith.mulf %10, %16 : vector<8x256xf32>
    %c0_8 = arith.constant 0 : index
    %c0_9 = arith.constant 0 : index
    %18 = vector.load %arg4[%c0_8, %c0_9] : memref<8x256xf32, #tpu.memory_space<vmem>>, vector<8x256xf32>
    tpu.vector_store %arg4[%c0_8, %c0_9], %17 {strides = array<i32>} : memref<8x256xf32, #tpu.memory_space<vmem>>, vector<8x256xf32>,
    return
  }
  func.func @transform_0(%arg0: i32) -> (i32, i32) {
    %c0_i32 = arith.constant 0 : i32
    %c0_i32_0 = arith.constant 0 : i32
    return %arg0, %c0_i32 : i32, i32
  }
  func.func @transform_1(%arg0: i32) -> (i32, i32) {
    %c0_i32 = arith.constant 0 : i32
    %c0_i32_0 = arith.constant 0 : i32
    %c0_i32_1 = arith.constant 0 : i32
    return %c0_i32, %c0_i32_0 : i32, i32
  }
  func.func @transform_2(%arg0: i32) -> (i32, i32) {
    %c0_i32 = arith.constant 0 : i32
    %c0_i32_0 = arith.constant 0 : i32
    %c0_i32_1 = arith.constant 0 : i32
    return %c0_i32, %c0_i32_0 : i32, i32
  }
  func.func @transform_3(%arg0: i32) -> (i32, i32) {
    %c0_i32 = arith.constant 0 : i32
    %c0_i32_0 = arith.constant 0 : i32
    return %arg0, %c0_i32 : i32, i32
  }
}

</mosaic_0001>

<bundles_post_ra>
// kernel: tpu_custom_call.1
= control target key start
LH: loop header
LB: loop body
LE: loop exit
PB: predicated region body
PF: predicated region fallthrough
CT: control target
= control target key end

     0   :  { %8 = vsyncpa [#allocation3], 0  ;;  %s7850_s0 = inlined_call_operand.hbm [shape: f32[8,128], index: 0, kind: input, shape index: {}]   ;;  %s7851_s1 = inlined_call_operand.hbm [shape: f32[128,256], index: 1, kind: input, shape index: {}]   ;;  %s7852_s2 = inlined_call_operand.hbm [shape: f32[256,512], index: 2, kind: input, shape index: {}]   ;;  %s7853_s3 = inlined_call_operand.hbm [shape: f32[8,256], index: 3, kind: output, shape index: {}]  }
   0x1   :  { %9 = vsyncpa [#allocation6], 0 }
   0x2   :  { %10 = vsyncpa [#allocation4], 0  ;;  %s4776_s12 = smov [#allocation5]   ;;  %s4682_s16 = scalar_lea.hbm %s7851_s1, 4096 }
   0x3   :  { %s26_s13 = sshll.u32 %s4776_s12, 4  ;;  %p4683_p0 = scmp.ne.s32.totalorder %s7851_s1, %s4682_s16  ;;  %s27_s13 = int_to_ptr.vmem [resolvable:$true] %s26_s13 }
   0x4   :  { %p4686_p1 = scmp.lt.u32.totalorder %s4682_s16, %s7851_s1 }
   0x6   :  { %p4688_p2 = pnand %p4686_p1, %p4683_p0 }
   0x8   :  { %4691 = shalt.err (!%p4688_p2)
}
   0x9   :  { %s4692_s21 = scalar_lea.vmem %s27_s13, 4096  ;;  %p4697_p4 = scmp.lt.s32.totalorder %s27_s13, %s27_s13 }
   0xa   :  { %p4693_p3 = scmp.ne.s32.totalorder %s27_s13, %s4692_s21  ;;  %p4698_p5 = scmp.lt.s32.totalorder %s4692_s21, %s4692_s21 }
   0xc   :  { %p4699_p6 = por %p4698_p5, %p4697_p4 }
   0xe   :  { %p4700_p7 = pnand %p4699_p6, %p4693_p3 }
  0x10   :  { %4703 = shalt.err (!%p4700_p7)
}
  0x11   :  { %s4777_s22 = smov 256   ;;  %s4778_s23 = smov 16  }
  0x12   :  { %32 = dma.hbm_to_vmem [thread:$0]  %s7851_s1, 4096, %s27_s13, [#allocation6], %s4777_s22, %s4777_s22, %s4778_s23  }
  0x13   :  { %s4779_s26 = smov [#allocation2]   ;;  %s4780_s28 = smov [#allocation7]  }
  0x14   :  { %s17_s27 = sshll.u32 %s4779_s26, 4  ;;  %s38_s29 = sshll.u32 %s4780_s28, 4  ;;  %s18_s27 = int_to_ptr.vmem [resolvable:$true] %s17_s27  ;;  %s39_s29 = int_to_ptr.vmem [resolvable:$true] %s38_s29 }
  0x15   :  { %s4704_s5 = scalar_lea.hbm %s7850_s0, 128 }
  0x16   :  { %p4705_p8 = scmp.ne.s32.totalorder %s7850_s0, %s4704_s5  ;;  %p4708_p9 = scmp.lt.u32.totalorder %s4704_s5, %s7850_s0 }
  0x18   :  { %p4710_p10 = pnand %p4708_p9, %p4705_p8 }
  0x1a   :  { %4713 = shalt.err (!%p4710_p10)
}
  0x1b   :  { %s4714_s1 = scalar_lea.vmem %s18_s27, 128  ;;  %p4719_p12 = scmp.lt.s32.totalorder %s18_s27, %s18_s27 }
  0x1c   :  { %p4715_p11 = scmp.ne.s32.totalorder %s18_s27, %s4714_s1  ;;  %p4720_p13 = scmp.lt.s32.totalorder %s4714_s1, %s4714_s1 }
  0x1e   :  { %p4721_p0 = por %p4720_p13, %p4719_p12 }
  0x20   :  { %p4722_p1 = pnand %p4721_p0, %p4715_p11 }
  0x22   :  { %4725 = shalt.err (!%p4722_p1)
}
  0x23   :  { %20 = dma.hbm_to_vmem [thread:$0]  %s7850_s0, 128, %s18_s27, [#allocation3]  }
  0x24   :  { %s4726_s14 = scalar_lea.hbm %s7852_s2, 16384 }
  0x25   :  { %p4727_p2 = scmp.ne.s32.totalorder %s7852_s2, %s4726_s14  ;;  %p4730_p3 = scmp.lt.u32.totalorder %s4726_s14, %s7852_s2 }
  0x27   :  { %p4732_p4 = pnand %p4730_p3, %p4727_p2 }
  0x29   :  { %4735 = shalt.err (!%p4732_p4)
}
  0x2a   :  { %s4736_s19 = scalar_lea.vmem %s39_s29, 16384  ;;  %p4741_p6 = scmp.lt.s32.totalorder %s39_s29, %s39_s29 }
  0x2b   :  { %p4737_p5 = scmp.ne.s32.totalorder %s39_s29, %s4736_s19  ;;  %p4742_p7 = scmp.lt.s32.totalorder %s4736_s19, %s4736_s19 }
  0x2d   :  { %p4743_p8 = por %p4742_p7, %p4741_p6 }
  0x2f   :  { %p4744_p9 = pnand %p4743_p8, %p4737_p5 }
  0x31   :  { %4747 = shalt.err (!%p4744_p9)
}
  0x32   :  { %s4781_s0 = smov 512   ;;  %s4782_s20 = smov 32  }
  0x33   :  { %44 = dma.hbm_to_vmem [thread:$0]  %s7852_s2, 16384, %s39_s29, [#allocation6], %s4781_s0, %s4781_s0, %s4782_s20  }
  0x34   :  { %4770 = dma.done.wait [#allocation3], 128  }
  0x35   :  { %4771 = vsyncadd [#allocation3], 4294967168 }
  0x36   :  { %4772 = dma.done.wait [#allocation6], 20480  }
  0x37   :  { %4773 = vsyncadd [#allocation6], 4294946816  ;;  %v7865_v0 = vmov 0.0   ;;  %v4843_v1 = vld [vmem:[#allocation5 + $0x8] sm:$0xff]  ;;  %v4845_v2 = vld [vmem:[#allocation5 + $0x18] sm:$0xff]  ;;  %s4784_s2 = smov [#allocation8]  }
  0x38   :  { %419 = vmatprep.mubr.f32.mxu0 %v7865_v0  ;;  %183 = vmatprep.mubr.f32.mxu1 %v7865_v0  ;;  %v4847_v3 = vld [vmem:[#allocation5] sm:$0xff]  ;;  %v7898_v4 = vand.u32 4294901760, %v4843_v1  ;;  %v7896_v5 = vand.u32 4294901760, %v4845_v2  ;;  %v4851_v6 = vld [vmem:[#allocation5 + $0x10] sm:$0xff]  ;;  %v4854_v8 = vld [vmem:[#allocation5 + $0x28] sm:$0xff]  ;;  %s3665_s23 = sshll.u32 %s4784_s2, 4  ;;  %s3666_s23 = int_to_ptr.vmem [resolvable:$true] %s3665_s23 }
  0x39   :  { %v7894_v7 = vand.u32 4294901760, %v4847_v3  ;;  %v4856_v9 = vld [vmem:[#allocation5 + $0x38] sm:$0xff]  ;;  %v7892_v10 = vand.u32 4294901760, %v4851_v6  ;;  %v7891_v11 = vand.u32 4294901760, %v4854_v8  ;;  %v4861_v13 = vld [vmem:[#allocation5 + $0x20] sm:$0xff]  ;;  %v4863_v14 = vld [vmem:[#allocation5 + $0x30] sm:$0xff]  ;;  %p4753_p11 = scmp.lt.s32.totalorder %s3666_s23, %s3666_s23 }
  0x3a   :  { %v7888_v12 = vand.u32 4294901760, %v4856_v9  ;;  %v4868_v15 = vsub.f32 %v4843_v1, %v7898_v4  ;;  %v4873_v16 = vsub.f32 %v4845_v2, %v7896_v5  ;;  %v7887_v18 = vand.u32 4294901760, %v4861_v13  ;;  %v4933_v39 = vld [vmem:[#allocation5 + $0x48] sm:$0xff]  ;;  %v4935_v40 = vld [vmem:[#allocation5 + $0x58] sm:$0xff]  ;;  %v4940_v45 = vld [vmem:[#allocation5 + $0x40] sm:$0xff]  ;;  %s4748_s24 = scalar_lea.vmem %s3666_s23, 256 }
  0x3b   :  { %v4878_v17 = vsub.f32 %v4847_v3, %v7894_v7  ;;  %v4884_v19 = vsub.f32 %v4851_v6, %v7892_v10  ;;  %v4889_v20 = vsub.f32 %v4854_v8, %v7891_v11  ;;  %v7884_v22 = vand.u32 4294901760, %v4863_v14  ;;  %v4945_v50 = vld [vmem:[#allocation5 + $0x50] sm:$0xff]  ;;  %v4947_v51 = vld [vmem:[#allocation5 + $0x68] sm:$0xff]  ;;  %v4951_v56 = vld [vmem:[#allocation5 + $0x78] sm:$0xff]  ;;  %p4749_p10 = scmp.ne.s32.totalorder %s3666_s23, %s4748_s24  ;;  %p4754_p12 = scmp.lt.s32.totalorder %s4748_s24, %s4748_s24 }
  0x3c   :  { %v4894_v21 = vsub.f32 %v4856_v9, %v7888_v12  ;;  %v7876_v23 = vand.u32 4294901760, %v4868_v15  ;;  %v7873_v24 = vand.u32 4294901760, %v4873_v16  ;;  %v4903_v26 = vsub.f32 %v4861_v13, %v7887_v18  ;;  %8504 = vst [vmem:[#allocation12_spill] sm:$0xff] %v4951_v56  ;;  %v4953_v57 = vld [vmem:[#allocation5 + $0x60] sm:$0xff]  ;;  %v5105_v18 = vld [vmem:[#allocation5 + $0xc8] sm:$0xff] }
  0x3d   :  { %v7872_v25 = vand.u32 4294901760, %v4878_v17  ;;  %v7871_v27 = vand.u32 4294901760, %v4884_v19  ;;  %v7869_v28 = vand.u32 4294901760, %v4889_v20  ;;  %v4911_v30 = vsub.f32 %v4863_v14, %v7884_v22  ;;  %8505 = vst [vmem:[#allocation13_spill] sm:$0xff] %v4953_v57  ;;  %v5036_v0 = vld [vmem:[#allocation5 + $0x80] sm:$0xff]  ;;  %8515 = vst [vmem:[#allocation23_spill] sm:$0xff] %v5105_v18  ;;  %p4755_p13 = por %p4754_p12, %p4753_p11 }
  0x3e   :  { %v7868_v29 = vand.u32 4294901760, %v4894_v21  ;;  %v198_v31 = vsub.f32 %v4868_v15, %v7876_v23  ;;  %v210_v32 = vsub.f32 %v4873_v16, %v7873_v24  ;;  %v7863_v34 = vand.u32 4294901760, %v4903_v26  ;;  %8509 = vst [vmem:[#allocation17_spill] sm:$0xff] %v5036_v0  ;;  %v5047_v23 = vld [vmem:[#allocation5 + $0xb8] sm:$0xff]  ;;  %v5129_v4 = vld [vmem:[#allocation5 + $0xc0] sm:$0xff] }
  0x3f   :  { %v204_v33 = vsub.f32 %v4878_v17, %v7872_v25  ;;  %v216_v35 = vsub.f32 %v4884_v19, %v7871_v27  ;;  %v222_v36 = vsub.f32 %v4889_v20, %v7869_v28  ;;  %v7862_v38 = vand.u32 4294901760, %v4911_v30  ;;  %8512 = vst [vmem:[#allocation20_spill] sm:$0xff] %v5047_v23  ;;  %8517 = vst [vmem:[#allocation25_spill] sm:$0xff] %v5129_v4  ;;  %p4756_p0 = pnand %p4755_p13, %p4749_p10 }
  0x40   :  { %v234_v37 = vsub.f32 %v4894_v21, %v7868_v29  ;;  %v199_v41 = vand.u32 4294901760, %v198_v31  ;;  %v211_v42 = vand.u32 4294901760, %v210_v32  ;;  %v228_v44 = vsub.f32 %v4903_v26, %v7863_v34 }
  0x41   :  { %v205_v43 = vand.u32 4294901760, %v204_v33  ;;  %v217_v46 = vand.u32 4294901760, %v216_v35  ;;  %v223_v47 = vand.u32 4294901760, %v222_v36  ;;  %v240_v49 = vsub.f32 %v4911_v30, %v7862_v38  ;;  %v4968_v33 = vld [vmem:[#allocation5 + $0x70] sm:$0xff]  ;;  %v5027_v38 = vld [vmem:[#allocation5 + $0x98] sm:$0xff] }
  0x42   :  { %v235_v48 = vand.u32 4294901760, %v234_v37  ;;  %v3707_v52 = vpack.c.bf16 %v211_v42, %v199_v41  ;;  %v229_v53 = vand.u32 4294901760, %v228_v44  ;;  %v7883_v54 = vand.u32 4294901760, %v4933_v39  ;;  %8506 = vst [vmem:[#allocation14_spill] sm:$0xff] %v4968_v33  ;;  %8508 = vst [vmem:[#allocation16_spill] sm:$0xff] %v5027_v38 }
  0x43   :  { %v7877_v55 = vand.u32 4294901760, %v4935_v40  ;;  %v3709_v58 = vpack.c.bf16 %v217_v46, %v205_v43  ;;  %v241_v60 = vand.u32 4294901760, %v240_v49  ;;  %v7858_v61 = vand.u32 4294901760, %v4940_v45 }
  0x44   :  { %v3711_v59 = vpack.c.bf16 %v235_v48, %v223_v47  ;;  %3708 = vmatprep.subr.bf16.mxu0 %v3707_v52  ;;  %v4959_v62 = vsub.f32 %v4933_v39, %v7883_v54  ;;  %v7857_v31 = vand.u32 4294901760, %v4945_v50  ;;  %v7856_v32 = vand.u32 4294901760, %v4947_v51 }
  0x45   :  { %v4964_v63 = vsub.f32 %v4935_v40, %v7877_v55  ;;  %3710 = vmatpush1.bf16.msra.mxu0 %v3709_v58  ;;  %v3713_v35 = vpack.c.bf16 %v241_v60, %v229_v53  ;;  %v4973_v36 = vsub.f32 %v4940_v45, %v7858_v61  ;;  %v7854_v37 = vand.u32 4294901760, %v4951_v56  ;;  %v5019_v61 = vld [vmem:[#allocation5 + $0x88] sm:$0xff] }
  0x46   :  { %v7855_v41 = vand.u32 4294901760, %v4953_v57  ;;  %3712 = vmatprep.subr.bf16.mxu0 %v3711_v59  ;;  %v7860_v42 = vand.u32 4294901760, %v4959_v62  ;;  %v4982_v44 = vsub.f32 %v4945_v50, %v7857_v31  ;;  %v4987_v46 = vsub.f32 %v4947_v51, %v7856_v32  ;;  %8507 = vst [vmem:[#allocation15_spill] sm:$0xff] %v5019_v61 }
  0x47   :  { %v7859_v43 = vand.u32 4294901760, %v4964_v63  ;;  %v7861_v47 = vand.u32 4294901760, %v4973_v36  ;;  %v4993_v48 = vsub.f32 %v4951_v56, %v7854_v37  ;;  %v7864_v49 = vand.u32 4294901760, %v4968_v33 }
  0x48   :  { %v4999_v52 = vsub.f32 %v4953_v57, %v7855_v41  ;;  %v246_v53 = vsub.f32 %v4959_v62, %v7860_v42  ;;  %v7867_v59 = vand.u32 4294901760, %v4982_v44  ;;  %v7870_v60 = vand.u32 4294901760, %v4987_v46 }
  0x49   :  { %v258_v58 = vsub.f32 %v4964_v63, %v7859_v43  ;;  %3714 = vmatpush1.bf16.msra.mxu0 %v3713_v35  ;;  %v252_v37 = vsub.f32 %v4973_v36, %v7861_v47  ;;  %v7874_v41 = vand.u32 4294901760, %v4993_v48  ;;  %v5017_v31 = vsub.f32 %v4968_v33, %v7864_v49 }
  0x4a   :  { %v7875_v32 = vand.u32 4294901760, %v4999_v52  ;;  %v247_v43 = vand.u32 4294901760, %v246_v53  ;;  %v264_v35 = vsub.f32 %v4982_v44, %v7867_v59  ;;  %v270_v47 = vsub.f32 %v4987_v46, %v7870_v60  ;;  %v5038_v59 = vld [vmem:[#allocation5 + $0x90] sm:$0xff] }
  0x4b   :  { %v259_v42 = vand.u32 4294901760, %v258_v58  ;;  %v253_v34 = vand.u32 4294901760, %v252_v37  ;;  %v282_v49 = vsub.f32 %v4993_v48, %v7874_v41  ;;  %v7878_v58 = vand.u32 4294901760, %v5017_v31  ;;  %8510 = vst [vmem:[#allocation18_spill] sm:$0xff] %v5038_v59  ;;  %v5041_v37 = vld [vmem:[#allocation5 + $0xa8] sm:$0xff] }
  0x4c   :  { %v276_v53 = vsub.f32 %v4999_v52, %v7875_v32  ;;  %v265_v28 = vand.u32 4294901760, %v264_v35  ;;  %v271_v60 = vand.u32 4294901760, %v270_v47  ;;  %v7880_v27 = vand.u32 4294901760, %v5019_v61  ;;  %8511 = vst [vmem:[#allocation19_spill] sm:$0xff] %v5041_v37 }
  0x4d   :  { %v3715_v29 = vpack.c.bf16 %v259_v42, %v247_v43  ;;  %v283_v25 = vand.u32 4294901760, %v282_v49  ;;  %v288_v41 = vsub.f32 %v5017_v31, %v7878_v58  ;;  %v7879_v32 = vand.u32 4294901760, %v5027_v38  ;;  %v5056_v49 = vld [vmem:[#allocation5 + $0xa0] sm:$0xff] }
  0x4e   :  { %v277_v24 = vand.u32 4294901760, %v276_v53  ;;  %v3717_v55 = vpack.c.bf16 %v265_v28, %v253_v34  ;;  %v5052_v42 = vsub.f32 %v5019_v61, %v7880_v27  ;;  %v7881_v43 = vand.u32 4294901760, %v5036_v0  ;;  %8513 = vst [vmem:[#allocation21_spill] sm:$0xff] %v5056_v49 }
  0x4f   :  { %3716 = vmatprep.subr.bf16.mxu0 %v3715_v29  ;;  %v7882_v47 = vand.u32 4294901760, %v5038_v59  ;;  %v3719_v35 = vpack.c.bf16 %v283_v25, %v271_v60  ;;  %v289_v53 = vand.u32 4294901760, %v288_v41  ;;  %v5061_v58 = vsub.f32 %v5027_v38, %v7879_v32  ;;  %v5076_v60 = vld [vmem:[#allocation5 + $0xb0] sm:$0xff] }
  0x50   :  { %v7885_v28 = vand.u32 4294901760, %v5041_v37  ;;  %3718 = vmatpush1.bf16.msra.mxu0 %v3717_v55  ;;  %v7886_v29 = vand.u32 4294901760, %v5052_v42  ;;  %v5068_v34 = vsub.f32 %v5036_v0, %v7881_v43  ;;  %v7889_v41 = vand.u32 4294901760, %v5047_v23  ;;  %8514 = vst [vmem:[#allocation22_spill] sm:$0xff] %v5076_v60  ;;  %v5145_v0 = vld [vmem:[#allocation5 + $0xf8] sm:$0xff] }
  0x51   :  { %v5073_v25 = vsub.f32 %v5038_v59, %v7882_v47  ;;  %3720 = vmatprep.subr.bf16.mxu0 %v3719_v35  ;;  %v3721_v32 = vpack.c.bf16 %v289_v53, %v277_v24  ;;  %v7890_v55 = vand.u32 4294901760, %v5061_v58  ;;  %v7893_v43 = vand.u32 4294901760, %v5056_v49  ;;  %8521 = vst [vmem:[#allocation28_spill] sm:$0xff] %v5145_v0 }
  0x52   :  { %v5082_v27 = vsub.f32 %v5041_v37, %v7885_v28  ;;  %v294_v47 = vsub.f32 %v5052_v42, %v7886_v29  ;;  %v7895_v54 = vand.u32 4294901760, %v5068_v34  ;;  %v5093_v24 = vsub.f32 %v5047_v23, %v7889_v41 }
  0x53   :  { %v7897_v22 = vand.u32 4294901760, %v5073_v25  ;;  %v306_v35 = vsub.f32 %v5061_v58, %v7890_v55  ;;  %v7902_v28 = vand.u32 4294901760, %v5076_v60  ;;  %v5103_v29 = vsub.f32 %v5056_v49, %v7893_v43 }
  0x54   :  { %v7899_v53 = vand.u32 4294901760, %v5082_v27  ;;  %3722 = vmatpush1.bf16.msra.mxu0 %v3721_v32  ;;  %v295_v12 = vand.u32 4294901760, %v294_v47  ;;  %v300_v41 = vsub.f32 %v5068_v34, %v7895_v54  ;;  %v7905_v11 = vand.u32 4294901760, %v5093_v24  ;;  %v5123_v47 = vld [vmem:[#allocation5 + $0xd8] sm:$0xff] }
  0x55   :  { %v312_v55 = vsub.f32 %v5073_v25, %v7897_v22  ;;  %v307_v10 = vand.u32 4294901760, %v306_v35  ;;  %v5121_v32 = vsub.f32 %v5076_v60, %v7902_v28  ;;  %8516 = vst [vmem:[#allocation24_spill] sm:$0xff] %v5123_v47  ;;  %v7908_v35 = vand.u32 4294901760, %v5105_v18 }
  0x56   :  { %v318_v43 = vsub.f32 %v5082_v27, %v7899_v53  ;;  %v301_v54 = vand.u32 4294901760, %v300_v41  ;;  %v330_v22 = vsub.f32 %v5093_v24, %v7905_v11  ;;  %v5131_v53 = vld [vmem:[#allocation5 + $0xd0] sm:$0xff]  ;;  %v8519_v23 = vand.u32 4294901760, %v5103_v29  ;;  %v5137_v41 = vld [vmem:[#allocation5 + $0xe8] sm:$0xff] }
  0x57   :  { %v313_v5 = vand.u32 4294901760, %v312_v55  ;;  %8518 = vst [vmem:[#allocation26_spill] sm:$0xff] %v5131_v53  ;;  %v3723_v7 = vpack.c.bf16 %v307_v10, %v295_v12  ;;  %v7909_v60 = vand.u32 4294901760, %v5121_v32  ;;  %8520 = vst [vmem:[#allocation27_spill] sm:$0xff] %v5137_v41  ;;  %v7910_v11 = vand.u32 4294901760, %v5123_v47 }
  0x58   :  { %v319_v49 = vand.u32 4294901760, %v318_v43  ;;  %v324_v28 = vsub.f32 %v5103_v29, %v8519_v23  ;;  %v331_v37 = vand.u32 4294901760, %v330_v22  ;;  %v5143_v59 = vsub.f32 %v5105_v18, %v7908_v35  ;;  %v5152_v22 = vld [vmem:[#allocation5 + $0xe0] sm:$0xff] }
  0x59   :  { %v3725_v55 = vpack.c.bf16 %v313_v5, %v301_v54  ;;  %3724 = vmatprep.subr.bf16.mxu0 %v3723_v7  ;;  %v336_v12 = vsub.f32 %v5121_v32, %v7909_v60  ;;  %v7911_v23 = vand.u32 4294901760, %v5129_v4  ;;  %v7913_v5 = vand.u32 4294901760, %v5131_v53  ;;  %8522 = vst [vmem:[#allocation29_spill] sm:$0xff] %v5152_v22 }
  0x5a   :  { %v325_v10 = vand.u32 4294901760, %v324_v28  ;;  %v3727_v54 = vpack.c.bf16 %v331_v37, %v319_v49  ;;  %v7916_v43 = vand.u32 4294901760, %v5143_v59  ;;  %v5158_v35 = vsub.f32 %v5123_v47, %v7910_v11  ;;  %v5172_v49 = vld [vmem:[#allocation5 + $0xf0] sm:$0xff] }
  0x5b   :  { %3726 = vmatpush1.bf16.msra.mxu0 %v3725_v55  ;;  %v7918_v7 = vand.u32 4294901760, %v5137_v41  ;;  %v337_v28 = vand.u32 4294901760, %v336_v12  ;;  %v5164_v60 = vsub.f32 %v5129_v4, %v7911_v23  ;;  %v5169_v55 = vsub.f32 %v5131_v53, %v7913_v5  ;;  %8523 = vst [vmem:[#allocation30_spill] sm:$0xff] %v5172_v49 }
  0x5c   :  { %3728 = vmatprep.subr.bf16.mxu0 %v3727_v54  ;;  %v342_v11 = vsub.f32 %v5143_v59, %v7916_v43  ;;  %v7920_v12 = vand.u32 4294901760, %v5158_v35  ;;  %v7928_v4 = vand.u32 4294901760, %v5152_v22  ;;  %v8524_v54 = vand.u32 4294901760, %v5145_v0 }
  0x5d   :  { %v5181_v23 = vsub.f32 %v5137_v41, %v7918_v7  ;;  %v3729_v5 = vpack.c.bf16 %v337_v28, %v325_v10  ;;  %v7921_v53 = vand.u32 4294901760, %v5164_v60  ;;  %v7924_v37 = vand.u32 4294901760, %v5169_v55 }
  0x5e   :  { %v5189_v47 = vsub.f32 %v5145_v0, %v8524_v54  ;;  %v343_v43 = vand.u32 4294901760, %v342_v11  ;;  %v354_v18 = vsub.f32 %v5158_v35, %v7920_v12  ;;  %v7932_v41 = vand.u32 4294901760, %v5172_v49 }
  0x5f   :  { %v7931_v7 = vand.u32 4294901760, %v5181_v23  ;;  %3730 = vmatpush1.bf16.msra.mxu0 %v3729_v5  ;;  %v348_v10 = vsub.f32 %v5164_v60, %v7921_v53  ;;  %v360_v28 = vsub.f32 %v5169_v55, %v7924_v37  ;;  %v5206_v11 = vsub.f32 %v5152_v22, %v7928_v4 }
  0x60   :  { %v377_v54 = vand.u32 4294901760, %v5189_v47  ;;  %v355_v12 = vand.u32 4294901760, %v354_v18  ;;  %v5214_v53 = vsub.f32 %v5172_v49, %v7932_v41 }
  0x61   :  { %v366_v5 = vsub.f32 %v5181_v23, %v7931_v7  ;;  %v349_v0 = vand.u32 4294901760, %v348_v10  ;;  %v361_v38 = vand.u32 4294901760, %v360_v28  ;;  %v371_v61 = vand.u32 4294901760, %v5206_v11  ;;  %v5221_v28 = vld [vmem:[#allocation2] sm:$0xff] }
  0x62   :  { %v378_v37 = vsub.f32 %v5189_v47, %v377_v54  ;;  %v3731_v33 = vpack.c.bf16 %v355_v12, %v343_v43  ;;  %v383_v4 = vand.u32 4294901760, %v5214_v53  ;;  %v3739_v43 = vpack.c.bf16 %v4873_v16, %v4868_v15 }
  0x63   :  { %v367_v57 = vand.u32 4294901760, %v366_v5  ;;  %v3733_v18 = vpack.c.bf16 %v361_v38, %v349_v0  ;;  %v372_v56 = vsub.f32 %v5206_v11, %v371_v61  ;;  %v5226_v5 = vand.u32 4294901760, %v5221_v28 }
  0x64   :  { %v379_v22 = vand.u32 4294901760, %v378_v37  ;;  %3732 = vmatprep.subr.bf16.mxu0 %v3731_v33  ;;  %v384_v7 = vsub.f32 %v5214_v53, %v383_v4  ;;  %v3741_v0 = vpack.c.bf16 %v4884_v19, %v4878_v17  ;;  %v8525_v38 = vand.u32 4294901760, %v4843_v1 }
  0x65   :  { %3734 = vmatpush1.bf16.msra.mxu0 %v3733_v18  ;;  %v373_v49 = vand.u32 4294901760, %v372_v56  ;;  %v3743_v33 = vpack.c.bf16 %v4894_v21, %v4889_v20  ;;  %v3747_v1 = vpack.c.bf16 %v4964_v63, %v4959_v62 }
  0x66   :  { %v3735_v41 = vpack.c.bf16 %v379_v22, %v367_v57  ;;  %v385_v10 = vand.u32 4294901760, %v384_v7  ;;  %v8526_v57 = vand.u32 4294901760, %v4845_v2  ;;  %v8527_v22 = vand.u32 4294901760, %v4847_v3 }
  0x67   :  { %v8528_v7 = vand.u32 4294901760, %v4851_v6  ;;  %v8529_v2 = vand.u32 4294901760, %v4854_v8  ;;  %v8533_v3 = vand.u32 4294901760, %v4933_v39  ;;  %v8534_v6 = vand.u32 4294901760, %v4935_v40 }
  0x68   :  { %3736 = vmatprep.subr.bf16.mxu0 %v3735_v41  ;;  %v3737_v12 = vpack.c.bf16 %v385_v10, %v373_v49  ;;  %v5234_v56 = vpack.c.bf16 %v8526_v57, %v8525_v38  ;;  %v3745_v41 = vpack.c.bf16 %v4911_v30, %v4903_v26  ;;  %v8530_v49 = vand.u32 4294901760, %v4856_v9 }
  0x69   :  { %v5244_v37 = vpack.c.bf16 %v8528_v7, %v8527_v22  ;;  %v8531_v10 = vand.u32 4294901760, %v4861_v13  ;;  %v5264_v38 = vpack.c.bf16 %v8534_v6, %v8533_v3  ;;  %v8535_v8 = vand.u32 4294901760, %v4868_v15 }
  0x6a   :  { %3738 = vmatpush1.bf16.msra.mxu0 %v3737_v12  ;;  %v5252_v18 = vpack.c.bf16 %v8530_v49, %v8529_v2  ;;  %3676 = vmatprep.subr.bf16.mxu1 %v5234_v56  ;;  %v8536_v9 = vand.u32 4294901760, %v4873_v16  ;;  %v8537_v13 = vand.u32 4294901760, %v4878_v17  ;;  %v8539_v39 = vand.u32 4294901760, %v4889_v20 }
  0x6b   :  { %3740 = vmatprep.subr.bf16.mxu0 %v3739_v43  ;;  %v8532_v43 = vand.u32 4294901760, %v4863_v14  ;;  %v8538_v14 = vand.u32 4294901760, %v4884_v19  ;;  %v8540_v40 = vand.u32 4294901760, %v4894_v21  ;;  %3678 = vmatpush1.bf16.msra.mxu1 %v5244_v37  ;;  %v8541_v15 = vmov 0.0  }
  0x6c   :  { %v5272_v57 = vpack.c.bf16 %v8536_v9, %v8535_v8  ;;  %v8542_v16 = vand.u32 4294901760, %v4903_v26  ;;  %v8543_v2 = vand.u32 4294901760, %v4911_v30  ;;  %v8544_v19 = vand.u32 4294901760, %v4959_v62  ;;  %3680 = vmatprep.subr.bf16.mxu1 %v5252_v18 }
  0x6d   :  { %v5258_v12 = vpack.c.bf16 %v8532_v43, %v8531_v10  ;;  %421 = vmatmul.mubr.f32.vlgmr.msra.gmra.mrb[0].mxu0 %v5226_v5  ;;  %v5278_v22 = vpack.c.bf16 %v8538_v14, %v8537_v13  ;;  %v5284_v7 = vpack.c.bf16 %v8540_v40, %v8539_v39  ;;  %v8545_v49 = vand.u32 4294901760, %v4964_v63 }
  0x6e   :  { %3742 = vmatpush1.bf16.msra.mxu0 %v3741_v0  ;;  %555 = vmatprep.mubr.f32.mxu0 %v8541_v15  ;;  %v5292_v17 = vpack.c.bf16 %v8543_v2, %v8542_v16  ;;  %v8546_v21 = vand.u32 4294901760, %v4973_v36  ;;  %v8547_v10 = vand.u32 4294901760, %v4982_v44  ;;  %v8548_v0 = vand.u32 4294901760, %v4987_v46 }
  0x6f   :  { %v5298_v20 = vpack.c.bf16 %v8545_v49, %v8544_v19  ;;  %3744 = vmatprep.subr.bf16.mxu0 %v3743_v33  ;;  %v8549_v26 = vand.u32 4294901760, %v4993_v48  ;;  %v8550_v3 = vand.u32 4294901760, %v4999_v52  ;;  %v8551_v62 = vand.u32 4294901760, %v5017_v31  ;;  %3682 = vmatpush1.bf16.msra.mxu1 %v5258_v12 }
  0x70   :  { %v5304_v43 = vpack.c.bf16 %v8547_v10, %v8546_v21  ;;  %v8552_v6 = vand.u32 4294901760, %v5052_v42  ;;  %v8553_v8 = vand.u32 4294901760, %v5061_v58  ;;  %v8554_v33 = vand.u32 4294901760, %v5068_v34  ;;  %3684 = vmatprep.subr.bf16.mxu1 %v5264_v38 }
  0x71   :  { %v5310_v30 = vpack.c.bf16 %v8549_v26, %v8548_v0  ;;  %v5316_v63 = vpack.c.bf16 %v8551_v62, %v8550_v3  ;;  %v8555_v13 = vand.u32 4294901760, %v5073_v25  ;;  %v8556_v39 = vand.u32 4294901760, %v5082_v27 }
  0x72   :  { %v5322_v9 = vpack.c.bf16 %v8553_v8, %v8552_v6  ;;  %v8557_v40 = vand.u32 4294901760, %v5093_v24  ;;  %v8558_v2 = vand.u32 4294901760, %v5103_v29  ;;  %v8559_v19 = vand.u32 4294901760, %v5121_v32  ;;  %3746 = vmatpush1.bf16.msra.mxu0 %v3745_v41 }
  0x73   :  { %v5328_v14 = vpack.c.bf16 %v8555_v13, %v8554_v33  ;;  %v8560_v21 = vand.u32 4294901760, %v5143_v59  ;;  %v8561_v10 = vand.u32 4294901760, %v5158_v35  ;;  %v8562_v26 = vand.u32 4294901760, %v5164_v60  ;;  %3748 = vmatprep.subr.bf16.mxu0 %v3747_v1  ;;  %v8574_v1 = vld [vmem:[#allocation15_spill] sm:$0xff] }
  0x74   :  { %v5334_v16 = vpack.c.bf16 %v8557_v40, %v8556_v39  ;;  %v5340_v49 = vpack.c.bf16 %v8559_v19, %v8558_v2  ;;  %v8563_v3 = vand.u32 4294901760, %v5169_v55  ;;  %v8564_v6 = vand.u32 4294901760, %v5181_v23 }
  0x75   :  { %v5346_v0 = vpack.c.bf16 %v8561_v10, %v8560_v21  ;;  %v5359_v33 = vpack.c.bf16 %v383_v4, %v371_v61  ;;  %v3749_v13 = vpack.c.bf16 %v4982_v44, %v4973_v36  ;;  %v3751_v39 = vpack.c.bf16 %v4993_v48, %v4987_v46  ;;  %v8568_v61 = vld [vmem:[#allocation12_spill] sm:$0xff]  ;;  %v8572_v46 = vld [vmem:[#allocation14_spill] sm:$0xff] }
  0x76   :  { %v5352_v62 = vpack.c.bf16 %v8563_v3, %v8562_v26  ;;  %v5357_v8 = vpack.c.bf16 %v377_v54, %v8564_v6  ;;  %v8565_v40 = vand.u32 4294901760, %v4940_v45  ;;  %v8566_v2 = vand.u32 4294901760, %v4945_v50  ;;  %v8570_v50 = vld [vmem:[#allocation13_spill] sm:$0xff]  ;;  %v8576_v10 = vld [vmem:[#allocation16_spill] sm:$0xff]  ;;  %v8580_v6 = vld [vmem:[#allocation18_spill] sm:$0xff] }
  0x77   :  { %v8567_v4 = vand.u32 4294901760, %v4947_v51  ;;  %v8569_v19 = vand.u32 4294901760, %v8568_v61  ;;  %3750 = vmatpush1.bf16.msra.mxu0 %v3749_v13  ;;  %v3753_v36 = vpack.c.bf16 %v5017_v31, %v4999_v52  ;;  %v3755_v45 = vpack.c.bf16 %v5061_v58, %v5052_v42  ;;  %v8578_v58 = vld [vmem:[#allocation17_spill] sm:$0xff] }
  0x78   :  { %v5371_v54 = vpack.c.bf16 %v8566_v2, %v8565_v40  ;;  %3752 = vmatprep.subr.bf16.mxu0 %v3751_v39  ;;  %v8571_v44 = vand.u32 4294901760, %v8570_v50  ;;  %v8573_v51 = vand.u32 4294901760, %v8572_v46  ;;  %v8575_v21 = vand.u32 4294901760, %v8574_v1  ;;  %v8582_v40 = vld [vmem:[#allocation19_spill] sm:$0xff]  ;;  %v8592_v1 = vld [vmem:[#allocation24_spill] sm:$0xff] }
  0x79   :  { %v5377_v41 = vpack.c.bf16 %v8569_v19, %v8567_v4  ;;  %v8577_v26 = vand.u32 4294901760, %v8576_v10  ;;  %v3757_v31 = vpack.c.bf16 %v5073_v25, %v5068_v34  ;;  %v3759_v52 = vpack.c.bf16 %v5093_v24, %v5082_v27  ;;  %v8584_v4 = vld [vmem:[#allocation20_spill] sm:$0xff]  ;;  %v8586_v25 = vld [vmem:[#allocation21_spill] sm:$0xff]  ;;  %v8590_v46 = vld [vmem:[#allocation23_spill] sm:$0xff] }
  0x7a   :  { %3686 = vmatpush1.bf16.msra.mxu1 %v5371_v54  ;;  %v5389_v48 = vpack.c.bf16 %v8573_v51, %v8571_v44  ;;  %v8579_v42 = vand.u32 4294901760, %v8578_v58  ;;  %v8581_v13 = vand.u32 4294901760, %v8580_v6  ;;  %v8583_v2 = vand.u32 4294901760, %v8582_v40  ;;  %v8598_v58 = vld [vmem:[#allocation27_spill] sm:$0xff]  ;;  %v8600_v6 = vld [vmem:[#allocation28_spill] sm:$0xff] }
  0x7b   :  { %3688 = vmatprep.subr.bf16.mxu1 %v5377_v41  ;;  %v5395_v3 = vpack.c.bf16 %v8577_v26, %v8575_v21  ;;  %3754 = vmatpush1.bf16.msra.mxu0 %v3753_v36  ;;  %v8585_v61 = vand.u32 4294901760, %v8584_v4  ;;  %v3761_v34 = vpack.c.bf16 %v5121_v32, %v5103_v29  ;;  %v3763_v27 = vpack.c.bf16 %v5158_v35, %v5143_v59  ;;  %v8588_v36 = vld [vmem:[#allocation22_spill] sm:$0xff] }
  0x7c   :  { %3756 = vmatprep.subr.bf16.mxu0 %v3755_v45  ;;  %v5407_v39 = vpack.c.bf16 %v8581_v13, %v8579_v42  ;;  %v8587_v24 = vand.u32 4294901760, %v8586_v25  ;;  %v8589_v45 = vand.u32 4294901760, %v8588_v36  ;;  %v185_v44 = vsub.f32 %v5221_v28, %v5226_v5  ;;  %v8594_v28 = vld [vmem:[#allocation25_spill] sm:$0xff]  ;;  %v8596_v26 = vld [vmem:[#allocation26_spill] sm:$0xff] }
  0x7d   :  { %v5413_v19 = vpack.c.bf16 %v8585_v61, %v8583_v2  ;;  %v8591_v51 = vand.u32 4294901760, %v8590_v46  ;;  %v8593_v21 = vand.u32 4294901760, %v8592_v1  ;;  %v3765_v59 = vpack.c.bf16 %v5169_v55, %v5164_v60  ;;  %v8604_v2 = vld [vmem:[#allocation30_spill] sm:$0xff]  ;;  %v952_v46 = vld [vmem:[#allocation7 + $0x8] sm:$0xff] }
  0x7e   :  { %3690 = vmatpush1.bf16.msra.mxu1 %v5389_v48  ;;  %v5425_v50 = vpack.c.bf16 %v8589_v45, %v8587_v24  ;;  %v186_v32 = vand.u32 4294901760, %v185_v44  ;;  %v3767_v35 = vpack.c.bf16 %v5189_v47, %v5181_v23  ;;  %v8595_v10 = vand.u32 4294901760, %v8594_v28  ;;  %v8602_v47 = vld [vmem:[#allocation29_spill] sm:$0xff] }
  0x7f   :  { %3692 = vmatprep.subr.bf16.mxu1 %v5395_v3  ;;  %3758 = vmatpush1.bf16.msra.mxu0 %v3757_v31  ;;  %v5433_v29 = vpack.c.bf16 %v8593_v21, %v8591_v51  ;;  %v8597_v31 = vand.u32 4294901760, %v8596_v26  ;;  %v8599_v42 = vand.u32 4294901760, %v8598_v58  ;;  %v8601_v13 = vand.u32 4294901760, %v8600_v6  ;;  %v956_v51 = vld [vmem:[#allocation7 + $0x28] sm:$0xff] }
  0x80   :  { %3760 = vmatprep.subr.bf16.mxu0 %v3759_v52  ;;  %v187_v60 = vsub.f32 %v185_v44, %v186_v32  ;;  %v3769_v55 = vpack.c.bf16 %v5214_v53, %v5206_v11  ;;  %v8603_v23 = vand.u32 4294901760, %v8602_v47  ;;  %v8605_v4 = vand.u32 4294901760, %v8604_v2  ;;  %v5512_v53 = vld [vmem:[#allocation7 + $0x18] sm:$0xff]  ;;  %v5613_v2 = vld [vmem:[#allocation7 + $0x90] sm:$0xff] }
  0x81   :  { %v5445_v52 = vpack.c.bf16 %v8597_v31, %v8595_v10  ;;  %v5451_v40 = vpack.c.bf16 %v8601_v13, %v8599_v42  ;;  %8606 = vst [vmem:[#allocation12_spill] sm:$0xff] %v5512_v53  ;;  %v5514_v11 = vld [vmem:[#allocation7 + $0x38] sm:$0xff]  ;;  %v1079_v42 = vand.u32 4294901760, %v952_v46  ;;  %v1083_v6 = vand.u32 4294901760, %v956_v51  ;;  %v951_v13 = vld [vmem:[#allocation7] sm:$0xff]  ;;  %8624 = vst [vmem:[#allocation30_spill] sm:$0xff] %v5613_v2 }
  0x82   :  { %3694 = vmatpush1.bf16.msra.mxu1 %v5407_v39  ;;  %v3705_v61 = vpack.c.bf16 %v8605_v4, %v8603_v23  ;;  %8607 = vst [vmem:[#allocation13_spill] sm:$0xff] %v5514_v11  ;;  %v5610_v31 = vld [vmem:[#allocation7 + $0xb8] sm:$0xff]  ;;  %v5615_v4 = vld [vmem:[#allocation7 + $0xb0] sm:$0xff] }
  0x83   :  { %3696 = vmatprep.subr.bf16.mxu1 %v5413_v19  ;;  %3762 = vmatpush1.bf16.msra.mxu0 %v3761_v34  ;;  %v188_v34 = vand.u32 4294901760, %v187_v60  ;;  %8623 = vst [vmem:[#allocation29_spill] sm:$0xff] %v5610_v31  ;;  %8625 = vst [vmem:[#allocation31_spill] sm:$0xff] %v5615_v4 }
  0x84   :  { %3764 = vmatprep.subr.bf16.mxu0 %v3763_v27 }
  0x86   :  { %3698 = vmatpush1.bf16.msra.mxu1 %v5425_v50 }
  0x87   :  { %3700 = vmatprep.subr.bf16.mxu1 %v5433_v29  ;;  %3766 = vmatpush1.bf16.msra.mxu0 %v3765_v59 }
  0x88   :  { %3768 = vmatprep.subr.bf16.mxu0 %v3767_v35 }
  0x8a   :  { %3702 = vmatpush1.bf16.msra.mxu1 %v5445_v52 }
  0x8b   :  { %3704 = vmatprep.subr.bf16.mxu1 %v5451_v40  ;;  %3770 = vmatpush1.bf16.msra.mxu0 %v3769_v55 }
  0x8c   :  { %3772 = vmatprep.subr.bf16.mxu0 %v5234_v56 }
  0x8e   :  { %3706 = vmatpush1.bf16.msra.mxu1 %v3705_v61  ;;  %558 = vmatmul.mubr.f32.vlgmr.msra.gmra.mrb[0].mxu0 %v185_v44 }
  0x8f   :  { %3774 = vmatpush1.bf16.msra.mxu0 %v5244_v37  ;;  %660 = vmatprep.mubr.f32.mxu0 %v8541_v15 }
  0x90   :  { %3776 = vmatprep.subr.bf16.mxu0 %v5252_v18 }
  0x91   :  { %189 = vmatmul.mubr.f32.vlgmr.msra.gmra.mrb[0].mxu1 %v188_v34  ;;  %v5617_v34 = vpack.c.bf16 %v1083_v6, %v1079_v42 }
  0x93   :  { %3778 = vmatpush1.bf16.msra.mxu0 %v5258_v12  ;;  %8626 = vst [vmem:[#allocation32_spill] sm:$0xff] %v5617_v34  ;;  %3868 = vmatprep.subr.bf16.mxu1 %v5617_v34 }
  0x94   :  { %3780 = vmatprep.subr.bf16.mxu0 %v5264_v38 }
  0x97   :  { %3782 = vmatpush1.bf16.msra.mxu0 %v5371_v54 }
  0x98   :  { %3784 = vmatprep.subr.bf16.mxu0 %v5377_v41 }
  0x9b   :  { %3786 = vmatpush1.bf16.msra.mxu0 %v5389_v48 }
  0x9c   :  { %3788 = vmatprep.subr.bf16.mxu0 %v5395_v3 }
  0x9f   :  { %3790 = vmatpush1.bf16.msra.mxu0 %v5407_v39 }
  0xa0   :  { %3792 = vmatprep.subr.bf16.mxu0 %v5413_v19 }
  0xa3   :  { %3794 = vmatpush1.bf16.msra.mxu0 %v5425_v50 }
  0xa4   :  { %3796 = vmatprep.subr.bf16.mxu0 %v5433_v29 }
  0xa7   :  { %3798 = vmatpush1.bf16.msra.mxu0 %v5445_v52 }
  0xa8   :  { %3800 = vmatprep.subr.bf16.mxu0 %v5451_v40 }
  0xab   :  { %3802 = vmatpush1.bf16.msra.mxu0 %v3705_v61 }
  0xac   :  { %3804 = vmatprep.subr.bf16.mxu0 %v5272_v57  ;;  %v5523_v57 = vld [vmem:[#allocation7 + $0x58] sm:$0xff] }
  0xad   :  { %8610 = vst [vmem:[#allocation16_spill] sm:$0xff] %v5523_v57 }
  0xae   :  { %664 = vmatmul.mubr.f32.vlgmr.msra.gmra.mrb[0].mxu0 %v186_v32  ;;  %v5605_v32 = vld [vmem:[#allocation7 + $0x98] sm:$0xff] }
  0xaf   :  { %3806 = vmatpush1.bf16.msra.mxu0 %v5278_v22  ;;  %830 = vmatprep.mubr.f32.mxu0 %v8541_v15  ;;  %v5525_v22 = vld [vmem:[#allocation7 + $0x78] sm:$0xff]  ;;  %8622 = vst [vmem:[#allocation28_spill] sm:$0xff] %v5605_v32  ;;  %v7950_v23 = vand.u32 4294901760, %v5605_v32 }
  0xb0   :  { %3808 = vmatprep.subr.bf16.mxu0 %v5284_v7  ;;  %8611 = vst [vmem:[#allocation17_spill] sm:$0xff] %v5525_v22  ;;  %v7955_v7 = vand.u32 4294901760, %v5523_v57 }
  0xb3   :  { %3810 = vmatpush1.bf16.msra.mxu0 %v5292_v17  ;;  %v5530_v17 = vld [vmem:[#allocation7 + $0x50] sm:$0xff] }
  0xb4   :  { %3812 = vmatprep.subr.bf16.mxu0 %v5298_v20  ;;  %8612 = vst [vmem:[#allocation18_spill] sm:$0xff] %v5530_v17  ;;  %v5532_v20 = vld [vmem:[#allocation7 + $0x70] sm:$0xff] }
  0xb5   :  { %8613 = vst [vmem:[#allocation19_spill] sm:$0xff] %v5532_v20 }
  0xb7   :  { %3814 = vmatpush1.bf16.msra.mxu0 %v5304_v43 }
  0xb8   :  { %3816 = vmatprep.subr.bf16.mxu0 %v5310_v30 }
  0xbb   :  { %3818 = vmatpush1.bf16.msra.mxu0 %v5316_v63 }
  0xbc   :  { %3820 = vmatprep.subr.bf16.mxu0 %v5322_v9  ;;  %v7953_v9 = vand.u32 4294901760, %v5530_v17 }
  0xbf   :  { %3822 = vmatpush1.bf16.msra.mxu0 %v5328_v14 }
  0xc0   :  { %3824 = vmatprep.subr.bf16.mxu0 %v5334_v16  ;;  %v5558_v16 = vsub.f32 %v5523_v57, %v7955_v7 }
  0xc2   :  { %8618 = vst [vmem:[#allocation24_spill] sm:$0xff] %v5558_v16 }
  0xc3   :  { %3826 = vmatpush1.bf16.msra.mxu0 %v5340_v49 }
  0xc4   :  { %3828 = vmatprep.subr.bf16.mxu0 %v5346_v0  ;;  %v7951_v0 = vand.u32 4294901760, %v5532_v20 }
  0xc7   :  { %3830 = vmatpush1.bf16.msra.mxu0 %v5352_v62 }
  0xc8   :  { %3832 = vmatprep.subr.bf16.mxu0 %v5357_v8 }
  0xcb   :  { %3834 = vmatpush1.bf16.msra.mxu0 %v5359_v33 }
  0xcc   :  { %3836 = vmatprep.subr.bf16.mxu0 %v5234_v56  ;;  %v5516_v56 = vld [vmem:[#allocation7 + $0x10] sm:$0xff] }
  0xcd   :  { %8608 = vst [vmem:[#allocation14_spill] sm:$0xff] %v5516_v56 }
  0xce   :  { %832 = vmatmul.mubr.f32.vlgmr.msra.gmra.mrb[0].mxu0 %v5226_v5 }
  0xcf   :  { %3838 = vmatpush1.bf16.msra.mxu0 %v5244_v37  ;;  %934 = vmatprep.mubr.f32.mxu0 %v8541_v15  ;;  %v7962_v37 = vand.u32 4294901760, %v5512_v53  ;;  %v7954_v15 = vand.u32 4294901760, %v5525_v22 }
  0xd0   :  { %3840 = vmatprep.subr.bf16.mxu0 %v5252_v18  ;;  %v7960_v18 = vand.u32 4294901760, %v5514_v11 }
  0xd1   :  { %v5537_v43 = vsub.f32 %v5512_v53, %v7962_v37  ;;  %v5563_v49 = vsub.f32 %v5525_v22, %v7954_v15  ;;  %v5739_v37 = vld [vmem:[#allocation7 + $0x130] sm:$0xff] }
  0xd2   :  { %v5542_v30 = vsub.f32 %v5514_v11, %v7960_v18  ;;  %v967_v18 = vld [vmem:[#allocation7 + $0x80] sm:$0xff]  ;;  %8650 = vst [vmem:[#allocation56_spill] sm:$0xff] %v5739_v37 }
  0xd3   :  { %3842 = vmatpush1.bf16.msra.mxu0 %v5258_v12  ;;  %v5520_v12 = vld [vmem:[#allocation7 + $0x30] sm:$0xff]  ;;  %8614 = vst [vmem:[#allocation20_spill] sm:$0xff] %v5537_v43  ;;  %8619 = vst [vmem:[#allocation25_spill] sm:$0xff] %v5563_v49  ;;  %v7943_v62 = vand.u32 4294901760, %v5537_v43 }
  0xd4   :  { %3844 = vmatprep.subr.bf16.mxu0 %v5264_v38  ;;  %8609 = vst [vmem:[#allocation15_spill] sm:$0xff] %v5520_v12  ;;  %v7958_v38 = vand.u32 4294901760, %v5516_v56  ;;  %8615 = vst [vmem:[#allocation21_spill] sm:$0xff] %v5542_v30  ;;  %v7942_v8 = vand.u32 4294901760, %v5542_v30 }
  0xd6   :  { %v5547_v63 = vsub.f32 %v5516_v56, %v7958_v38  ;;  %v2523_v27 = vsub.f32 %v5542_v30, %v7942_v8  ;;  %v5862_v56 = vld [vmem:[#allocation7 + $0x190] sm:$0xff] }
  0xd7   :  { %3846 = vmatpush1.bf16.msra.mxu0 %v5371_v54  ;;  %v5572_v54 = vsub.f32 %v5530_v17, %v7953_v9  ;;  %8685 = vst [vmem:[#allocation83_spill] sm:$0xff] %v5862_v56 }
  0xd8   :  { %3848 = vmatprep.subr.bf16.mxu0 %v5377_v41  ;;  %8616 = vst [vmem:[#allocation22_spill] sm:$0xff] %v5547_v63  ;;  %v7940_v33 = vand.u32 4294901760, %v5547_v63  ;;  %v2524_v21 = vand.u32 4294901760, %v2523_v27  ;;  %v5621_v27 = vsub.f32 %v956_v51, %v1083_v6  ;;  %v7947_v51 = vand.u32 4294901760, %v5613_v2 }
  0xd9   :  { %8620 = vst [vmem:[#allocation26_spill] sm:$0xff] %v5572_v54  ;;  %v7935_v24 = vand.u32 4294901760, %v5572_v54 }
  0xda   :  { %v2517_v25 = vsub.f32 %v5547_v63, %v7940_v33  ;;  %v5652_v6 = vsub.f32 %v5613_v2, %v7947_v51 }
  0xdb   :  { %3850 = vmatpush1.bf16.msra.mxu0 %v5389_v48  ;;  %v7938_v48 = vand.u32 4294901760, %v5558_v16  ;;  %v2541_v59 = vsub.f32 %v5572_v54, %v7935_v24 }
  0xdc   :  { %3852 = vmatprep.subr.bf16.mxu0 %v5395_v3  ;;  %v7936_v3 = vand.u32 4294901760, %v5563_v49  ;;  %8632 = vst [vmem:[#allocation38_spill] sm:$0xff] %v5652_v6  ;;  %v7949_v24 = vand.u32 4294901760, %v5652_v6 }
  0xdd   :  { %v2535_v45 = vsub.f32 %v5558_v16, %v7938_v48  ;;  %v2542_v58 = vand.u32 4294901760, %v2541_v59  ;;  %v5674_v48 = vld [vmem:[#allocation7 + $0xd0] sm:$0xff] }
  0xde   :  { %8636 = vst [vmem:[#allocation42_spill] sm:$0xff] %v5674_v48 }
  0xdf   :  { %3854 = vmatpush1.bf16.msra.mxu0 %v5407_v39  ;;  %v5580_v39 = vsub.f32 %v5532_v20, %v7951_v0  ;;  %v2536_v28 = vand.u32 4294901760, %v2535_v45  ;;  %v5627_v45 = vsub.f32 %v5605_v32, %v7950_v23  ;;  %v972_v0 = vld [vmem:[#allocation7 + $0xa8] sm:$0xff]  ;;  %v5809_v20 = vld [vmem:[#allocation7 + $0x170] sm:$0xff] }
  0xe0   :  { %3856 = vmatprep.subr.bf16.mxu0 %v5413_v19  ;;  %v2511_v19 = vsub.f32 %v5537_v43, %v7943_v62  ;;  %8671 = vst [vmem:[#allocation72_spill] sm:$0xff] %v5809_v20 }
  0xe1   :  { %8621 = vst [vmem:[#allocation27_spill] sm:$0xff] %v5580_v39  ;;  %v7934_v44 = vand.u32 4294901760, %v5580_v39  ;;  %8627 = vst [vmem:[#allocation33_spill] sm:$0xff] %v5627_v45 }
  0xe2   :  { %v2512_v1 = vand.u32 4294901760, %v2511_v19  ;;  %v5619_v19 = vsub.f32 %v952_v46, %v1079_v42 }
  0xe3   :  { %3858 = vmatpush1.bf16.msra.mxu0 %v5425_v50  ;;  %v2547_v50 = vsub.f32 %v5563_v49, %v7936_v3  ;;  %v2553_v26 = vsub.f32 %v5580_v39, %v7934_v44 }
  0xe4   :  { %3860 = vmatprep.subr.bf16.mxu0 %v5433_v29  ;;  %v2518_v29 = vand.u32 4294901760, %v2517_v25  ;;  %v7948_v25 = vand.u32 4294901760, %v5610_v31 }
  0xe5   :  { %v2548_v10 = vand.u32 4294901760, %v2547_v50  ;;  %v2554_v47 = vand.u32 4294901760, %v2553_v26  ;;  %v1081_v50 = vand.u32 4294901760, %v951_v13 }
  0xe6   :  { %v5633_v46 = vsub.f32 %v5610_v31, %v7948_v25 }
  0xe7   :  { %3862 = vmatpush1.bf16.msra.mxu0 %v5445_v52  ;;  %v4315_v52 = vpack.c.bf16 %v2524_v21, %v2512_v1  ;;  %v4319_v55 = vpack.c.bf16 %v2548_v10, %v2536_v28  ;;  %v964_v21 = vld [vmem:[#allocation7 + $0x68] sm:$0xff]  ;;  %v5639_v28 = vld [vmem:[#allocation7 + $0xf8] sm:$0xff]  ;;  %v7937_v10 = vand.u32 4294901760, %v5627_v45 }
  0xe8   :  { %3864 = vmatprep.subr.bf16.mxu0 %v5451_v40  ;;  %v955_v40 = vld [vmem:[#allocation7 + $0x20] sm:$0xff]  ;;  %8628 = vst [vmem:[#allocation34_spill] sm:$0xff] %v5633_v46  ;;  %8630 = vst [vmem:[#allocation36_spill] sm:$0xff] %v5639_v28  ;;  %v7941_v42 = vand.u32 4294901760, %v5633_v46 }
  0xe9   :  { %v1085_v1 = vand.u32 4294901760, %v955_v40 }
  0xea   :  { %v2571_v44 = vsub.f32 %v5633_v46, %v7941_v42 }
  0xeb   :  { %3866 = vmatpush1.bf16.msra.mxu0 %v3705_v61  ;;  %v960_v61 = vld [vmem:[#allocation7 + $0x48] sm:$0xff]  ;;  %v5642_v26 = vpack.c.bf16 %v1085_v1, %v1081_v50 }
  0xec   :  { %4316 = vmatprep.subr.bf16.mxu0 %v4315_v52  ;;  %v1087_v59 = vand.u32 4294901760, %v960_v61  ;;  %v5644_v52 = vsub.f32 %v951_v13, %v1081_v50  ;;  %v2559_v13 = vsub.f32 %v5627_v45, %v7937_v10  ;;  %v7946_v50 = vand.u32 4294901760, %v5639_v28  ;;  %v963_v10 = vld [vmem:[#allocation7 + $0x60] sm:$0xff] }
  0xed   :  { %8631 = vst [vmem:[#allocation37_spill] sm:$0xff] %v5642_v26  ;;  %3870 = vmatpush1.bf16.msra.mxu1 %v5642_v26  ;;  %v2572_v8 = vand.u32 4294901760, %v2571_v44  ;;  %v7961_v44 = vand.u32 4294901760, %v5674_v48 }
  0xee   :  { %936 = vmatmul.mubr.f32.vlgmr.msra.gmra.mrb[0].mxu0 %v5226_v5  ;;  %v7956_v5 = vand.u32 4294901760, %v5520_v12  ;;  %v5686_v42 = vsub.f32 %v5639_v28, %v7946_v50  ;;  %v968_v50 = vld [vmem:[#allocation7 + $0x88] sm:$0xff]  ;;  %v8664_v28 = vand.u32 4294901760, %v5739_v37 }
  0xf0   :  { %v5553_v14 = vsub.f32 %v5520_v12, %v7956_v5  ;;  %8639 = vst [vmem:[#allocation45_spill] sm:$0xff] %v5686_v42  ;;  %v7959_v62 = vand.u32 4294901760, %v5686_v42 }
  0xf2   :  { %8617 = vst [vmem:[#allocation23_spill] sm:$0xff] %v5553_v14  ;;  %v7939_v41 = vand.u32 4294901760, %v5553_v14  ;;  %v2595_v15 = vsub.f32 %v5686_v42, %v7959_v62 }
  0xf4   :  { %v2529_v36 = vsub.f32 %v5553_v14, %v7939_v41  ;;  %v2596_v62 = vand.u32 4294901760, %v2595_v15  ;;  %v5737_v15 = vld [vmem:[#allocation7 + $0x110] sm:$0xff] }
  0xf5   :  { %8649 = vst [vmem:[#allocation55_spill] sm:$0xff] %v5737_v15 }
  0xf6   :  { %v2530_v35 = vand.u32 4294901760, %v2529_v36  ;;  %v4321_v36 = vpack.c.bf16 %v2554_v47, %v2542_v58  ;;  %v5646_v58 = vsub.f32 %v955_v40, %v1085_v1  ;;  %v5663_v40 = vsub.f32 %v960_v61, %v1087_v59  ;;  %v959_v1 = vld [vmem:[#allocation7 + $0x40] sm:$0xff] }
  0xf7   :  { %v2560_v61 = vand.u32 4294901760, %v2559_v13 }
  0xf8   :  { %v4317_v60 = vpack.c.bf16 %v2530_v35, %v2518_v29  ;;  %v7945_v29 = vand.u32 4294901760, %v5615_v4  ;;  %v5637_v35 = vld [vmem:[#allocation7 + $0xd8] sm:$0xff]  ;;  %8634 = vst [vmem:[#allocation40_spill] sm:$0xff] %v5663_v40 }
  0xf9   :  { %8629 = vst [vmem:[#allocation35_spill] sm:$0xff] %v5637_v35  ;;  %v7944_v47 = vand.u32 4294901760, %v5637_v35  ;;  %v4323_v51 = vpack.c.bf16 %v2572_v8, %v2560_v61  ;;  %v5714_v8 = vld [vmem:[#allocation7 + $0x138] sm:$0xff] }
  0xfa   :  { %4318 = vmatpush1.bf16.msra.mxu0 %v4317_v60  ;;  %v5657_v60 = vsub.f32 %v5615_v4, %v7945_v29  ;;  %v5697_v29 = vld [vmem:[#allocation7 + $0xf0] sm:$0xff]  ;;  %8645 = vst [vmem:[#allocation51_spill] sm:$0xff] %v5714_v8  ;;  %v8656_v26 = vand.u32 4294901760, %v5714_v8 }
  0xfb   :  { %4320 = vmatprep.subr.bf16.mxu0 %v4319_v55  ;;  %v1091_v55 = vand.u32 4294901760, %v964_v21  ;;  %v5681_v33 = vsub.f32 %v5637_v35, %v7944_v47  ;;  %v1093_v47 = vand.u32 4294901760, %v963_v10  ;;  %8640 = vst [vmem:[#allocation46_spill] sm:$0xff] %v5697_v29  ;;  %v5789_v35 = vsub.f32 %v5739_v37, %v8664_v28  ;;  %v979_v28 = vld [vmem:[#allocation7 + $0xe0] sm:$0xff]  ;;  %v5799_v37 = vld [vmem:[#allocation7 + $0x150] sm:$0xff] }
  0xfc   :  { %8633 = vst [vmem:[#allocation39_spill] sm:$0xff] %v5657_v60  ;;  %v5757_v34 = vsub.f32 %v5714_v8, %v8656_v26  ;;  %8668 = vst [vmem:[#allocation69_spill] sm:$0xff] %v5799_v37 }
  0xfd   :  { %v5672_v3 = vpack.c.bf16 %v1091_v55, %v1087_v59  ;;  %v5676_v41 = vsub.f32 %v964_v21, %v1091_v55  ;;  %8638 = vst [vmem:[#allocation44_spill] sm:$0xff] %v5681_v33  ;;  %v2565_v59 = vsub.f32 %v5652_v6, %v7949_v24  ;;  %v1089_v55 = vand.u32 4294901760, %v959_v1  ;;  %8665 = vst [vmem:[#allocation66_spill] sm:$0xff] %v5789_v35 }
  0xfe   :  { %4322 = vmatpush1.bf16.msra.mxu0 %v4321_v36  ;;  %v7952_v36 = vand.u32 4294901760, %v5657_v60  ;;  %v7957_v13 = vand.u32 4294901760, %v5681_v33  ;;  %v5712_v5 = vsub.f32 %v963_v10, %v1093_v47  ;;  %v1099_v10 = vand.u32 4294901760, %v972_v0  ;;  %8657 = vst [vmem:[#allocation60_spill] sm:$0xff] %v5757_v34 }
  0xff   :  { %8635 = vst [vmem:[#allocation41_spill] sm:$0xff] %v5672_v3  ;;  %8637 = vst [vmem:[#allocation43_spill] sm:$0xff] %v5676_v41  ;;  %3872 = vmatprep.subr.bf16.mxu1 %v5672_v3  ;;  %v2566_v25 = vand.u32 4294901760, %v2565_v59  ;;  %v5700_v23 = vsub.f32 %v959_v1, %v1089_v55  ;;  %v5710_v7 = vpack.c.bf16 %v1093_v47, %v1089_v55  ;;  %4324 = vmatprep.subr.bf16.mxu0 %v4323_v51 }
 0x100   :  { %v2577_v21 = vsub.f32 %v5657_v60, %v7952_v36  ;;  %v5702_v36 = vld [vmem:[#allocation7 + $0x118] sm:$0xff]  ;;  %v2583_v9 = vsub.f32 %v5681_v33, %v7957_v13  ;;  %8644 = vst [vmem:[#allocation50_spill] sm:$0xff] %v5712_v5  ;;  %v7967_v59 = vand.u32 4294901760, %v5697_v29  ;;  %v1095_v13 = vand.u32 4294901760, %v968_v50  ;;  %v6048_v60 = vld [vmem:[#allocation7 + $0x250] sm:$0xff] }
 0x101   :  { %8641 = vst [vmem:[#allocation47_spill] sm:$0xff] %v5700_v23  ;;  %8642 = vst [vmem:[#allocation48_spill] sm:$0xff] %v5702_v36  ;;  %3874 = vmatpush1.bf16.msra.mxu1 %v5710_v7  ;;  %v7985_v26 = vand.u32 4294901760, %v5757_v34 }
 0x102   :  { %v2578_v24 = vand.u32 4294901760, %v2577_v21  ;;  %8643 = vst [vmem:[#allocation49_spill] sm:$0xff] %v5710_v7  ;;  %v5722_v21 = vsub.f32 %v5674_v48, %v7961_v44  ;;  %v2584_v55 = vand.u32 4294901760, %v2583_v9  ;;  %v5734_v51 = vsub.f32 %v968_v50, %v1095_v13  ;;  %v971_v9 = vld [vmem:[#allocation7 + $0xa0] sm:$0xff]  ;;  %8734 = vst [vmem:[#allocation125_spill] sm:$0xff] %v6048_v60 }
 0x103   :  { %v5741_v47 = vpack.c.bf16 %v1099_v10, %v1095_v13  ;;  %v1101_v13 = vand.u32 4294901760, %v971_v9 }
 0x104   :  { %v4325_v1 = vpack.c.bf16 %v2578_v24, %v2566_v25  ;;  %8646 = vst [vmem:[#allocation52_spill] sm:$0xff] %v5722_v21  ;;  %v5732_v25 = vsub.f32 %v5697_v29, %v7967_v59  ;;  %8648 = vst [vmem:[#allocation54_spill] sm:$0xff] %v5734_v51  ;;  %v4327_v7 = vpack.c.bf16 %v2596_v62, %v2584_v55  ;;  %v8653_v24 = vand.u32 4294901760, %v5702_v36  ;;  %v5769_v29 = vld [vmem:[#allocation7 + $0x158] sm:$0xff] }
 0x105   :  { %8651 = vst [vmem:[#allocation57_spill] sm:$0xff] %v5741_v47  ;;  %v8655_v50 = vand.u32 4294901760, %v5722_v21  ;;  %v1097_v62 = vand.u32 4294901760, %v967_v18  ;;  %3876 = vmatprep.subr.bf16.mxu1 %v5741_v47  ;;  %8659 = vst [vmem:[#allocation62_spill] sm:$0xff] %v5769_v29 }
 0x106   :  { %4326 = vmatpush1.bf16.msra.mxu0 %v4325_v1  ;;  %8647 = vst [vmem:[#allocation53_spill] sm:$0xff] %v5732_v25  ;;  %v5743_v1 = vsub.f32 %v972_v0, %v1099_v10  ;;  %v5748_v3 = vsub.f32 %v5702_v36, %v8653_v24  ;;  %v7978_v44 = vand.u32 4294901760, %v5732_v25  ;;  %v976_v24 = vld [vmem:[#allocation7 + $0xc8] sm:$0xff]  ;;  %v5776_v10 = vsub.f32 %v971_v9, %v1101_v13 }
 0x107   :  { %v2589_v59 = vsub.f32 %v5722_v21, %v8655_v50  ;;  %4328 = vmatprep.subr.bf16.mxu0 %v4327_v7  ;;  %v5767_v8 = vsub.f32 %v967_v18, %v1097_v62  ;;  %v980_v7 = vld [vmem:[#allocation7 + $0xe8] sm:$0xff]  ;;  %v5774_v55 = vpack.c.bf16 %v1101_v13, %v1097_v62  ;;  %v2619_v18 = vsub.f32 %v5757_v34, %v7985_v26  ;;  %v5791_v62 = vld [vmem:[#allocation7 + $0x178] sm:$0xff] }
 0x108   :  { %8652 = vst [vmem:[#allocation58_spill] sm:$0xff] %v5743_v1  ;;  %8654 = vst [vmem:[#allocation59_spill] sm:$0xff] %v5748_v3  ;;  %v7981_v0 = vand.u32 4294901760, %v5748_v3  ;;  %v2601_v36 = vsub.f32 %v5732_v25, %v7978_v44  ;;  %v7993_v26 = vand.u32 4294901760, %v5789_v35 }
 0x109   :  { %v2590_v50 = vand.u32 4294901760, %v2589_v59  ;;  %8658 = vst [vmem:[#allocation61_spill] sm:$0xff] %v5767_v8  ;;  %8660 = vst [vmem:[#allocation63_spill] sm:$0xff] %v5774_v55  ;;  %v8662_v59 = vand.u32 4294901760, %v5737_v15  ;;  %3878 = vmatpush1.bf16.msra.mxu1 %v5774_v55  ;;  %v2620_v2 = vand.u32 4294901760, %v2619_v18 }
 0x10a   :  { %v2607_v47 = vsub.f32 %v5748_v3, %v7981_v0  ;;  %8661 = vst [vmem:[#allocation64_spill] sm:$0xff] %v5776_v10  ;;  %v2602_v44 = vand.u32 4294901760, %v2601_v36  ;;  %v1103_v0 = vand.u32 4294901760, %v976_v24  ;;  %8666 = vst [vmem:[#allocation67_spill] sm:$0xff] %v5791_v62  ;;  %v7999_v36 = vand.u32 4294901760, %v5791_v62 }
 0x10b   :  { %v5781_v48 = vsub.f32 %v5737_v15, %v8662_v59  ;;  %v1107_v59 = vand.u32 4294901760, %v980_v7  ;;  %v975_v15 = vld [vmem:[#allocation7 + $0xc0] sm:$0xff] }
 0x10c   :  { %v2608_v9 = vand.u32 4294901760, %v2607_v47  ;;  %v4329_v4 = vpack.c.bf16 %v2602_v44, %v2590_v50  ;;  %v5797_v31 = vsub.f32 %v976_v24, %v1103_v0  ;;  %v2625_v24 = vsub.f32 %v5789_v35, %v7993_v26 }
 0x10d   :  { %8663 = vst [vmem:[#allocation65_spill] sm:$0xff] %v5781_v48  ;;  %v7992_v13 = vand.u32 4294901760, %v5781_v48  ;;  %v5804_v55 = vpack.c.bf16 %v1107_v59, %v1103_v0  ;;  %v5806_v32 = vsub.f32 %v980_v7, %v1107_v59  ;;  %v8672_v50 = vand.u32 4294901760, %v5769_v29 }
 0x10e   :  { %8667 = vst [vmem:[#allocation68_spill] sm:$0xff] %v5797_v31  ;;  %4330 = vmatpush1.bf16.msra.mxu0 %v4329_v4  ;;  %v4331_v44 = vpack.c.bf16 %v2620_v2, %v2608_v9  ;;  %v5823_v7 = vsub.f32 %v5791_v62, %v7999_v36  ;;  %v1109_v4 = vand.u32 4294901760, %v979_v28  ;;  %v8001_v2 = vand.u32 4294901760, %v5799_v37  ;;  %v984_v9 = vld [vmem:[#allocation7 + $0x108] sm:$0xff] }
 0x10f   :  { %v2613_v47 = vsub.f32 %v5781_v48, %v7992_v13  ;;  %8669 = vst [vmem:[#allocation70_spill] sm:$0xff] %v5804_v55  ;;  %8670 = vst [vmem:[#allocation71_spill] sm:$0xff] %v5806_v32  ;;  %v5817_v18 = vsub.f32 %v5769_v29, %v8672_v50  ;;  %v1105_v13 = vand.u32 4294901760, %v975_v15  ;;  %3880 = vmatprep.subr.bf16.mxu1 %v5804_v55  ;;  %v2626_v59 = vand.u32 4294901760, %v2625_v24  ;;  %v5830_v29 = vld [vmem:[#allocation7 + $0x198] sm:$0xff] }
 0x110   :  { %8674 = vst [vmem:[#allocation74_spill] sm:$0xff] %v5823_v7  ;;  %4332 = vmatprep.subr.bf16.mxu0 %v4331_v44  ;;  %8676 = vst [vmem:[#allocation76_spill] sm:$0xff] %v5830_v29  ;;  %v5835_v36 = vsub.f32 %v979_v28, %v1109_v4  ;;  %v5840_v44 = vsub.f32 %v5799_v37, %v8001_v2  ;;  %v5842_v24 = vld [vmem:[#allocation7 + $0x1b8] sm:$0xff]  ;;  %v8681_v62 = vand.u32 4294901760, %v5809_v20  ;;  %v8683_v28 = vand.u32 4294901760, %v5823_v7 }
 0x111   :  { %8673 = vst [vmem:[#allocation73_spill] sm:$0xff] %v5817_v18  ;;  %v2614_v0 = vand.u32 4294901760, %v2613_v47  ;;  %v8003_v26 = vand.u32 4294901760, %v5817_v18  ;;  %v5827_v17 = vsub.f32 %v975_v15, %v1105_v13  ;;  %v988_v47 = vld [vmem:[#allocation7 + $0x128] sm:$0xff]  ;;  %v5833_v22 = vpack.c.bf16 %v1109_v4, %v1105_v13  ;;  %8680 = vst [vmem:[#allocation80_spill] sm:$0xff] %v5842_v24 }
 0x112   :  { %8678 = vst [vmem:[#allocation78_spill] sm:$0xff] %v5835_v36  ;;  %8679 = vst [vmem:[#allocation79_spill] sm:$0xff] %v5840_v44  ;;  %v5850_v55 = vsub.f32 %v5809_v20, %v8681_v62  ;;  %v1111_v13 = vand.u32 4294901760, %v984_v9  ;;  %v2643_v4 = vsub.f32 %v5823_v7, %v8683_v28  ;;  %v8012_v2 = vand.u32 4294901760, %v5840_v44  ;;  %v987_v20 = vld [vmem:[#allocation7 + $0x120] sm:$0xff] }
 0x113   :  { %8675 = vst [vmem:[#allocation75_spill] sm:$0xff] %v5827_v17  ;;  %8677 = vst [vmem:[#allocation77_spill] sm:$0xff] %v5833_v22  ;;  %v4333_v15 = vpack.c.bf16 %v2626_v59, %v2614_v0  ;;  %v2631_v50 = vsub.f32 %v5817_v18, %v8003_v26  ;;  %3882 = vmatpush1.bf16.msra.mxu1 %v5833_v22  ;;  %v1115_v37 = vand.u32 4294901760, %v988_v47  ;;  %v983_v59 = vld [vmem:[#allocation7 + $0x100] sm:$0xff]  ;;  %v8021_v62 = vand.u32 4294901760, %v5842_v24 }
 0x114   :  { %8682 = vst [vmem:[#allocation81_spill] sm:$0xff] %v5850_v55  ;;  %v8013_v57 = vand.u32 4294901760, %v5850_v55  ;;  %v5859_v12 = vsub.f32 %v984_v9, %v1111_v13  ;;  %v2644_v28 = vand.u32 4294901760, %v2643_v4  ;;  %v2637_v22 = vsub.f32 %v5840_v44, %v8012_v2  ;;  %v5884_v2 = vld [vmem:[#allocation7 + $0x1b0] sm:$0xff] }
 0x115   :  { %4334 = vmatpush1.bf16.msra.mxu0 %v4333_v15  ;;  %v2632_v26 = vand.u32 4294901760, %v2631_v50  ;;  %v5867_v11 = vpack.c.bf16 %v1115_v37, %v1111_v13  ;;  %v5869_v0 = vsub.f32 %v988_v47, %v1115_v37  ;;  %v8688_v9 = vand.u32 4294901760, %v5830_v29  ;;  %8691 = vst [vmem:[#allocation88_spill] sm:$0xff] %v5884_v2 }
 0x116   :  { %8684 = vst [vmem:[#allocation82_spill] sm:$0xff] %v5859_v12  ;;  %v2649_v50 = vsub.f32 %v5850_v55, %v8013_v57  ;;  %v5882_v4 = vsub.f32 %v5842_v24, %v8021_v62  ;;  %v1113_v53 = vand.u32 4294901760, %v983_v59  ;;  %v2638_v37 = vand.u32 4294901760, %v2637_v22  ;;  %v992_v55 = vld [vmem:[#allocation7 + $0x148] sm:$0xff]  ;;  %v5892_v24 = vld [vmem:[#allocation7 + $0x1d8] sm:$0xff] }
 0x117   :  { %8686 = vst [vmem:[#allocation84_spill] sm:$0xff] %v5867_v11  ;;  %8687 = vst [vmem:[#allocation85_spill] sm:$0xff] %v5869_v0  ;;  %v5877_v15 = vsub.f32 %v5830_v29, %v8688_v9  ;;  %v4335_v13 = vpack.c.bf16 %v2644_v28, %v2632_v26  ;;  %3884 = vmatprep.subr.bf16.mxu1 %v5867_v11  ;;  %v1117_v47 = vand.u32 4294901760, %v987_v20  ;;  %v8025_v57 = vand.u32 4294901760, %v5862_v56  ;;  %v996_v62 = vld [vmem:[#allocation7 + $0x168] sm:$0xff] }
 0x118   :  { %8690 = vst [vmem:[#allocation87_spill] sm:$0xff] %v5882_v4  ;;  %v2650_v44 = vand.u32 4294901760, %v2649_v50  ;;  %v5890_v7 = vsub.f32 %v983_v59, %v1113_v53  ;;  %8693 = vst [vmem:[#allocation90_spill] sm:$0xff] %v5892_v24  ;;  %v8038_v26 = vand.u32 4294901760, %v5884_v2  ;;  %v5904_v50 = vld [vmem:[#allocation7 + $0x1f8] sm:$0xff]  ;;  %v1123_v11 = vand.u32 4294901760, %v996_v62 }
 0x119   :  { %8689 = vst [vmem:[#allocation86_spill] sm:$0xff] %v5877_v15  ;;  %v8028_v9 = vand.u32 4294901760, %v5877_v15  ;;  %4336 = vmatprep.subr.bf16.mxu0 %v4335_v13  ;;  %v5894_v18 = vpack.c.bf16 %v1117_v47, %v1113_v53  ;;  %v5896_v22 = vsub.f32 %v987_v20, %v1117_v47  ;;  %v5902_v28 = vsub.f32 %v5862_v56, %v8025_v57 }
 0x11a   :  { %8692 = vst [vmem:[#allocation89_spill] sm:$0xff] %v5890_v7  ;;  %8697 = vst [vmem:[#allocation94_spill] sm:$0xff] %v5904_v50  ;;  %v4337_v29 = vpack.c.bf16 %v2650_v44, %v2638_v37  ;;  %v8698_v13 = vand.u32 4294901760, %v5882_v4  ;;  %v1119_v20 = vand.u32 4294901760, %v992_v55  ;;  %v5917_v57 = vsub.f32 %v5884_v2, %v8038_v26  ;;  %v991_v37 = vld [vmem:[#allocation7 + $0x140] sm:$0xff] }
 0x11b   :  { %8694 = vst [vmem:[#allocation91_spill] sm:$0xff] %v5894_v18  ;;  %8695 = vst [vmem:[#allocation92_spill] sm:$0xff] %v5896_v22  ;;  %v2655_v59 = vsub.f32 %v5877_v15, %v8028_v9  ;;  %3886 = vmatpush1.bf16.msra.mxu1 %v5894_v18  ;;  %v8042_v47 = vand.u32 4294901760, %v5902_v28  ;;  %v5923_v18 = vld [vmem:[#allocation7 + $0x1d0] sm:$0xff]  ;;  %v5931_v44 = vsub.f32 %v996_v62, %v1123_v11 }
 0x11c   :  { %8696 = vst [vmem:[#allocation93_spill] sm:$0xff] %v5902_v28  ;;  %v2667_v53 = vsub.f32 %v5882_v4, %v8698_v13  ;;  %8699 = vst [vmem:[#allocation95_spill] sm:$0xff] %v5917_v57  ;;  %4338 = vmatpush1.bf16.msra.mxu0 %v4337_v29  ;;  %v5920_v15 = vsub.f32 %v992_v55, %v1119_v20  ;;  %v8046_v13 = vand.u32 4294901760, %v5904_v50  ;;  %v995_v4 = vld [vmem:[#allocation7 + $0x160] sm:$0xff]  ;;  %v8050_v26 = vand.u32 4294901760, %v5917_v57  ;;  %v5933_v29 = vld [vmem:[#allocation7 + $0x1f0] sm:$0xff] }
 0x11d   :  { %v2656_v9 = vand.u32 4294901760, %v2655_v59  ;;  %8701 = vst [vmem:[#allocation97_spill] sm:$0xff] %v5923_v18  ;;  %v2661_v35 = vsub.f32 %v5902_v28, %v8042_v47  ;;  %v5929_v2 = vpack.c.bf16 %v1123_v11, %v1119_v20  ;;  %8703 = vst [vmem:[#allocation99_spill] sm:$0xff] %v5931_v44  ;;  %v8705_v55 = vand.u32 4294901760, %v5892_v24 }
 0x11e   :  { %v2668_v56 = vand.u32 4294901760, %v2667_v53  ;;  %8700 = vst [vmem:[#allocation96_spill] sm:$0xff] %v5920_v15  ;;  %8704 = vst [vmem:[#allocation100_spill] sm:$0xff] %v5933_v29  ;;  %v5943_v48 = vsub.f32 %v5904_v50, %v8046_v13  ;;  %v1121_v47 = vand.u32 4294901760, %v991_v37  ;;  %v2673_v11 = vsub.f32 %v5917_v57, %v8050_v26  ;;  %v5955_v50 = vld [vmem:[#allocation7 + $0x218] sm:$0xff] }
 0x11f   :  { %8702 = vst [vmem:[#allocation98_spill] sm:$0xff] %v5929_v2  ;;  %v5938_v53 = vsub.f32 %v5892_v24, %v8705_v55  ;;  %v2662_v28 = vand.u32 4294901760, %v2661_v35  ;;  %3888 = vmatprep.subr.bf16.mxu1 %v5929_v2  ;;  %v1125_v62 = vand.u32 4294901760, %v995_v4  ;;  %v1004_v35 = vld [vmem:[#allocation7 + $0x1a8] sm:$0xff]  ;;  %8709 = vst [vmem:[#allocation104_spill] sm:$0xff] %v5955_v50  ;;  %v8713_v57 = vand.u32 4294901760, %v5933_v29 }
 0x120   :  { %v4339_v59 = vpack.c.bf16 %v2668_v56, %v2656_v9  ;;  %8707 = vst [vmem:[#allocation102_spill] sm:$0xff] %v5943_v48  ;;  %v8055_v56 = vand.u32 4294901760, %v5923_v18  ;;  %v1000_v9 = vld [vmem:[#allocation7 + $0x188] sm:$0xff]  ;;  %v8064_v55 = vand.u32 4294901760, %v5943_v48  ;;  %v5952_v24 = vsub.f32 %v991_v37, %v1121_v47 }
 0x121   :  { %8706 = vst [vmem:[#allocation101_spill] sm:$0xff] %v5938_v53  ;;  %v8057_v20 = vand.u32 4294901760, %v5938_v53  ;;  %v2674_v34 = vand.u32 4294901760, %v2673_v11  ;;  %v5957_v26 = vpack.c.bf16 %v1125_v62, %v1121_v47  ;;  %v5959_v2 = vsub.f32 %v995_v4, %v1125_v62  ;;  %v5977_v11 = vld [vmem:[#allocation7 + $0x238] sm:$0xff] }
 0x122   :  { %4340 = vmatprep.subr.bf16.mxu0 %v4339_v59  ;;  %8708 = vst [vmem:[#allocation103_spill] sm:$0xff] %v5952_v24  ;;  %v5964_v59 = vsub.f32 %v5923_v18, %v8055_v56  ;;  %v2691_v13 = vsub.f32 %v5943_v48, %v8064_v55  ;;  %v5975_v47 = vsub.f32 %v5933_v29, %v8713_v57  ;;  %v1127_v4 = vand.u32 4294901760, %v1000_v9  ;;  %v1003_v57 = vld [vmem:[#allocation7 + $0x1a0] sm:$0xff]  ;;  %v5985_v29 = vld [vmem:[#allocation7 + $0x210] sm:$0xff] }
 0x123   :  { %8710 = vst [vmem:[#allocation105_spill] sm:$0xff] %v5957_v26  ;;  %8711 = vst [vmem:[#allocation106_spill] sm:$0xff] %v5959_v2  ;;  %v2679_v37 = vsub.f32 %v5938_v53, %v8057_v20  ;;  %v4341_v62 = vpack.c.bf16 %v2674_v34, %v2662_v28  ;;  %3890 = vmatpush1.bf16.msra.mxu1 %v5957_v26  ;;  %v1131_v18 = vand.u32 4294901760, %v1004_v35  ;;  %v999_v53 = vld [vmem:[#allocation7 + $0x180] sm:$0xff]  ;;  %v8083_v20 = vand.u32 4294901760, %v5977_v11 }
 0x124   :  { %8712 = vst [vmem:[#allocation107_spill] sm:$0xff] %v5964_v59  ;;  %8714 = vst [vmem:[#allocation108_spill] sm:$0xff] %v5975_v47  ;;  %v8074_v56 = vand.u32 4294901760, %v5964_v59  ;;  %v2692_v25 = vand.u32 4294901760, %v2691_v13  ;;  %v8075_v55 = vand.u32 4294901760, %v5975_v47  ;;  %v5983_v48 = vsub.f32 %v1000_v9, %v1127_v4 }
 0x125   :  { %8715 = vst [vmem:[#allocation109_spill] sm:$0xff] %v5977_v11  ;;  %v2680_v3 = vand.u32 4294901760, %v2679_v37  ;;  %8717 = vst [vmem:[#allocation111_spill] sm:$0xff] %v5985_v29  ;;  %4342 = vmatpush1.bf16.msra.mxu0 %v4341_v62  ;;  %v5990_v28 = vpack.c.bf16 %v1131_v18, %v1127_v4  ;;  %v5992_v26 = vsub.f32 %v1004_v35, %v1131_v18  ;;  %v5995_v37 = vld [vmem:[#allocation7 + $0x230] sm:$0xff]  ;;  %v8721_v21 = vand.u32 4294901760, %v5955_v50 }
 0x126   :  { %8716 = vst [vmem:[#allocation110_spill] sm:$0xff] %v5983_v48  ;;  %v2685_v34 = vsub.f32 %v5964_v59, %v8074_v56  ;;  %8720 = vst [vmem:[#allocation114_spill] sm:$0xff] %v5995_v37  ;;  %v2697_v9 = vsub.f32 %v5975_v47, %v8075_v55  ;;  %v1129_v42 = vand.u32 4294901760, %v999_v53  ;;  %v6009_v18 = vsub.f32 %v5977_v11, %v8083_v20 }
 0x127   :  { %8718 = vst [vmem:[#allocation112_spill] sm:$0xff] %v5990_v28  ;;  %8719 = vst [vmem:[#allocation113_spill] sm:$0xff] %v5992_v26  ;;  %v4343_v13 = vpack.c.bf16 %v2692_v25, %v2680_v3  ;;  %v6003_v62 = vsub.f32 %v5955_v50, %v8721_v21  ;;  %3892 = vmatprep.subr.bf16.mxu1 %v5990_v28  ;;  %v1133_v35 = vand.u32 4294901760, %v1003_v57  ;;  %v8085_v3 = vand.u32 4294901760, %v5985_v29  ;;  %v1008_v25 = vld [vmem:[#allocation7 + $0x1c8] sm:$0xff]  ;;  %v6016_v50 = vld [vmem:[#allocation7 + $0x258] sm:$0xff] }
 0x128   :  { %v2686_v56 = vand.u32 4294901760, %v2685_v34  ;;  %8723 = vst [vmem:[#allocation116_spill] sm:$0xff] %v6009_v18  ;;  %v2698_v4 = vand.u32 4294901760, %v2697_v9  ;;  %v6013_v47 = vsub.f32 %v999_v53, %v1129_v42  ;;  %v1012_v34 = vld [vmem:[#allocation7 + $0x1e8] sm:$0xff]  ;;  %8725 = vst [vmem:[#allocation118_spill] sm:$0xff] %v6016_v50  ;;  %v6028_v9 = vld [vmem:[#allocation7 + $0x278] sm:$0xff] }
 0x129   :  { %8722 = vst [vmem:[#allocation115_spill] sm:$0xff] %v6003_v62  ;;  %4344 = vmatprep.subr.bf16.mxu0 %v4343_v13  ;;  %v8087_v55 = vand.u32 4294901760, %v6003_v62  ;;  %v6019_v59 = vpack.c.bf16 %v1133_v35, %v1129_v42  ;;  %v6021_v20 = vsub.f32 %v1003_v57, %v1133_v35  ;;  %v6026_v13 = vsub.f32 %v5985_v29, %v8085_v3 }
 0x12a   :  { %8724 = vst [vmem:[#allocation117_spill] sm:$0xff] %v6013_v47  ;;  %8729 = vst [vmem:[#allocation122_spill] sm:$0xff] %v6028_v9  ;;  %v4345_v53 = vpack.c.bf16 %v2698_v4, %v2686_v56  ;;  %v8730_v11 = vand.u32 4294901760, %v5995_v37  ;;  %v1135_v42 = vand.u32 4294901760, %v1008_v25  ;;  %v8732_v57 = vand.u32 4294901760, %v6009_v18  ;;  %v1007_v4 = vld [vmem:[#allocation7 + $0x1c0] sm:$0xff] }
 0x12b   :  { %8726 = vst [vmem:[#allocation119_spill] sm:$0xff] %v6019_v59  ;;  %8727 = vst [vmem:[#allocation120_spill] sm:$0xff] %v6021_v20  ;;  %v2703_v21 = vsub.f32 %v6003_v62, %v8087_v55  ;;  %3894 = vmatpush1.bf16.msra.mxu1 %v6019_v59  ;;  %v8101_v3 = vand.u32 4294901760, %v6026_v13  ;;  %v1139_v29 = vand.u32 4294901760, %v1012_v34  ;;  %v1137_v6 = vand.u32 4294901760, %v1007_v4 }
 0x12c   :  { %8728 = vst [vmem:[#allocation121_spill] sm:$0xff] %v6026_v13  ;;  %v6036_v28 = vsub.f32 %v5995_v37, %v8730_v11  ;;  %v2715_v35 = vsub.f32 %v6009_v18, %v8732_v57  ;;  %4346 = vmatpush1.bf16.msra.mxu0 %v4345_v53  ;;  %v6045_v33 = vsub.f32 %v1008_v25, %v1135_v42  ;;  %v8110_v11 = vand.u32 4294901760, %v6028_v9  ;;  %v1011_v37 = vld [vmem:[#allocation7 + $0x1e0] sm:$0xff] }
 0x12d   :  { %v2704_v55 = vand.u32 4294901760, %v2703_v21  ;;  %v2709_v59 = vsub.f32 %v6026_v13, %v8101_v3  ;;  %v6053_v18 = vpack.c.bf16 %v1139_v29, %v1135_v42  ;;  %v6055_v56 = vsub.f32 %v1012_v34, %v1139_v29  ;;  %v6070_v3 = vld [vmem:[#allocation7 + $0x270] sm:$0xff] }
 0x12e   :  { %8731 = vst [vmem:[#allocation123_spill] sm:$0xff] %v6036_v28  ;;  %v8102_v62 = vand.u32 4294901760, %v6036_v28  ;;  %8733 = vst [vmem:[#allocation124_spill] sm:$0xff] %v6045_v33  ;;  %v2716_v57 = vand.u32 4294901760, %v2715_v35  ;;  %v8737_v25 = vand.u32 4294901760, %v6016_v50  ;;  %v6068_v35 = vsub.f32 %v6028_v9, %v8110_v11  ;;  %v1020_v11 = vld [vmem:[#allocation7 + $0x228] sm:$0xff] }
 0x12f   :  { %8735 = vst [vmem:[#allocation126_spill] sm:$0xff] %v6053_v18  ;;  %8736 = vst [vmem:[#allocation127_spill] sm:$0xff] %v6055_v56  ;;  %v2710_v29 = vand.u32 4294901760, %v2709_v59  ;;  %3896 = vmatprep.subr.bf16.mxu1 %v6053_v18  ;;  %v1141_v34 = vand.u32 4294901760, %v1011_v37  ;;  %v6076_v46 = vsub.f32 %v1007_v4, %v1137_v6  ;;  %v6078_v9 = vld [vmem:[#allocation7 + $0x298] sm:$0xff]  ;;  %v8127_v59 = vand.u32 4294901760, %v6070_v3 }
 0x130   :  { %v2721_v21 = vsub.f32 %v6036_v28, %v8102_v62  ;;  %v6063_v53 = vsub.f32 %v6016_v50, %v8737_v25  ;;  %8739 = vst [vmem:[#allocation129_spill] sm:$0xff] %v6068_v35  ;;  %8740 = vst [vmem:[#allocation130_spill] sm:$0xff] %v6070_v3  ;;  %v4347_v42 = vpack.c.bf16 %v2716_v57, %v2704_v55  ;;  %v8114_v62 = vand.u32 4294901760, %v6048_v60  ;;  %v1016_v28 = vld [vmem:[#allocation7 + $0x208] sm:$0xff] }
 0x131   :  { %8741 = vst [vmem:[#allocation131_spill] sm:$0xff] %v6076_v46  ;;  %8742 = vst [vmem:[#allocation132_spill] sm:$0xff] %v6078_v9  ;;  %v6080_v45 = vpack.c.bf16 %v1141_v34, %v1137_v6  ;;  %v6082_v55 = vsub.f32 %v1011_v37, %v1141_v34  ;;  %v1143_v37 = vand.u32 4294901760, %v1016_v28  ;;  %v1147_v18 = vand.u32 4294901760, %v1020_v11  ;;  %v1060_v46 = vld [vmem:[#allocation7 + $0x368] sm:$0xff] }
 0x132   :  { %8738 = vst [vmem:[#allocation128_spill] sm:$0xff] %v6063_v53  ;;  %v2722_v13 = vand.u32 4294901760, %v2721_v21  ;;  %v8117_v25 = vand.u32 4294901760, %v6063_v53  ;;  %4348 = vmatprep.subr.bf16.mxu0 %v4347_v42  ;;  %v6088_v57 = vsub.f32 %v6048_v60, %v8114_v62  ;;  %v6090_v21 = vld [vmem:[#allocation7 + $0x2b8] sm:$0xff]  ;;  %v8747_v42 = vand.u32 4294901760, %v6068_v35 }
 0x133   :  { %8743 = vst [vmem:[#allocation133_spill] sm:$0xff] %v6080_v45  ;;  %8744 = vst [vmem:[#allocation134_spill] sm:$0xff] %v6082_v55  ;;  %3898 = vmatpush1.bf16.msra.mxu1 %v6080_v45  ;;  %v6103_v62 = vsub.f32 %v6070_v3, %v8127_v59  ;;  %v6109_v45 = vld [vmem:[#allocation7 + $0x290] sm:$0xff]  ;;  %v6115_v3 = vpack.c.bf16 %v1147_v18, %v1143_v37  ;;  %v1187_v33 = vand.u32 4294901760, %v1060_v46 }
 0x134   :  { %8745 = vst [vmem:[#allocation135_spill] sm:$0xff] %v6088_v57  ;;  %8746 = vst [vmem:[#allocation136_spill] sm:$0xff] %v6090_v21  ;;  %v4349_v50 = vpack.c.bf16 %v2722_v13, %v2710_v29  ;;  %v2727_v4 = vsub.f32 %v6063_v53, %v8117_v25  ;;  %v2739_v6 = vsub.f32 %v6068_v35, %v8747_v42  ;;  %v8131_v34 = vand.u32 4294901760, %v6088_v57  ;;  %v1015_v29 = vld [vmem:[#allocation7 + $0x200] sm:$0xff] }
 0x135   :  { %8748 = vst [vmem:[#allocation137_spill] sm:$0xff] %v6103_v62  ;;  %v6106_v53 = vsub.f32 %v1016_v28, %v1143_v37  ;;  %v8135_v42 = vand.u32 4294901760, %v6090_v21  ;;  %v1019_v35 = vld [vmem:[#allocation7 + $0x220] sm:$0xff]  ;;  %8750 = vst [vmem:[#allocation139_spill] sm:$0xff] %v6109_v45  ;;  %v8139_v59 = vand.u32 4294901760, %v6103_v62  ;;  %v6117_v13 = vsub.f32 %v1020_v11, %v1147_v18  ;;  %3900 = vmatprep.subr.bf16.mxu1 %v6115_v3 }
 0x136   :  { %4350 = vmatpush1.bf16.msra.mxu0 %v4349_v50  ;;  %v2728_v25 = vand.u32 4294901760, %v2727_v4  ;;  %v2740_v60 = vand.u32 4294901760, %v2739_v6  ;;  %v2733_v39 = vsub.f32 %v6088_v57, %v8131_v34  ;;  %8751 = vst [vmem:[#allocation140_spill] sm:$0xff] %v6115_v3  ;;  %v6119_v50 = vld [vmem:[#allocation7 + $0x2b0] sm:$0xff]  ;;  %v8754_v28 = vand.u32 4294901760, %v6078_v9 }
 0x137   :  { %8749 = vst [vmem:[#allocation138_spill] sm:$0xff] %v6106_v53  ;;  %8752 = vst [vmem:[#allocation141_spill] sm:$0xff] %v6117_v13  ;;  %v6129_v54 = vsub.f32 %v6090_v21, %v8135_v42  ;;  %v1145_v34 = vand.u32 4294901760, %v1015_v29  ;;  %v2745_v18 = vsub.f32 %v6103_v62, %v8139_v59  ;;  %v1149_v11 = vand.u32 4294901760, %v1019_v35  ;;  %v6141_v21 = vld [vmem:[#allocation7 + $0x2d8] sm:$0xff] }
 0x138   :  { %8753 = vst [vmem:[#allocation142_spill] sm:$0xff] %v6119_v50  ;;  %v4351_v4 = vpack.c.bf16 %v2740_v60, %v2728_v25  ;;  %v6124_v6 = vsub.f32 %v6078_v9, %v8754_v28  ;;  %v2734_v57 = vand.u32 4294901760, %v2733_v39  ;;  %v8144_v60 = vand.u32 4294901760, %v6109_v45  ;;  %v1024_v25 = vld [vmem:[#allocation7 + $0x248] sm:$0xff]  ;;  %8758 = vst [vmem:[#allocation146_spill] sm:$0xff] %v6141_v21  ;;  %v6414_v53 = vld [vmem:[#allocation7 + $0x3f8] sm:$0xff] }
 0x139   :  { %8756 = vst [vmem:[#allocation144_spill] sm:$0xff] %v6129_v54  ;;  %v8153_v28 = vand.u32 4294901760, %v6129_v54  ;;  %v6138_v9 = vsub.f32 %v1015_v29, %v1145_v34  ;;  %v1028_v39 = vld [vmem:[#allocation7 + $0x268] sm:$0xff]  ;;  %v2746_v49 = vand.u32 4294901760, %v2745_v18  ;;  %v6143_v59 = vpack.c.bf16 %v1149_v11, %v1145_v34  ;;  %v6163_v18 = vld [vmem:[#allocation7 + $0x2f8] sm:$0xff]  ;;  %8819 = vst [vmem:[#allocation192_spill] sm:$0xff] %v6414_v53 }
 0x13a   :  { %8755 = vst [vmem:[#allocation143_spill] sm:$0xff] %v6124_v6  ;;  %4352 = vmatprep.subr.bf16.mxu0 %v4351_v4  ;;  %v8146_v37 = vand.u32 4294901760, %v6124_v6  ;;  %v6145_v3 = vsub.f32 %v1019_v35, %v1149_v11  ;;  %v6150_v4 = vsub.f32 %v6109_v45, %v8144_v60  ;;  %v8762_v62 = vand.u32 4294901760, %v6119_v50  ;;  %8764 = vst [vmem:[#allocation151_spill] sm:$0xff] %v6163_v18 }
 0x13b   :  { %8757 = vst [vmem:[#allocation145_spill] sm:$0xff] %v6138_v9  ;;  %8759 = vst [vmem:[#allocation147_spill] sm:$0xff] %v6143_v59  ;;  %v2763_v42 = vsub.f32 %v6129_v54, %v8153_v28  ;;  %v1151_v35 = vand.u32 4294901760, %v1024_v25  ;;  %v4353_v11 = vpack.c.bf16 %v2746_v49, %v2734_v57  ;;  %3902 = vmatpush1.bf16.msra.mxu1 %v6143_v59  ;;  %v1155_v45 = vand.u32 4294901760, %v1028_v39  ;;  %v6395_v9 = vld [vmem:[#allocation7 + $0x308] sm:$0xff] }
 0x13c   :  { %8760 = vst [vmem:[#allocation148_spill] sm:$0xff] %v6145_v3  ;;  %8761 = vst [vmem:[#allocation149_spill] sm:$0xff] %v6150_v4  ;;  %v2751_v29 = vsub.f32 %v6124_v6, %v8146_v37  ;;  %v6161_v34 = vsub.f32 %v6119_v50, %v8762_v62  ;;  %v8162_v60 = vand.u32 4294901760, %v6150_v4  ;;  %v1023_v6 = vld [vmem:[#allocation7 + $0x240] sm:$0xff]  ;;  %v6171_v50 = vld [vmem:[#allocation7 + $0x2d0] sm:$0xff]  ;;  %v8167_v37 = vand.u32 4294901760, %v6163_v18 }
 0x13d   :  { %v2764_v14 = vand.u32 4294901760, %v2763_v42  ;;  %v6169_v54 = vsub.f32 %v1024_v25, %v1151_v35  ;;  %v1027_v62 = vld [vmem:[#allocation7 + $0x260] sm:$0xff]  ;;  %8766 = vst [vmem:[#allocation153_spill] sm:$0xff] %v6171_v50  ;;  %4354 = vmatpush1.bf16.msra.mxu0 %v4353_v11  ;;  %v6176_v57 = vpack.c.bf16 %v1155_v45, %v1151_v35  ;;  %v6178_v59 = vsub.f32 %v1028_v39, %v1155_v45 }
 0x13e   :  { %8763 = vst [vmem:[#allocation150_spill] sm:$0xff] %v6161_v34  ;;  %v2752_v16 = vand.u32 4294901760, %v2751_v29  ;;  %v8163_v28 = vand.u32 4294901760, %v6161_v34  ;;  %v2757_v49 = vsub.f32 %v6150_v4, %v8162_v60  ;;  %v6181_v29 = vld [vmem:[#allocation7 + $0x2f0] sm:$0xff]  ;;  %v8770_v63 = vand.u32 4294901760, %v6141_v21 }
 0x13f   :  { %8765 = vst [vmem:[#allocation152_spill] sm:$0xff] %v6169_v54  ;;  %8767 = vst [vmem:[#allocation154_spill] sm:$0xff] %v6176_v57  ;;  %v1153_v54 = vand.u32 4294901760, %v1023_v6  ;;  %3904 = vmatprep.subr.bf16.mxu1 %v6176_v57  ;;  %v6195_v45 = vsub.f32 %v6163_v18, %v8167_v37  ;;  %v1157_v39 = vand.u32 4294901760, %v1027_v62 }
 0x140   :  { %8768 = vst [vmem:[#allocation155_spill] sm:$0xff] %v6178_v59  ;;  %8769 = vst [vmem:[#allocation156_spill] sm:$0xff] %v6181_v29  ;;  %v4355_v42 = vpack.c.bf16 %v2764_v14, %v2752_v16  ;;  %v2769_v25 = vsub.f32 %v6161_v34, %v8163_v28  ;;  %v6189_v11 = vsub.f32 %v6141_v21, %v8770_v63  ;;  %v2758_v60 = vand.u32 4294901760, %v2757_v49  ;;  %v6385_v59 = vld [vmem:[#allocation7 + $0x390] sm:$0xff] }
 0x141   :  { %8772 = vst [vmem:[#allocation158_spill] sm:$0xff] %v6195_v45  ;;  %v8171_v14 = vand.u32 4294901760, %v6171_v50  ;;  %v6199_v28 = vsub.f32 %v1023_v6, %v1153_v54  ;;  %v8170_v63 = vand.u32 4294901760, %v6181_v29  ;;  %v8172_v49 = vand.u32 4294901760, %v6195_v45  ;;  %8811 = vst [vmem:[#allocation187_spill] sm:$0xff] %v6385_v59 }
 0x142   :  { %8771 = vst [vmem:[#allocation157_spill] sm:$0xff] %v6189_v11  ;;  %4356 = vmatprep.subr.bf16.mxu0 %v4355_v42  ;;  %v2770_v16 = vand.u32 4294901760, %v2769_v25  ;;  %v8169_v35 = vand.u32 4294901760, %v6189_v11  ;;  %v6203_v21 = vpack.c.bf16 %v1157_v39, %v1153_v54  ;;  %v6205_v57 = vsub.f32 %v1027_v62, %v1157_v39 }
 0x143   :  { %8773 = vst [vmem:[#allocation159_spill] sm:$0xff] %v6199_v28  ;;  %v6210_v37 = vsub.f32 %v6171_v50, %v8171_v14  ;;  %v6218_v6 = vsub.f32 %v6181_v29, %v8170_v63  ;;  %v2787_v54 = vsub.f32 %v6195_v45, %v8172_v49  ;;  %v6240_v50 = vld [vmem:[#allocation7 + $0x318] sm:$0xff] }
 0x144   :  { %8774 = vst [vmem:[#allocation160_spill] sm:$0xff] %v6203_v21  ;;  %8775 = vst [vmem:[#allocation161_spill] sm:$0xff] %v6205_v57  ;;  %v4357_v18 = vpack.c.bf16 %v2770_v16, %v2758_v60  ;;  %v2775_v42 = vsub.f32 %v6189_v11, %v8169_v35  ;;  %3906 = vmatpush1.bf16.msra.mxu1 %v6203_v21 }
 0x145   :  { %8776 = vst [vmem:[#allocation162_spill] sm:$0xff] %v6210_v37  ;;  %8777 = vst [vmem:[#allocation163_spill] sm:$0xff] %v6218_v6  ;;  %v8176_v62 = vand.u32 4294901760, %v6210_v37  ;;  %v8178_v60 = vand.u32 4294901760, %v6218_v6  ;;  %v2788_v39 = vand.u32 4294901760, %v2787_v54 }
 0x146   :  { %4358 = vmatpush1.bf16.msra.mxu0 %v4357_v18  ;;  %v2776_v25 = vand.u32 4294901760, %v2775_v42  ;;  %8780 = vst [vmem:[#allocation166_spill] sm:$0xff] %v6240_v50 }
 0x147   :  { %v2781_v16 = vsub.f32 %v6210_v37, %v8176_v62  ;;  %v2793_v35 = vsub.f32 %v6218_v6, %v8178_v60  ;;  %v6306_v6 = vld [vmem:[#allocation7 + $0x2a8] sm:$0xff] }
 0x148   :  { %v4359_v63 = vpack.c.bf16 %v2788_v39, %v2776_v25  ;;  %v6242_v25 = vld [vmem:[#allocation7 + $0x338] sm:$0xff]  ;;  %v8216_v34 = vand.u32 4294901760, %v6306_v6 }
 0x149   :  { %v2782_v14 = vand.u32 4294901760, %v2781_v16  ;;  %v2794_v49 = vand.u32 4294901760, %v2793_v35  ;;  %8781 = vst [vmem:[#allocation167_spill] sm:$0xff] %v6242_v25  ;;  %v8179_v35 = vand.u32 4294901760, %v6240_v50  ;;  %v6272_v16 = vld [vmem:[#allocation7 + $0x358] sm:$0xff] }
 0x14a   :  { %4360 = vmatprep.subr.bf16.mxu0 %v4359_v63  ;;  %8788 = vst [vmem:[#allocation174_spill] sm:$0xff] %v6272_v16  ;;  %v8793_v37 = vand.u32 4294901760, %v6272_v16 }
 0x14b   :  { %v4361_v21 = vpack.c.bf16 %v2794_v49, %v2782_v14  ;;  %v6246_v14 = vld [vmem:[#allocation7 + $0x310] sm:$0xff]  ;;  %v6255_v63 = vsub.f32 %v6240_v50, %v8179_v35 }
 0x14c   :  { %8782 = vst [vmem:[#allocation168_spill] sm:$0xff] %v6246_v14  ;;  %v6280_v50 = vld [vmem:[#allocation7 + $0x350] sm:$0xff]  ;;  %v6297_v45 = vsub.f32 %v6272_v16, %v8793_v37 }
 0x14d   :  { %4362 = vmatpush1.bf16.msra.mxu0 %v4361_v21  ;;  %v8180_v21 = vand.u32 4294901760, %v6242_v25  ;;  %8784 = vst [vmem:[#allocation170_spill] sm:$0xff] %v6255_v63  ;;  %v8193_v60 = vand.u32 4294901760, %v6255_v63  ;;  %8790 = vst [vmem:[#allocation176_spill] sm:$0xff] %v6280_v50  ;;  %v8799_v37 = vand.u32 4294901760, %v6280_v50 }
 0x14e   :  { %8794 = vst [vmem:[#allocation178_spill] sm:$0xff] %v6297_v45 }
 0x14f   :  { %v6260_v49 = vsub.f32 %v6242_v25, %v8180_v21  ;;  %v2799_v35 = vsub.f32 %v6255_v63, %v8193_v60  ;;  %v6317_v16 = vsub.f32 %v6280_v50, %v8799_v37 }
 0x151   :  { %8785 = vst [vmem:[#allocation171_spill] sm:$0xff] %v6260_v49  ;;  %v8792_v21 = vand.u32 4294901760, %v6260_v49  ;;  %8800 = vst [vmem:[#allocation180_spill] sm:$0xff] %v6317_v16  ;;  %v2800_v4 = vand.u32 4294901760, %v2799_v35  ;;  %v8220_v35 = vand.u32 4294901760, %v6297_v45  ;;  %v8231_v28 = vand.u32 4294901760, %v6317_v16 }
 0x153   :  { %v2811_v25 = vsub.f32 %v6260_v49, %v8792_v21 }
 0x164   :  { %v5716_v61 = vpop.f32.mrb[0].mxu1 }
 0x165   :  { %v5724_v38 = vpop.f32.mrb[1].mxu1 }
 0x1c1   :  { %v937_v29 = vpop.f32.mrb[0].mxu0 }
 0x1c2   :  { %v6233_v18 = vadd.f32 %v937_v29, %v5716_v61  ;;  %v939_v42 = vpop.f32.mrb[1].mxu0  ;;  %v6248_v61 = vld [vmem:[#allocation7 + $0x330] sm:$0xff]  ;;  %v8183_v29 = vand.u32 4294901760, %v6246_v14 }
 0x1c3   :  { %v6236_v54 = vadd.f32 %v939_v42, %v5724_v38  ;;  %8783 = vst [vmem:[#allocation169_spill] sm:$0xff] %v6248_v61  ;;  %v8185_v38 = vand.u32 4294901760, %v6248_v61  ;;  %v6274_v42 = vld [vmem:[#allocation7 + $0x378] sm:$0xff] }
 0x1c4   :  { %8778 = vst [vmem:[#allocation164_spill] sm:$0xff] %v6233_v18  ;;  %8789 = vst [vmem:[#allocation175_spill] sm:$0xff] %v6274_v42 }
 0x1c5   :  { %8779 = vst [vmem:[#allocation165_spill] sm:$0xff] %v6236_v54  ;;  %v942_v62 = vmax.f32 %v6233_v18, %v6236_v54  ;;  %v6270_v39 = vsub.f32 %v6248_v61, %v8185_v38  ;;  %v6304_v61 = vld [vmem:[#allocation7 + $0x288] sm:$0xff]  ;;  %v6328_v54 = vld [vmem:[#allocation7 + $0x2a0] sm:$0xff] }
 0x1c6   :  { %v8217_v11 = vand.u32 4294901760, %v6304_v61  ;;  %v8218_v37 = vand.u32 4294901760, %v6328_v54 }
 0x1c7   :  { %943 = vmax.xlane.f32.xlu0 %v942_v62  ;;  %v6265_v62 = vsub.f32 %v6246_v14, %v8183_v29  ;;  %8787 = vst [vmem:[#allocation173_spill] sm:$0xff] %v6270_v39  ;;  %v6282_v29 = vld [vmem:[#allocation7 + $0x370] sm:$0xff]  ;;  %v8795_v14 = vand.u32 4294901760, %v6274_v42  ;;  %v8798_v21 = vand.u32 4294901760, %v6270_v39 }
 0x1c8   :  { %8791 = vst [vmem:[#allocation177_spill] sm:$0xff] %v6282_v29 }
 0x1c9   :  { %8786 = vst [vmem:[#allocation172_spill] sm:$0xff] %v6265_v62  ;;  %v6302_v38 = vsub.f32 %v6274_v42, %v8795_v14  ;;  %v8797_v60 = vand.u32 4294901760, %v6265_v62  ;;  %v2817_v49 = vsub.f32 %v6270_v39, %v8798_v21  ;;  %v8801_v14 = vand.u32 4294901760, %v6282_v29 }
 0x1cb   :  { %8796 = vst [vmem:[#allocation179_spill] sm:$0xff] %v6302_v38  ;;  %v2805_v63 = vsub.f32 %v6265_v62, %v8797_v60  ;;  %v6322_v42 = vsub.f32 %v6282_v29, %v8801_v14  ;;  %v2812_v60 = vand.u32 4294901760, %v2811_v25  ;;  %v6326_v62 = vld [vmem:[#allocation7 + $0x280] sm:$0xff]  ;;  %v2818_v39 = vand.u32 4294901760, %v2817_v49  ;;  %v6348_v49 = vld [vmem:[#allocation7 + $0x2e8] sm:$0xff] }
 0x1cc   :  { %v8219_v21 = vand.u32 4294901760, %v6326_v62  ;;  %v6336_v14 = vpack.c.bf16 %v8216_v34, %v8217_v11  ;;  %v8221_v25 = vand.u32 4294901760, %v6302_v38  ;;  %v6367_v34 = vld [vmem:[#allocation7 + $0x3b8] sm:$0xff]  ;;  %v6387_v11 = vld [vmem:[#allocation7 + $0x3b0] sm:$0xff] }
 0x1cd   :  { %8802 = vst [vmem:[#allocation181_spill] sm:$0xff] %v6322_v42  ;;  %v2806_v50 = vand.u32 4294901760, %v2805_v63  ;;  %v4363_v29 = vpack.c.bf16 %v2812_v60, %v2800_v4  ;;  %v6346_v63 = vld [vmem:[#allocation7 + $0x2c8] sm:$0xff]  ;;  %v6352_v4 = vld [vmem:[#allocation7 + $0x398] sm:$0xff]  ;;  %8806 = vst [vmem:[#allocation185_spill] sm:$0xff] %v6367_v34  ;;  %v8807_v60 = vand.u32 4294901760, %v6322_v42 }
 0x1ce   :  { %8803 = vst [vmem:[#allocation182_spill] sm:$0xff] %v6336_v14  ;;  %v6344_v18 = vpack.c.bf16 %v8218_v37, %v8219_v21  ;;  %8805 = vst [vmem:[#allocation184_spill] sm:$0xff] %v6352_v4  ;;  %3908 = vmatprep.subr.bf16.mxu1 %v6336_v14  ;;  %v6363_v37 = vld [vmem:[#allocation7 + $0x2c0] sm:$0xff]  ;;  %v8808_v14 = vand.u32 4294901760, %v6346_v63 }
 0x1cf   :  { %v4365_v57 = vpack.c.bf16 %v2818_v39, %v2806_v50  ;;  %4364 = vmatprep.subr.bf16.mxu0 %v4363_v29  ;;  %v2823_v50 = vsub.f32 %v6297_v45, %v8220_v35  ;;  %v2835_v39 = vsub.f32 %v6302_v38, %v8221_v25  ;;  %v6365_v21 = vld [vmem:[#allocation7 + $0x2e0] sm:$0xff]  ;;  %v2829_v35 = vsub.f32 %v6317_v16, %v8231_v28 }
 0x1d0   :  { %8804 = vst [vmem:[#allocation183_spill] sm:$0xff] %v6344_v18  ;;  %3910 = vmatpush1.bf16.msra.mxu1 %v6344_v18  ;;  %v2841_v25 = vsub.f32 %v6322_v42, %v8807_v60  ;;  %v8809_v38 = vand.u32 4294901760, %v6348_v49  ;;  %8812 = vst [vmem:[#allocation188_spill] sm:$0xff] %v6387_v11  ;;  %v8813_v28 = vand.u32 4294901760, %v6363_v37  ;;  %v8814_v16 = vand.u32 4294901760, %v6365_v21 }
 0x1d1   :  { %4366 = vmatpush1.bf16.msra.mxu0 %v4365_v57  ;;  %v2824_v18 = vand.u32 4294901760, %v2823_v50  ;;  %v2836_v57 = vand.u32 4294901760, %v2835_v39  ;;  %v2830_v60 = vand.u32 4294901760, %v2829_v35  ;;  %v6400_v50 = vld [vmem:[#allocation7 + $0x3d8] sm:$0xff]  ;;  %v6410_v35 = vld [vmem:[#allocation7 + $0x300] sm:$0xff] }
 0x1d2   :  { %v6382_v45 = vpack.c.bf16 %v8809_v38, %v8808_v14  ;;  %v6393_v3 = vpack.c.bf16 %v8814_v16, %v8813_v28  ;;  %v2842_v42 = vand.u32 4294901760, %v2841_v25  ;;  %v6397_v38 = vld [vmem:[#allocation7 + $0x328] sm:$0xff]  ;;  %8816 = vst [vmem:[#allocation190_spill] sm:$0xff] %v6400_v50  ;;  %v8817_v28 = vand.u32 4294901760, %v6352_v4  ;;  %v6412_v25 = vld [vmem:[#allocation7 + $0x320] sm:$0xff] }
 0x1d3   :  { %v4367_v39 = vpack.c.bf16 %v2836_v57, %v2824_v18  ;;  %v8820_v18 = vand.u32 4294901760, %v6367_v34  ;;  %v1177_v13 = vand.u32 4294901760, %v6410_v35  ;;  %v1181_v29 = vand.u32 4294901760, %v6412_v25 }
 0x1d4   :  { %8810 = vst [vmem:[#allocation186_spill] sm:$0xff] %v6382_v45  ;;  %8815 = vst [vmem:[#allocation189_spill] sm:$0xff] %v6393_v3  ;;  %3912 = vmatprep.subr.bf16.mxu1 %v6382_v45  ;;  %v6408_v16 = vsub.f32 %v6352_v4, %v8817_v28  ;;  %v4369_v14 = vpack.c.bf16 %v2842_v42, %v2830_v60  ;;  %v8822_v28 = vand.u32 4294901760, %v6395_v9  ;;  %v8823_v45 = vand.u32 4294901760, %v6397_v38 }
 0x1d5   :  { %3914 = vmatpush1.bf16.msra.mxu1 %v6393_v3  ;;  %v6420_v57 = vsub.f32 %v6367_v34, %v8820_v18  ;;  %4368 = vmatprep.subr.bf16.mxu0 %v4367_v39  ;;  %v8255_v42 = vand.u32 4294901760, %v6385_v59  ;;  %v8257_v60 = vand.u32 4294901760, %v6387_v11  ;;  %v6434_v3 = vpack.c.bf16 %v1181_v29, %v1177_v13  ;;  %v1056_v34 = vld [vmem:[#allocation7 + $0x348] sm:$0xff]  ;;  %v1055_v39 = vld [vmem:[#allocation7 + $0x340] sm:$0xff] }
 0x1d6   :  { %8818 = vst [vmem:[#allocation191_spill] sm:$0xff] %v6408_v16  ;;  %v6428_v4 = vpack.c.bf16 %v8823_v45, %v8822_v28  ;;  %v8252_v55 = vand.u32 4294901760, %v6408_v16  ;;  %4370 = vmatpush1.bf16.msra.mxu0 %v4369_v14  ;;  %v1183_v18 = vand.u32 4294901760, %v1056_v34 }
 0x1d7   :  { %8821 = vst [vmem:[#allocation193_spill] sm:$0xff] %v6420_v57  ;;  %8825 = vst [vmem:[#allocation195_spill] sm:$0xff] %v6434_v3  ;;  %v6445_v14 = vsub.f32 %v6385_v59, %v8255_v42  ;;  %v6450_v28 = vsub.f32 %v6387_v11, %v8257_v60  ;;  %v8828_v56 = vand.u32 4294901760, %v6420_v57  ;;  %v8831_v42 = vand.u32 4294901760, %v6414_v53  ;;  %v1059_v60 = vld [vmem:[#allocation7 + $0x360] sm:$0xff]  ;;  %v6466_v11 = vld [vmem:[#allocation7 + $0x3d0] sm:$0xff] }
 0x1d8   :  { %8824 = vst [vmem:[#allocation194_spill] sm:$0xff] %v6428_v4  ;;  %3916 = vmatprep.subr.bf16.mxu1 %v6428_v4  ;;  %v2847_v45 = vsub.f32 %v6408_v16, %v8252_v55  ;;  %v8829_v55 = vand.u32 4294901760, %v6400_v50  ;;  %8833 = vst [vmem:[#allocation200_spill] sm:$0xff] %v6466_v11  ;;  %v6472_v48 = vpack.c.bf16 %v1187_v33, %v1183_v18  ;;  %v8280_v2 = vand.u32 4294901760, %v6466_v11 }
 0x1d9   :  { %8826 = vst [vmem:[#allocation196_spill] sm:$0xff] %v6445_v14  ;;  %8827 = vst [vmem:[#allocation197_spill] sm:$0xff] %v6450_v28  ;;  %v2859_v4 = vsub.f32 %v6420_v57, %v8828_v56  ;;  %3918 = vmatpush1.bf16.msra.mxu1 %v6434_v3  ;;  %v6464_v59 = vsub.f32 %v6414_v53, %v8831_v42  ;;  %v8272_v47 = vand.u32 4294901760, %v6445_v14  ;;  %v8277_v56 = vand.u32 4294901760, %v6450_v28  ;;  %v6470_v57 = vld [vmem:[#allocation7 + $0x3f0] sm:$0xff] }
 0x1da   :  { %v6459_v16 = vsub.f32 %v6400_v50, %v8829_v55  ;;  %v2848_v20 = vand.u32 4294901760, %v2847_v45  ;;  %v1185_v3 = vand.u32 4294901760, %v1055_v39  ;;  %8834 = vst [vmem:[#allocation201_spill] sm:$0xff] %v6470_v57  ;;  %8835 = vst [vmem:[#allocation202_spill] sm:$0xff] %v6472_v48  ;;  %v1189_v53 = vand.u32 4294901760, %v1059_v60  ;;  %3920 = vmatprep.subr.bf16.mxu1 %v6472_v48 }
 0x1db   :  { %8832 = vst [vmem:[#allocation199_spill] sm:$0xff] %v6464_v59  ;;  %v2860_v26 = vand.u32 4294901760, %v2859_v4  ;;  %v8279_v50 = vand.u32 4294901760, %v6464_v59  ;;  %v2853_v42 = vsub.f32 %v6445_v14, %v8272_v47  ;;  %v2865_v45 = vsub.f32 %v6450_v28, %v8277_v56 }
 0x1dc   :  { %8830 = vst [vmem:[#allocation198_spill] sm:$0xff] %v6459_v16  ;;  %v8278_v55 = vand.u32 4294901760, %v6459_v16  ;;  %v6491_v22 = vpack.c.bf16 %v1189_v53, %v1185_v3  ;;  %v8841_v47 = vand.u32 4294901760, %v6328_v54  ;;  %v8842_v48 = vand.u32 4294901760, %v6346_v63 }
 0x1dd   :  { %v4371_v24 = vpack.c.bf16 %v2860_v26, %v2848_v20  ;;  %v2883_v44 = vsub.f32 %v6464_v59, %v8279_v50  ;;  %v2854_v14 = vand.u32 4294901760, %v2853_v42  ;;  %v2866_v15 = vand.u32 4294901760, %v2865_v45 }
 0x1de   :  { %v2871_v4 = vsub.f32 %v6459_v16, %v8278_v55  ;;  %8836 = vst [vmem:[#allocation203_spill] sm:$0xff] %v6491_v22  ;;  %v6496_v26 = vsub.f32 %v6466_v11, %v8280_v2  ;;  %v8838_v20 = vand.u32 4294901760, %v6304_v61  ;;  %v8839_v55 = vand.u32 4294901760, %v6306_v6  ;;  %3922 = vmatpush1.bf16.msra.mxu1 %v6491_v22  ;;  %v1067_v11 = vld [vmem:[#allocation7 + $0x3a0] sm:$0xff] }
 0x1df   :  { %v8840_v42 = vand.u32 4294901760, %v6326_v62  ;;  %v6516_v2 = vsub.f32 %v6328_v54, %v8841_v47  ;;  %4372 = vmatprep.subr.bf16.mxu0 %v4371_v24  ;;  %v8848_v54 = vand.u32 4294901760, %v6397_v38  ;;  %v6557_v22 = vsub.f32 %v1060_v46, %v1187_v33 }
 0x1e0   :  { %8837 = vst [vmem:[#allocation204_spill] sm:$0xff] %v6496_v26  ;;  %v6501_v56 = vsub.f32 %v6304_v61, %v8838_v20  ;;  %v6506_v50 = vsub.f32 %v6306_v6, %v8839_v55  ;;  %v6521_v61 = vsub.f32 %v6346_v63, %v8842_v48  ;;  %v8843_v20 = vand.u32 4294901760, %v6348_v49 }
 0x1e1   :  { %v6511_v45 = vsub.f32 %v6326_v62, %v8840_v42  ;;  %v8844_v55 = vand.u32 4294901760, %v6363_v37  ;;  %v8845_v42 = vand.u32 4294901760, %v6365_v21  ;;  %v8846_v48 = vand.u32 4294901760, %v6395_v9  ;;  %8853 = vst [vmem:[#allocation210_spill] sm:$0xff] %v6557_v22 }
 0x1e2   :  { %v6526_v6 = vsub.f32 %v6348_v49, %v8843_v20  ;;  %v6547_v63 = vsub.f32 %v6397_v38, %v8848_v54  ;;  %v6553_v49 = vsub.f32 %v6412_v25, %v1181_v29  ;;  %v1068_v20 = vld [vmem:[#allocation7 + $0x3a8] sm:$0xff]  ;;  %v2884_v59 = vand.u32 4294901760, %v2883_v44  ;;  %v1075_v54 = vld [vmem:[#allocation7 + $0x3e0] sm:$0xff] }
 0x1e3   :  { %v6531_v62 = vsub.f32 %v6363_v37, %v8844_v55  ;;  %v6536_v47 = vsub.f32 %v6365_v21, %v8845_v42  ;;  %v6542_v24 = vsub.f32 %v6395_v9, %v8846_v48  ;;  %v6550_v37 = vsub.f32 %v6410_v35, %v1177_v13  ;;  %v1064_v21 = vld [vmem:[#allocation7 + $0x388] sm:$0xff]  ;;  %v1063_v48 = vld [vmem:[#allocation7 + $0x380] sm:$0xff] }
 0x1e4   :  { %8849 = vst [vmem:[#allocation206_spill] sm:$0xff] %v6547_v63  ;;  %8851 = vst [vmem:[#allocation208_spill] sm:$0xff] %v6553_v49  ;;  %v4373_v55 = vpack.c.bf16 %v2866_v15, %v2854_v14  ;;  %v6555_v42 = vsub.f32 %v1056_v34, %v1183_v18  ;;  %v2872_v9 = vand.u32 4294901760, %v2871_v4  ;;  %v6559_v16 = vsub.f32 %v1055_v39, %v1185_v3  ;;  %v1072_v25 = vld [vmem:[#allocation7 + $0x3c8] sm:$0xff]  ;;  %v1071_v4 = vld [vmem:[#allocation7 + $0x3c0] sm:$0xff] }
 0x1e5   :  { %8847 = vst [vmem:[#allocation205_spill] sm:$0xff] %v6542_v24  ;;  %8850 = vst [vmem:[#allocation207_spill] sm:$0xff] %v6550_v37  ;;  %v6561_v38 = vsub.f32 %v1059_v60, %v1189_v53  ;;  %v8290_v13 = vand.u32 4294901760, %v6496_v26  ;;  %v8856_v29 = vand.u32 4294901760, %v6470_v57  ;;  %v1191_v15 = vand.u32 4294901760, %v1064_v21  ;;  %v1076_v53 = vld [vmem:[#allocation7 + $0x3e8] sm:$0xff] }
 0x1e6   :  { %8852 = vst [vmem:[#allocation209_spill] sm:$0xff] %v6555_v42  ;;  %8854 = vst [vmem:[#allocation211_spill] sm:$0xff] %v6559_v16  ;;  %4374 = vmatpush1.bf16.msra.mxu0 %v4373_v55  ;;  %v1195_v34 = vand.u32 4294901760, %v1068_v20  ;;  %v4375_v33 = vpack.c.bf16 %v2884_v59, %v2872_v9  ;;  %v1193_v44 = vand.u32 4294901760, %v1063_v48  ;;  %v1197_v3 = vand.u32 4294901760, %v1067_v11 }
 0x1e7   :  { %8855 = vst [vmem:[#allocation212_spill] sm:$0xff] %v6561_v38  ;;  %v6567_v35 = vsub.f32 %v6470_v57, %v8856_v29  ;;  %v2877_v46 = vsub.f32 %v6496_v26, %v8290_v13  ;;  %v6575_v39 = vsub.f32 %v1064_v21, %v1191_v15  ;;  %v1199_v21 = vand.u32 4294901760, %v1072_v25 }
 0x1e8   :  { %v6573_v18 = vpack.c.bf16 %v1195_v34, %v1191_v15  ;;  %v6577_v14 = vsub.f32 %v1068_v20, %v1195_v34  ;;  %4376 = vmatprep.subr.bf16.mxu0 %v4375_v33  ;;  %v6579_v59 = vpack.c.bf16 %v1197_v3, %v1193_v44  ;;  %v6581_v55 = vsub.f32 %v1063_v48, %v1193_v44 }
 0x1e9   :  { %8857 = vst [vmem:[#allocation213_spill] sm:$0xff] %v6567_v35  ;;  %v8291_v60 = vand.u32 4294901760, %v6567_v35  ;;  %8859 = vst [vmem:[#allocation215_spill] sm:$0xff] %v6575_v39  ;;  %v6583_v9 = vsub.f32 %v1067_v11, %v1197_v3  ;;  %v2878_v29 = vand.u32 4294901760, %v2877_v46  ;;  %v1203_v15 = vand.u32 4294901760, %v1076_v53 }
 0x1ea   :  { %8858 = vst [vmem:[#allocation214_spill] sm:$0xff] %v6573_v18  ;;  %8860 = vst [vmem:[#allocation216_spill] sm:$0xff] %v6577_v14  ;;  %3924 = vmatprep.subr.bf16.mxu1 %v6573_v18  ;;  %v4379_v20 = vpack.c.bf16 %v5542_v30, %v5537_v43  ;;  %v1201_v34 = vand.u32 4294901760, %v1071_v4  ;;  %v1205_v33 = vand.u32 4294901760, %v1075_v54  ;;  %v6594_v11 = vsub.f32 %v1072_v25, %v1199_v21 }
 0x1eb   :  { %8861 = vst [vmem:[#allocation217_spill] sm:$0xff] %v6579_v59  ;;  %8862 = vst [vmem:[#allocation218_spill] sm:$0xff] %v6581_v55  ;;  %v2889_v13 = vsub.f32 %v6567_v35, %v8291_v60  ;;  %3926 = vmatpush1.bf16.msra.mxu1 %v6579_v59  ;;  %v6592_v44 = vpack.c.bf16 %v1203_v15, %v1199_v21  ;;  %v6596_v46 = vsub.f32 %v1076_v53, %v1203_v15 }
 0x1ec   :  { %8863 = vst [vmem:[#allocation219_spill] sm:$0xff] %v6583_v9  ;;  %8865 = vst [vmem:[#allocation221_spill] sm:$0xff] %v6594_v11  ;;  %v6598_v3 = vpack.c.bf16 %v1205_v33, %v1201_v34  ;;  %v6600_v60 = vsub.f32 %v1071_v4, %v1201_v34  ;;  %v6602_v18 = vsub.f32 %v1075_v54, %v1205_v33  ;;  %v8300_v57 = vand.u32 4294901760, %v5619_v19 }
 0x1ed   :  { %v2890_v48 = vand.u32 4294901760, %v2889_v13  ;;  %8864 = vst [vmem:[#allocation220_spill] sm:$0xff] %v6592_v44  ;;  %8866 = vst [vmem:[#allocation222_spill] sm:$0xff] %v6596_v46  ;;  %3928 = vmatprep.subr.bf16.mxu1 %v6592_v44  ;;  %v8298_v59 = vand.u32 4294901760, %v5621_v27  ;;  %v8299_v13 = vand.u32 4294901760, %v5644_v52  ;;  %v8301_v53 = vand.u32 4294901760, %v5646_v58 }
 0x1ee   :  { %8867 = vst [vmem:[#allocation223_spill] sm:$0xff] %v6598_v3  ;;  %8868 = vst [vmem:[#allocation224_spill] sm:$0xff] %v6600_v60  ;;  %v1227_v25 = vsub.f32 %v5619_v19, %v8300_v57  ;;  %v8306_v4 = vand.u32 4294901760, %v5663_v40  ;;  %v8308_v21 = vand.u32 4294901760, %v5676_v41  ;;  %v8313_v33 = vand.u32 4294901760, %v5700_v23 }
 0x1ef   :  { %8869 = vst [vmem:[#allocation225_spill] sm:$0xff] %v6602_v18  ;;  %v4377_v30 = vpack.c.bf16 %v2890_v48, %v2878_v29  ;;  %3930 = vmatpush1.bf16.msra.mxu1 %v6598_v3  ;;  %v1239_v54 = vsub.f32 %v5621_v27, %v8298_v59  ;;  %v1233_v29 = vsub.f32 %v5644_v52, %v8299_v13  ;;  %v8311_v57 = vand.u32 4294901760, %v5712_v5 }
 0x1f0   :  { %v1228_v15 = vand.u32 4294901760, %v1227_v25  ;;  %v1245_v34 = vsub.f32 %v5646_v58, %v8301_v53  ;;  %v1263_v13 = vsub.f32 %v5676_v41, %v8308_v21  ;;  %v1257_v53 = vsub.f32 %v5700_v23, %v8313_v33 }
 0x1f1   :  { %4378 = vmatpush1.bf16.msra.mxu0 %v4377_v30  ;;  %v1251_v30 = vsub.f32 %v5663_v40, %v8306_v4  ;;  %v1240_v48 = vand.u32 4294901760, %v1239_v54  ;;  %v1234_v59 = vand.u32 4294901760, %v1233_v29  ;;  %v1269_v4 = vsub.f32 %v5712_v5, %v8311_v57 }
 0x1f2   :  { %4380 = vmatprep.subr.bf16.mxu0 %v4379_v20  ;;  %v1246_v20 = vand.u32 4294901760, %v1245_v34  ;;  %v1264_v44 = vand.u32 4294901760, %v1263_v13  ;;  %v8309_v54 = vand.u32 4294901760, %v5734_v51  ;;  %v1258_v43 = vand.u32 4294901760, %v1257_v53 }
 0x1f3   :  { %v1252_v25 = vand.u32 4294901760, %v1251_v30  ;;  %v3931_v3 = vpack.c.bf16 %v1240_v48, %v1228_v15  ;;  %v8310_v21 = vand.u32 4294901760, %v5743_v1  ;;  %v1270_v30 = vand.u32 4294901760, %v1269_v4 }
 0x1f4   :  { %v6639_v29 = vpack.c.bf16 %v1246_v20, %v1234_v59  ;;  %v1275_v15 = vsub.f32 %v5734_v51, %v8309_v54  ;;  %v8312_v13 = vand.u32 4294901760, %v5767_v8  ;;  %v8316_v59 = vand.u32 4294901760, %v5776_v10  ;;  %v8934_v51 = vld [vmem:[#allocation155_spill] sm:$0xff] }
 0x1f5   :  { %3932 = vmatprep.subr.bf16.mxu1 %v3931_v3  ;;  %v6642_v34 = vpack.c.bf16 %v1264_v44, %v1252_v25  ;;  %v1287_v48 = vsub.f32 %v5743_v1, %v8310_v21  ;;  %v8317_v53 = vand.u32 4294901760, %v5797_v31  ;;  %v6653_v20 = vpack.c.bf16 %v1270_v30, %v1258_v43 }
 0x1f6   :  { %8870 = vst [vmem:[#allocation226_spill] sm:$0xff] %v6639_v29  ;;  %v1276_v3 = vand.u32 4294901760, %v1275_v15  ;;  %v1281_v44 = vsub.f32 %v5767_v8, %v8312_v13  ;;  %v8318_v4 = vand.u32 4294901760, %v5806_v32  ;;  %v1293_v54 = vsub.f32 %v5776_v10, %v8316_v59  ;;  %v8938_v8 = vld [vmem:[#allocation23_spill] sm:$0xff] }
 0x1f7   :  { %8871 = vst [vmem:[#allocation227_spill] sm:$0xff] %v6642_v34  ;;  %8872 = vst [vmem:[#allocation228_spill] sm:$0xff] %v6653_v20  ;;  %v1288_v25 = vand.u32 4294901760, %v1287_v48  ;;  %v1299_v21 = vsub.f32 %v5797_v31, %v8317_v53  ;;  %v8320_v30 = vand.u32 4294901760, %v5827_v17  ;;  %v8319_v15 = vand.u32 4294901760, %v5835_v36  ;;  %v8935_v31 = vld [vmem:[#allocation164_spill] sm:$0xff] }
 0x1f8   :  { %v1282_v57 = vand.u32 4294901760, %v1281_v44  ;;  %v1311_v43 = vsub.f32 %v5806_v32, %v8318_v4  ;;  %v1294_v48 = vand.u32 4294901760, %v1293_v54  ;;  %v8321_v53 = vand.u32 4294901760, %v5859_v12  ;;  %v8928_v32 = vld [vmem:[#allocation124_spill] sm:$0xff] }
 0x1f9   :  { %v6670_v13 = vpack.c.bf16 %v1288_v25, %v1276_v3  ;;  %v1300_v33 = vand.u32 4294901760, %v1299_v21  ;;  %v1305_v59 = vsub.f32 %v5827_v17, %v8320_v30  ;;  %v1317_v44 = vsub.f32 %v5835_v36, %v8319_v15 }
 0x1fa   :  { %v1312_v28 = vand.u32 4294901760, %v1311_v43  ;;  %v6679_v4 = vpack.c.bf16 %v1294_v48, %v1282_v57  ;;  %v8322_v20 = vand.u32 4294901760, %v5869_v0  ;;  %v8323_v3 = vand.u32 4294901760, %v5890_v7  ;;  %v8876_v48 = vld [vmem:[#allocation92_spill] sm:$0xff] }
 0x1fb   :  { %8873 = vst [vmem:[#allocation229_spill] sm:$0xff] %v6670_v13  ;;  %v1306_v21 = vand.u32 4294901760, %v1305_v59  ;;  %v1318_v54 = vand.u32 4294901760, %v1317_v44  ;;  %v1323_v43 = vsub.f32 %v5859_v12, %v8321_v53  ;;  %v8330_v30 = vand.u32 4294901760, %v8876_v48  ;;  %v8879_v44 = vld [vmem:[#allocation99_spill] sm:$0xff] }
 0x1fc   :  { %8874 = vst [vmem:[#allocation230_spill] sm:$0xff] %v6679_v4  ;;  %v6683_v25 = vpack.c.bf16 %v1312_v28, %v1300_v33  ;;  %v1335_v15 = vsub.f32 %v5869_v0, %v8322_v20  ;;  %v1329_v57 = vsub.f32 %v5890_v7, %v8323_v3  ;;  %v8878_v33 = vld [vmem:[#allocation96_spill] sm:$0xff]  ;;  %v8881_v3 = vld [vmem:[#allocation106_spill] sm:$0xff] }
 0x1fd   :  { %v6695_v4 = vpack.c.bf16 %v1318_v54, %v1306_v21  ;;  %v1324_v28 = vand.u32 4294901760, %v1323_v43  ;;  %v8331_v59 = vand.u32 4294901760, %v8878_v33  ;;  %v1341_v53 = vsub.f32 %v8876_v48, %v8330_v30  ;;  %v8880_v54 = vld [vmem:[#allocation103_spill] sm:$0xff] }
 0x1fe   :  { %8875 = vst [vmem:[#allocation231_spill] sm:$0xff] %v6683_v25  ;;  %v8332_v25 = vand.u32 4294901760, %v8879_v44  ;;  %v1336_v13 = vand.u32 4294901760, %v1335_v15  ;;  %v1330_v34 = vand.u32 4294901760, %v1329_v57  ;;  %v8336_v43 = vand.u32 4294901760, %v8880_v54  ;;  %v8883_v57 = vld [vmem:[#allocation110_spill] sm:$0xff] }
 0x1ff   :  { %8877 = vst [vmem:[#allocation232_spill] sm:$0xff] %v6695_v4  ;;  %v1347_v20 = vsub.f32 %v8878_v33, %v8331_v59  ;;  %v8337_v4 = vand.u32 4294901760, %v8881_v3  ;;  %v1342_v15 = vand.u32 4294901760, %v1341_v53  ;;  %v8338_v7 = vand.u32 4294901760, %v8883_v57 }
 0x200   :  { %v1359_v21 = vsub.f32 %v8879_v44, %v8332_v25  ;;  %v6710_v29 = vpack.c.bf16 %v1336_v13, %v1324_v28  ;;  %v1353_v30 = vsub.f32 %v8880_v54, %v8336_v43  ;;  %v8885_v28 = vld [vmem:[#allocation113_spill] sm:$0xff] }
 0x201   :  { %v1348_v0 = vand.u32 4294901760, %v1347_v20  ;;  %v1365_v59 = vsub.f32 %v8881_v3, %v8337_v4  ;;  %v6719_v25 = vpack.c.bf16 %v1342_v15, %v1330_v34  ;;  %v1371_v13 = vsub.f32 %v8883_v57, %v8338_v7  ;;  %v8887_v44 = vld [vmem:[#allocation117_spill] sm:$0xff]  ;;  %v8888_v4 = vld [vmem:[#allocation120_spill] sm:$0xff] }
 0x202   :  { %8882 = vst [vmem:[#allocation233_spill] sm:$0xff] %v6710_v29  ;;  %v1360_v12 = vand.u32 4294901760, %v1359_v21  ;;  %v8340_v53 = vand.u32 4294901760, %v8885_v28  ;;  %v1354_v20 = vand.u32 4294901760, %v1353_v30  ;;  %v8341_v33 = vand.u32 4294901760, %v8887_v44 }
 0x203   :  { %8884 = vst [vmem:[#allocation234_spill] sm:$0xff] %v6719_v25  ;;  %v1366_v21 = vand.u32 4294901760, %v1365_v59  ;;  %v1372_v48 = vand.u32 4294901760, %v1371_v13  ;;  %v8343_v34 = vand.u32 4294901760, %v8888_v4  ;;  %v8890_v25 = vld [vmem:[#allocation124_spill] sm:$0xff] }
 0x204   :  { %v6725_v29 = vpack.c.bf16 %v1360_v12, %v1348_v0  ;;  %v1383_v43 = vsub.f32 %v8885_v28, %v8340_v53  ;;  %v1377_v7 = vsub.f32 %v8887_v44, %v8341_v33  ;;  %v8346_v12 = vand.u32 4294901760, %v8890_v25  ;;  %v8891_v0 = vld [vmem:[#allocation127_spill] sm:$0xff]  ;;  %v8893_v33 = vld [vmem:[#allocation134_spill] sm:$0xff] }
 0x205   :  { %v6732_v15 = vpack.c.bf16 %v1366_v21, %v1354_v20  ;;  %v8349_v30 = vand.u32 4294901760, %v8891_v0  ;;  %v1389_v13 = vsub.f32 %v8888_v4, %v8343_v34 }
 0x206   :  { %8886 = vst [vmem:[#allocation235_spill] sm:$0xff] %v6725_v29  ;;  %v1384_v59 = vand.u32 4294901760, %v1383_v43  ;;  %v8892_v29 = vld [vmem:[#allocation131_spill] sm:$0xff]  ;;  %v1378_v53 = vand.u32 4294901760, %v1377_v7  ;;  %v1395_v20 = vsub.f32 %v8890_v25, %v8346_v12  ;;  %v8895_v12 = vld [vmem:[#allocation138_spill] sm:$0xff] }
 0x207   :  { %8889 = vst [vmem:[#allocation236_spill] sm:$0xff] %v6732_v15  ;;  %v8353_v57 = vand.u32 4294901760, %v8892_v29  ;;  %v1407_v21 = vsub.f32 %v8891_v0, %v8349_v30  ;;  %v8352_v15 = vand.u32 4294901760, %v8893_v33  ;;  %v1390_v43 = vand.u32 4294901760, %v1389_v13  ;;  %v8897_v0 = vld [vmem:[#allocation141_spill] sm:$0xff] }
 0x208   :  { %v6750_v44 = vpack.c.bf16 %v1384_v59, %v1372_v48  ;;  %v1396_v4 = vand.u32 4294901760, %v1395_v20  ;;  %v8354_v25 = vand.u32 4294901760, %v8895_v12  ;;  %v8355_v54 = vand.u32 4294901760, %v8897_v0  ;;  %v8899_v20 = vld [vmem:[#allocation145_spill] sm:$0xff] }
 0x209   :  { %v1401_v34 = vsub.f32 %v8892_v29, %v8353_v57  ;;  %v1408_v28 = vand.u32 4294901760, %v1407_v21  ;;  %v1413_v7 = vsub.f32 %v8893_v33, %v8352_v15  ;;  %v6759_v3 = vpack.c.bf16 %v1390_v43, %v1378_v53  ;;  %v8900_v57 = vld [vmem:[#allocation148_spill] sm:$0xff] }
 0x20a   :  { %8894 = vst [vmem:[#allocation237_spill] sm:$0xff] %v6750_v44  ;;  %v1419_v13 = vsub.f32 %v8895_v12, %v8354_v25  ;;  %v8357_v21 = vand.u32 4294901760, %v8899_v20  ;;  %v1431_v15 = vsub.f32 %v8897_v0, %v8355_v54  ;;  %v8361_v44 = vand.u32 4294901760, %v8900_v57  ;;  %v8901_v53 = vld [vmem:[#allocation152_spill] sm:$0xff] }
 0x20b   :  { %8896 = vst [vmem:[#allocation238_spill] sm:$0xff] %v6759_v3  ;;  %v1402_v30 = vand.u32 4294901760, %v1401_v34  ;;  %v6762_v48 = vpack.c.bf16 %v1408_v28, %v1396_v4  ;;  %v1414_v59 = vand.u32 4294901760, %v1413_v7  ;;  %v8362_v43 = vand.u32 4294901760, %v8901_v53  ;;  %v8903_v28 = vld [vmem:[#allocation155_spill] sm:$0xff] }
 0x20c   :  { %v1420_v3 = vand.u32 4294901760, %v1419_v13  ;;  %v1425_v4 = vsub.f32 %v8899_v20, %v8357_v21  ;;  %v8363_v7 = vand.u32 4294901760, %v8903_v28  ;;  %v1432_v25 = vand.u32 4294901760, %v1431_v15 }
 0x20d   :  { %8898 = vst [vmem:[#allocation239_spill] sm:$0xff] %v6762_v48  ;;  %v6773_v34 = vpack.c.bf16 %v1414_v59, %v1402_v30  ;;  %v1437_v48 = vsub.f32 %v8900_v57, %v8361_v44  ;;  %v1443_v54 = vsub.f32 %v8901_v53, %v8362_v43  ;;  %v8904_v59 = vld [vmem:[#allocation159_spill] sm:$0xff]  ;;  %v8367_v43 = vand.u32 4294901760, %v6501_v56 }
 0x20e   :  { %v1426_v0 = vand.u32 4294901760, %v1425_v4  ;;  %v1455_v30 = vsub.f32 %v8903_v28, %v8363_v7  ;;  %v8366_v13 = vand.u32 4294901760, %v8904_v59  ;;  %v6790_v20 = vpack.c.bf16 %v1432_v25, %v1420_v3 }
 0x20f   :  { %8902 = vst [vmem:[#allocation148_spill] sm:$0xff] %v6773_v34  ;;  %v8905_v34 = vld [vmem:[#allocation161_spill] sm:$0xff]  ;;  %v1438_v15 = vand.u32 4294901760, %v1437_v48  ;;  %v1444_v12 = vand.u32 4294901760, %v1443_v54  ;;  %v8368_v28 = vand.u32 4294901760, %v6506_v50  ;;  %v8369_v3 = vand.u32 4294901760, %v6511_v45 }
 0x210   :  { %v8365_v21 = vand.u32 4294901760, %v8905_v34  ;;  %8906 = vst [vmem:[#allocation152_spill] sm:$0xff] %v6790_v20  ;;  %v1456_v33 = vand.u32 4294901760, %v1455_v30  ;;  %v1449_v44 = vsub.f32 %v8904_v59, %v8366_v13  ;;  %v1467_v30 = vsub.f32 %v6501_v56, %v8367_v43 }
 0x211   :  { %v6799_v7 = vpack.c.bf16 %v1438_v15, %v1426_v0  ;;  %v1473_v0 = vsub.f32 %v6511_v45, %v8369_v3  ;;  %v8370_v15 = vand.u32 4294901760, %v6516_v2 }
 0x212   :  { %v1461_v4 = vsub.f32 %v8905_v34, %v8365_v21  ;;  %v6803_v25 = vpack.c.bf16 %v1456_v33, %v1444_v12  ;;  %v1450_v54 = vand.u32 4294901760, %v1449_v44  ;;  %v1479_v21 = vsub.f32 %v6506_v50, %v8368_v28 }
 0x213   :  { %8907 = vst [vmem:[#allocation159_spill] sm:$0xff] %v6799_v7  ;;  %v1468_v33 = vand.u32 4294901760, %v1467_v30  ;;  %v8371_v44 = vand.u32 4294901760, %v6521_v61  ;;  %v8372_v12 = vand.u32 4294901760, %v6526_v6  ;;  %v1485_v43 = vsub.f32 %v6516_v2, %v8370_v15 }
 0x214   :  { %8908 = vst [vmem:[#allocation161_spill] sm:$0xff] %v6803_v25  ;;  %v1462_v48 = vand.u32 4294901760, %v1461_v4  ;;  %v1480_v4 = vand.u32 4294901760, %v1479_v21  ;;  %v1474_v25 = vand.u32 4294901760, %v1473_v0  ;;  %v8377_v30 = vand.u32 4294901760, %v6536_v47 }
 0x215   :  { %v1491_v28 = vsub.f32 %v6521_v61, %v8371_v44  ;;  %v1486_v21 = vand.u32 4294901760, %v1485_v43  ;;  %v8374_v0 = vand.u32 4294901760, %v6542_v24  ;;  %v8375_v43 = vand.u32 4294901760, %v6547_v63 }
 0x216   :  { %v6815_v13 = vpack.c.bf16 %v1462_v48, %v1450_v54  ;;  %v1503_v54 = vsub.f32 %v6526_v6, %v8372_v12  ;;  %v8373_v48 = vand.u32 4294901760, %v6531_v62  ;;  %v6830_v3 = vpack.c.bf16 %v1480_v4, %v1468_v33 }
 0x217   :  { %v1509_v44 = vsub.f32 %v6536_v47, %v8377_v30  ;;  %v6839_v12 = vpack.c.bf16 %v1486_v21, %v1474_v25  ;;  %v1515_v33 = vsub.f32 %v6542_v24, %v8374_v0  ;;  %v8378_v25 = vand.u32 4294901760, %v6553_v49 }
 0x218   :  { %8909 = vst [vmem:[#allocation240_spill] sm:$0xff] %v6815_v13  ;;  %8910 = vst [vmem:[#allocation241_spill] sm:$0xff] %v6830_v3  ;;  %v1492_v13 = vand.u32 4294901760, %v1491_v28  ;;  %v1504_v7 = vand.u32 4294901760, %v1503_v54  ;;  %v1497_v15 = vsub.f32 %v6531_v62, %v8373_v48  ;;  %v8376_v3 = vand.u32 4294901760, %v6550_v37 }
 0x219   :  { %8911 = vst [vmem:[#allocation242_spill] sm:$0xff] %v6839_v12  ;;  %v1510_v54 = vand.u32 4294901760, %v1509_v44  ;;  %v1516_v20 = vand.u32 4294901760, %v1515_v33  ;;  %v1527_v48 = vsub.f32 %v6547_v63, %v8375_v43  ;;  %v1533_v44 = vsub.f32 %v6553_v49, %v8378_v25 }
 0x21a   :  { %v6845_v4 = vpack.c.bf16 %v1504_v7, %v1492_v13  ;;  %v1498_v28 = vand.u32 4294901760, %v1497_v15  ;;  %v1521_v0 = vsub.f32 %v6550_v37, %v8376_v3  ;;  %v8379_v7 = vand.u32 4294901760, %v6555_v42 }
 0x21b   :  { %v8380_v13 = vand.u32 4294901760, %v6557_v22  ;;  %v1528_v15 = vand.u32 4294901760, %v1527_v48  ;;  %v8381_v33 = vand.u32 4294901760, %v6559_v16  ;;  %v8382_v3 = vand.u32 4294901760, %v6561_v38 }
 0x21c   :  { %8912 = vst [vmem:[#allocation243_spill] sm:$0xff] %v6845_v4  ;;  %v6852_v21 = vpack.c.bf16 %v1510_v54, %v1498_v28  ;;  %v1522_v43 = vand.u32 4294901760, %v1521_v0  ;;  %v1539_v28 = vsub.f32 %v6555_v42, %v8379_v7  ;;  %v1534_v48 = vand.u32 4294901760, %v1533_v44 }
 0x21d   :  { %v1551_v54 = vsub.f32 %v6557_v22, %v8380_v13  ;;  %v6870_v30 = vpack.c.bf16 %v1528_v15, %v1516_v20  ;;  %v1545_v25 = vsub.f32 %v6559_v16, %v8381_v33  ;;  %v1557_v7 = vsub.f32 %v6561_v38, %v8382_v3 }
 0x21e   :  { %8913 = vst [vmem:[#allocation244_spill] sm:$0xff] %v6852_v21  ;;  %v1540_v21 = vand.u32 4294901760, %v1539_v28  ;;  %v8383_v13 = vand.u32 4294901760, %v6575_v39  ;;  %v6881_v12 = vpack.c.bf16 %v1534_v48, %v1522_v43  ;;  %v8384_v15 = vand.u32 4294901760, %v6577_v14 }
 0x21f   :  { %8914 = vst [vmem:[#allocation245_spill] sm:$0xff] %v6870_v30  ;;  %v1552_v4 = vand.u32 4294901760, %v1551_v54  ;;  %v1546_v20 = vand.u32 4294901760, %v1545_v25  ;;  %v1558_v30 = vand.u32 4294901760, %v1557_v7  ;;  %v8385_v28 = vand.u32 4294901760, %v6581_v55 }
 0x220   :  { %v1563_v33 = vsub.f32 %v6575_v39, %v8383_v13  ;;  %v1575_v54 = vsub.f32 %v6577_v14, %v8384_v15  ;;  %v8390_v3 = vand.u32 4294901760, %v6583_v9  ;;  %v8392_v43 = vand.u32 4294901760, %v6594_v11 }
 0x221   :  { %v6884_v44 = vpack.c.bf16 %v1552_v4, %v1540_v21  ;;  %v6895_v25 = vpack.c.bf16 %v1558_v30, %v1546_v20  ;;  %v1569_v4 = vsub.f32 %v6581_v55, %v8385_v28  ;;  %v8391_v21 = vand.u32 4294901760, %v6596_v46  ;;  %v8948_v55 = vld [vmem:[#allocation39_spill] sm:$0xff] }
 0x222   :  { %v1564_v48 = vand.u32 4294901760, %v1563_v33  ;;  %v1576_v7 = vand.u32 4294901760, %v1575_v54  ;;  %v1581_v13 = vsub.f32 %v6583_v9, %v8390_v3  ;;  %v1587_v15 = vsub.f32 %v6594_v11, %v8392_v43  ;;  %v8950_v9 = vld [vmem:[#allocation45_spill] sm:$0xff]  ;;  %v8951_v11 = vld [vmem:[#allocation226_spill] sm:$0xff] }
 0x223   :  { %v1570_v0 = vand.u32 4294901760, %v1569_v4  ;;  %v1599_v30 = vsub.f32 %v6596_v46, %v8391_v21  ;;  %v8393_v33 = vand.u32 4294901760, %v6600_v60  ;;  %v8394_v20 = vand.u32 4294901760, %v6602_v18  ;;  %v8939_v21 = vld [vmem:[#allocation24_spill] sm:$0xff] }
 0x224   :  { %v6912_v28 = vpack.c.bf16 %v1576_v7, %v1564_v48  ;;  %v1582_v54 = vand.u32 4294901760, %v1581_v13  ;;  %v1588_v26 = vand.u32 4294901760, %v1587_v15  ;;  %v8933_v48 = vld [vmem:[#allocation145_spill] sm:$0xff] }
 0x225   :  { %v1600_v35 = vand.u32 4294901760, %v1599_v30  ;;  %v1593_v3 = vsub.f32 %v6600_v60, %v8393_v33  ;;  %v1605_v4 = vsub.f32 %v6602_v18, %v8394_v20  ;;  %v8923_v20 = vld [vmem:[#allocation106_spill] sm:$0xff]  ;;  %v8932_v33 = vld [vmem:[#allocation141_spill] sm:$0xff] }
 0x226   :  { %8915 = vst [vmem:[#allocation246_spill] sm:$0xff] %v6912_v28  ;;  %v6922_v43 = vpack.c.bf16 %v1582_v54, %v1570_v0  ;;  %v8925_v0 = vld [vmem:[#allocation113_spill] sm:$0xff]  ;;  %v8931_v54 = vld [vmem:[#allocation138_spill] sm:$0xff] }
 0x227   :  { %v6926_v7 = vpack.c.bf16 %v1600_v35, %v1588_v26  ;;  %v1594_v13 = vand.u32 4294901760, %v1593_v3  ;;  %v1606_v15 = vand.u32 4294901760, %v1605_v4  ;;  %v8929_v35 = vld [vmem:[#allocation127_spill] sm:$0xff]  ;;  %v8936_v26 = vld [vmem:[#allocation165_spill] sm:$0xff]  ;;  %v8937_v30 = vld [vmem:[#allocation22_spill] sm:$0xff] }
 0x228   :  { %v4381_v3 = vpack.c.bf16 %v8938_v8, %v8937_v30  ;;  %v8944_v30 = vld [vmem:[#allocation34_spill] sm:$0xff]  ;;  %v8965_v18 = vld [vmem:[#allocation81_spill] sm:$0xff] }
 0x229   :  { %v6932_v28 = vpack.c.bf16 %v1606_v15, %v1594_v13  ;;  %v8920_v13 = vld [vmem:[#allocation96_spill] sm:$0xff]  ;;  %v8921_v15 = vld [vmem:[#allocation99_spill] sm:$0xff] }
 0x254   :  { %v944_v1 = vpop.xlane.xlu0 %943 }
 0x255   :  { %v945_v10 = vsub.f32 %v8935_v31, %v944_v1  ;;  %v946_v17 = vsub.f32 %v8936_v26, %v944_v1  ;;  %v8940_v1 = vld [vmem:[#allocation25_spill] sm:$0xff] }
 0x256   :  { %v4383_v37 = vpack.c.bf16 %v8940_v1, %v8939_v21  ;;  %v8941_v1 = vld [vmem:[#allocation26_spill] sm:$0xff]  ;;  %v8942_v21 = vld [vmem:[#allocation27_spill] sm:$0xff] }
 0x257   :  { %v947_v29 = vmul.f32 1.442695, %v945_v10  ;;  %v949_v4 = vmul.f32 1.442695, %v946_v17  ;;  %v4385_v8 = vpack.c.bf16 %v8942_v21, %v8941_v1 }
 0x259   :  { %4674 = vpow2.f32 %v947_v29 }
 0x25a   :  { %4676 = vpow2.f32 %v949_v4 }
 0x263   :  { %v4675_v10 = vpop.eup %4674 }
 0x264   :  { %v4677_v26 = vpop.eup %4676  ;;  %v6984_v4 = vand.u32 4294901760, %v4675_v10 }
 0x265   :  { %v6986_v23 = vand.u32 4294901760, %v4677_v26 }
 0x266   :  { %v6991_v31 = vsub.f32 %v4675_v10, %v6984_v4  ;;  %v8952_v10 = vld [vmem:[#allocation52_spill] sm:$0xff] }
 0x267   :  { %2893 = vmatprep.mubr.f32.mxu0 %v6986_v23  ;;  %v6999_v29 = vsub.f32 %v4677_v26, %v6986_v23  ;;  %v8943_v26 = vld [vmem:[#allocation33_spill] sm:$0xff] }
 0x268   :  { %2895 = vmatmul.mubr.f32.vlgmr.msra.gmra.mrb[2].mxu0 %v6984_v4  ;;  %v7003_v16 = vand.u32 4294901760, %v6991_v31  ;;  %v4387_v39 = vpack.c.bf16 %v8944_v30, %v8943_v26  ;;  %v8949_v26 = vld [vmem:[#allocation44_spill] sm:$0xff] }
 0x269   :  { %4382 = vmatpush1.bf16.msra.mxu0 %v4381_v3  ;;  %3095 = vmatprep.mubr.f32.mxu0 %v6999_v29  ;;  %v7011_v17 = vand.u32 4294901760, %v6999_v29  ;;  %v4391_v38 = vpack.c.bf16 %v8950_v9, %v8949_v26  ;;  %v8958_v9 = vld [vmem:[#allocation65_spill] sm:$0xff]  ;;  %v8959_v26 = vld [vmem:[#allocation66_spill] sm:$0xff] }
 0x26a   :  { %4384 = vmatprep.subr.bf16.mxu0 %v4383_v37  ;;  %v1216_v14 = vsub.f32 %v6991_v31, %v7003_v16  ;;  %v8947_v37 = vld [vmem:[#allocation38_spill] sm:$0xff] }
 0x26b   :  { %v1210_v3 = vsub.f32 %v6999_v29, %v7011_v17  ;;  %v4389_v30 = vpack.c.bf16 %v8948_v55, %v8947_v37  ;;  %v8956_v55 = vld [vmem:[#allocation60_spill] sm:$0xff]  ;;  %v8960_v37 = vld [vmem:[#allocation229_spill] sm:$0xff] }
 0x26c   :  { %v7023_v21 = vand.u32 4294901760, %v1216_v14  ;;  %v8953_v14 = vld [vmem:[#allocation53_spill] sm:$0xff] }
 0x26d   :  { %4386 = vmatpush1.bf16.msra.mxu0 %v4385_v8  ;;  %v7025_v1 = vand.u32 4294901760, %v1210_v3  ;;  %v4393_v60 = vpack.c.bf16 %v8953_v14, %v8952_v10  ;;  %v8954_v8 = vld [vmem:[#allocation227_spill] sm:$0xff]  ;;  %v8963_v10 = vld [vmem:[#allocation230_spill] sm:$0xff] }
 0x26e   :  { %8945 = vst [vmem:[#allocation96_spill] sm:$0xff] %v7023_v21  ;;  %4388 = vmatprep.subr.bf16.mxu0 %v4387_v39  ;;  %v8955_v3 = vld [vmem:[#allocation59_spill] sm:$0xff] }
 0x26f   :  { %8946 = vst [vmem:[#allocation113_spill] sm:$0xff] %v7025_v1  ;;  %1212 = vmatprep.mubr.f32.mxu1 %v7025_v1  ;;  %v4395_v39 = vpack.c.bf16 %v8956_v55, %v8955_v3  ;;  %v8957_v1 = vld [vmem:[#allocation228_spill] sm:$0xff]  ;;  %v8966_v55 = vld [vmem:[#allocation231_spill] sm:$0xff] }
 0x270   :  { %1218 = vmatmul.mubr.f32.vlgmr.msra.gmra.mrb[2].mxu1 %v7023_v21  ;;  %v4397_v21 = vpack.c.bf16 %v8959_v26, %v8958_v9  ;;  %v8969_v3 = vld [vmem:[#allocation232_spill] sm:$0xff]  ;;  %v8972_v9 = vld [vmem:[#allocation233_spill] sm:$0xff] }
 0x271   :  { %3934 = vmatpush1.bf16.msra.mxu1 %v8951_v11  ;;  %4390 = vmatpush1.bf16.msra.mxu0 %v4389_v30  ;;  %v8961_v11 = vld [vmem:[#allocation73_spill] sm:$0xff]  ;;  %v8962_v30 = vld [vmem:[#allocation74_spill] sm:$0xff] }
 0x272   :  { %1609 = vmatprep.mubr.f32.mxu1 %v6986_v23  ;;  %3936 = vmatprep.subr.bf16.mxu1 %v8954_v8  ;;  %v4399_v14 = vpack.c.bf16 %v8962_v30, %v8961_v11  ;;  %v8964_v8 = vld [vmem:[#allocation79_spill] sm:$0xff]  ;;  %v8975_v11 = vld [vmem:[#allocation234_spill] sm:$0xff] }
 0x273   :  { %4392 = vmatprep.subr.bf16.mxu0 %v4391_v38  ;;  %v4401_v46 = vpack.c.bf16 %v8965_v18, %v8964_v8  ;;  %v8967_v38 = vld [vmem:[#allocation86_spill] sm:$0xff]  ;;  %v8978_v8 = vld [vmem:[#allocation235_spill] sm:$0xff] }
 0x275   :  { %3938 = vmatpush1.bf16.msra.mxu1 %v8957_v1  ;;  %4394 = vmatpush1.bf16.msra.mxu0 %v4393_v60  ;;  %v8968_v60 = vld [vmem:[#allocation87_spill] sm:$0xff] }
 0x276   :  { %3940 = vmatprep.subr.bf16.mxu1 %v8960_v37  ;;  %4396 = vmatprep.subr.bf16.mxu0 %v4395_v39  ;;  %v4403_v1 = vpack.c.bf16 %v8968_v60, %v8967_v38  ;;  %v8970_v37 = vld [vmem:[#allocation93_spill] sm:$0xff]  ;;  %v8971_v39 = vld [vmem:[#allocation95_spill] sm:$0xff]  ;;  %v8981_v38 = vld [vmem:[#allocation236_spill] sm:$0xff] }
 0x277   :  { %v4405_v26 = vpack.c.bf16 %v8971_v39, %v8970_v37  ;;  %v8984_v37 = vld [vmem:[#allocation237_spill] sm:$0xff] }
 0x279   :  { %3942 = vmatpush1.bf16.msra.mxu1 %v8963_v10  ;;  %4398 = vmatpush1.bf16.msra.mxu0 %v4397_v21  ;;  %v8973_v10 = vld [vmem:[#allocation101_spill] sm:$0xff]  ;;  %v8974_v21 = vld [vmem:[#allocation102_spill] sm:$0xff] }
 0x27a   :  { %3944 = vmatprep.subr.bf16.mxu1 %v8966_v55  ;;  %4400 = vmatprep.subr.bf16.mxu0 %v4399_v14  ;;  %v4407_v30 = vpack.c.bf16 %v8974_v21, %v8973_v10  ;;  %v8976_v55 = vld [vmem:[#allocation107_spill] sm:$0xff]  ;;  %v8977_v14 = vld [vmem:[#allocation108_spill] sm:$0xff]  ;;  %v8987_v10 = vld [vmem:[#allocation238_spill] sm:$0xff] }
 0x27b   :  { %v4409_v18 = vpack.c.bf16 %v8977_v14, %v8976_v55  ;;  %v8990_v55 = vld [vmem:[#allocation239_spill] sm:$0xff] }
 0x27d   :  { %3946 = vmatpush1.bf16.msra.mxu1 %v8969_v3  ;;  %4402 = vmatpush1.bf16.msra.mxu0 %v4401_v46  ;;  %v8979_v3 = vld [vmem:[#allocation115_spill] sm:$0xff]  ;;  %v8980_v46 = vld [vmem:[#allocation116_spill] sm:$0xff] }
 0x27e   :  { %3948 = vmatprep.subr.bf16.mxu1 %v8972_v9  ;;  %4404 = vmatprep.subr.bf16.mxu0 %v4403_v1  ;;  %v4411_v60 = vpack.c.bf16 %v8980_v46, %v8979_v3  ;;  %v8982_v9 = vld [vmem:[#allocation121_spill] sm:$0xff]  ;;  %v8983_v1 = vld [vmem:[#allocation123_spill] sm:$0xff]  ;;  %v8993_v3 = vld [vmem:[#allocation148_spill] sm:$0xff] }
 0x27f   :  { %v4413_v39 = vpack.c.bf16 %v8983_v1, %v8982_v9  ;;  %v8996_v9 = vld [vmem:[#allocation152_spill] sm:$0xff] }
 0x281   :  { %3950 = vmatpush1.bf16.msra.mxu1 %v8975_v11  ;;  %4406 = vmatpush1.bf16.msra.mxu0 %v4405_v26  ;;  %v8985_v11 = vld [vmem:[#allocation128_spill] sm:$0xff]  ;;  %v8986_v26 = vld [vmem:[#allocation129_spill] sm:$0xff] }
 0x282   :  { %3952 = vmatprep.subr.bf16.mxu1 %v8978_v8  ;;  %4408 = vmatprep.subr.bf16.mxu0 %v4407_v30  ;;  %v4415_v21 = vpack.c.bf16 %v8986_v26, %v8985_v11  ;;  %v8988_v8 = vld [vmem:[#allocation135_spill] sm:$0xff]  ;;  %v8989_v30 = vld [vmem:[#allocation137_spill] sm:$0xff] }
 0x283   :  { %v4417_v14 = vpack.c.bf16 %v8989_v30, %v8988_v8  ;;  %v8999_v11 = vld [vmem:[#allocation159_spill] sm:$0xff]  ;;  %v9002_v8 = vld [vmem:[#allocation161_spill] sm:$0xff] }
 0x285   :  { %3954 = vmatpush1.bf16.msra.mxu1 %v8981_v38  ;;  %4410 = vmatpush1.bf16.msra.mxu0 %v4409_v18  ;;  %v8991_v38 = vld [vmem:[#allocation143_spill] sm:$0xff]  ;;  %v8992_v18 = vld [vmem:[#allocation144_spill] sm:$0xff] }
 0x286   :  { %3956 = vmatprep.subr.bf16.mxu1 %v8984_v37  ;;  %4412 = vmatprep.subr.bf16.mxu0 %v4411_v60  ;;  %v4419_v46 = vpack.c.bf16 %v8992_v18, %v8991_v38  ;;  %v8994_v37 = vld [vmem:[#allocation149_spill] sm:$0xff]  ;;  %v8995_v60 = vld [vmem:[#allocation150_spill] sm:$0xff]  ;;  %v9005_v38 = vld [vmem:[#allocation240_spill] sm:$0xff] }
 0x287   :  { %v4421_v1 = vpack.c.bf16 %v8995_v60, %v8994_v37  ;;  %v9008_v37 = vld [vmem:[#allocation241_spill] sm:$0xff] }
 0x289   :  { %3958 = vmatpush1.bf16.msra.mxu1 %v8987_v10  ;;  %4414 = vmatpush1.bf16.msra.mxu0 %v4413_v39  ;;  %v8997_v10 = vld [vmem:[#allocation157_spill] sm:$0xff]  ;;  %v8998_v39 = vld [vmem:[#allocation158_spill] sm:$0xff] }
 0x28a   :  { %3960 = vmatprep.subr.bf16.mxu1 %v8990_v55  ;;  %4416 = vmatprep.subr.bf16.mxu0 %v4415_v21  ;;  %v4423_v26 = vpack.c.bf16 %v8998_v39, %v8997_v10  ;;  %v9000_v55 = vld [vmem:[#allocation162_spill] sm:$0xff]  ;;  %v9001_v21 = vld [vmem:[#allocation163_spill] sm:$0xff] }
 0x28b   :  { %v4425_v30 = vpack.c.bf16 %v9001_v21, %v9000_v55  ;;  %v9011_v10 = vld [vmem:[#allocation242_spill] sm:$0xff]  ;;  %v9014_v55 = vld [vmem:[#allocation243_spill] sm:$0xff] }
 0x28d   :  { %3962 = vmatpush1.bf16.msra.mxu1 %v8993_v3  ;;  %4418 = vmatpush1.bf16.msra.mxu0 %v4417_v14  ;;  %v9003_v3 = vld [vmem:[#allocation170_spill] sm:$0xff]  ;;  %v9004_v14 = vld [vmem:[#allocation171_spill] sm:$0xff] }
 0x28e   :  { %3964 = vmatprep.subr.bf16.mxu1 %v8996_v9  ;;  %4420 = vmatprep.subr.bf16.mxu0 %v4419_v46  ;;  %v4427_v18 = vpack.c.bf16 %v9004_v14, %v9003_v3  ;;  %v9006_v9 = vld [vmem:[#allocation172_spill] sm:$0xff]  ;;  %v9007_v46 = vld [vmem:[#allocation173_spill] sm:$0xff] }
 0x28f   :  { %v4429_v60 = vpack.c.bf16 %v9007_v46, %v9006_v9  ;;  %v9017_v3 = vld [vmem:[#allocation244_spill] sm:$0xff]  ;;  %v9020_v9 = vld [vmem:[#allocation245_spill] sm:$0xff] }
 0x291   :  { %3966 = vmatpush1.bf16.msra.mxu1 %v8999_v11  ;;  %4422 = vmatpush1.bf16.msra.mxu0 %v4421_v1  ;;  %v9009_v11 = vld [vmem:[#allocation178_spill] sm:$0xff]  ;;  %v9010_v1 = vld [vmem:[#allocation179_spill] sm:$0xff] }
 0x292   :  { %3968 = vmatprep.subr.bf16.mxu1 %v9002_v8  ;;  %4424 = vmatprep.subr.bf16.mxu0 %v4423_v26  ;;  %v4431_v39 = vpack.c.bf16 %v9010_v1, %v9009_v11  ;;  %v9012_v8 = vld [vmem:[#allocation180_spill] sm:$0xff]  ;;  %v9013_v26 = vld [vmem:[#allocation181_spill] sm:$0xff] }
 0x293   :  { %v4433_v21 = vpack.c.bf16 %v9013_v26, %v9012_v8 }
 0x295   :  { %3970 = vmatpush1.bf16.msra.mxu1 %v9005_v38  ;;  %4426 = vmatpush1.bf16.msra.mxu0 %v4425_v30  ;;  %v9015_v38 = vld [vmem:[#allocation191_spill] sm:$0xff]  ;;  %v9016_v30 = vld [vmem:[#allocation193_spill] sm:$0xff] }
 0x296   :  { %3972 = vmatprep.subr.bf16.mxu1 %v9008_v37  ;;  %4428 = vmatprep.subr.bf16.mxu0 %v4427_v18  ;;  %v4435_v14 = vpack.c.bf16 %v9016_v30, %v9015_v38  ;;  %v9018_v37 = vld [vmem:[#allocation196_spill] sm:$0xff]  ;;  %v9019_v18 = vld [vmem:[#allocation197_spill] sm:$0xff] }
 0x297   :  { %v4437_v46 = vpack.c.bf16 %v9019_v18, %v9018_v37  ;;  %v9025_v30 = vld [vmem:[#allocation13_spill] sm:$0xff]  ;;  %v9030_v37 = vld [vmem:[#allocation14_spill] sm:$0xff] }
 0x298   :  { %v9027_v18 = vld [vmem:[#allocation213_spill] sm:$0xff] }
 0x299   :  { %3974 = vmatpush1.bf16.msra.mxu1 %v9011_v10  ;;  %4430 = vmatpush1.bf16.msra.mxu0 %v4429_v60  ;;  %v9021_v10 = vld [vmem:[#allocation198_spill] sm:$0xff]  ;;  %v9022_v60 = vld [vmem:[#allocation199_spill] sm:$0xff] }
 0x29a   :  { %3976 = vmatprep.subr.bf16.mxu1 %v9014_v55  ;;  %4432 = vmatprep.subr.bf16.mxu0 %v4431_v39  ;;  %v4439_v1 = vpack.c.bf16 %v9022_v60, %v9021_v10  ;;  %v9023_v39 = vld [vmem:[#allocation12_spill] sm:$0xff]  ;;  %v9031_v60 = vand.u32 4294901760, %v9030_v37  ;;  %v9032_v10 = vld [vmem:[#allocation15_spill] sm:$0xff] }
 0x29b   :  { %v9024_v55 = vand.u32 4294901760, %v9023_v39  ;;  %v9037_v39 = vld [vmem:[#allocation17_spill] sm:$0xff] }
 0x29d   :  { %3978 = vmatpush1.bf16.msra.mxu1 %v9017_v3  ;;  %4434 = vmatpush1.bf16.msra.mxu0 %v4433_v21  ;;  %v9026_v3 = vand.u32 4294901760, %v9025_v30 }
 0x29e   :  { %3980 = vmatprep.subr.bf16.mxu1 %v9020_v9  ;;  %4436 = vmatprep.subr.bf16.mxu0 %v4435_v14  ;;  %v9028_v9 = vld [vmem:[#allocation204_spill] sm:$0xff] }
 0x29f   :  { %v7112_v21 = vpack.c.bf16 %v9026_v3, %v9024_v55  ;;  %v9029_v14 = vpack.c.bf16 %v9027_v18, %v9028_v9  ;;  %v9038_v55 = vand.u32 4294901760, %v9037_v39 }
 0x2a1   :  { %3982 = vmatpush1.bf16.msra.mxu1 %v6881_v12  ;;  %4438 = vmatpush1.bf16.msra.mxu0 %v4437_v46  ;;  %v9033_v12 = vand.u32 4294901760, %v9032_v10  ;;  %v9041_v10 = vld [vmem:[#allocation19_spill] sm:$0xff] }
 0x2a2   :  { %3984 = vmatprep.subr.bf16.mxu1 %v6884_v44  ;;  %4440 = vmatprep.subr.bf16.mxu0 %v4439_v1  ;;  %v9034_v44 = vld [vmem:[#allocation246_spill] sm:$0xff]  ;;  %v9035_v1 = vld [vmem:[#allocation16_spill] sm:$0xff] }
 0x2a3   :  { %v7122_v46 = vpack.c.bf16 %v9033_v12, %v9031_v60  ;;  %v9036_v30 = vand.u32 4294901760, %v9035_v1  ;;  %v9042_v60 = vand.u32 4294901760, %v9041_v10  ;;  %v9044_v12 = vld [vmem:[#allocation28_spill] sm:$0xff]  ;;  %v9046_v1 = vld [vmem:[#allocation29_spill] sm:$0xff] }
 0x2a5   :  { %3986 = vmatpush1.bf16.msra.mxu1 %v6895_v25  ;;  %4442 = vmatpush1.bf16.msra.mxu0 %v9029_v14  ;;  %v7130_v3 = vpack.c.bf16 %v9038_v55, %v9036_v30  ;;  %v9039_v25 = vld [vmem:[#allocation18_spill] sm:$0xff]  ;;  %v9047_v30 = vand.u32 4294901760, %v9046_v1 }
 0x2a6   :  { %3988 = vmatprep.subr.bf16.mxu1 %v9034_v44  ;;  %4444 = vmatprep.subr.bf16.mxu0 %v7112_v21  ;;  %v9040_v37 = vand.u32 4294901760, %v9039_v25  ;;  %v9045_v44 = vand.u32 4294901760, %v9044_v12  ;;  %v9050_v55 = vld [vmem:[#allocation30_spill] sm:$0xff]  ;;  %v9052_v25 = vld [vmem:[#allocation31_spill] sm:$0xff] }
 0x2a8   :  { %3098 = vmatmul.mubr.f32.vlgmr.msra.gmra.mrb[2].mxu0 %v6991_v31  ;;  %v7139_v14 = vpack.c.bf16 %v9042_v60, %v9040_v37  ;;  %v7147_v39 = vpack.c.bf16 %v9047_v30, %v9045_v44  ;;  %v9053_v37 = vand.u32 4294901760, %v9052_v25  ;;  %v9055_v60 = vld [vmem:[#allocation35_spill] sm:$0xff]  ;;  %v9057_v44 = vld [vmem:[#allocation36_spill] sm:$0xff]  ;;  %v9064_v25 = vld [vmem:[#allocation46_spill] sm:$0xff] }
 0x2a9   :  { %3990 = vmatpush1.bf16.msra.mxu1 %v6922_v43  ;;  %4446 = vmatpush1.bf16.msra.mxu0 %v7122_v46  ;;  %v9049_v43 = vpack.c.bf16 %v5621_v27, %v5619_v19  ;;  %v9056_v12 = vand.u32 4294901760, %v9055_v60  ;;  %v9058_v1 = vand.u32 4294901760, %v9057_v44 }
 0x2aa   :  { %9043 = vst [vmem:[#allocation124_spill] sm:$0xff] %v7139_v14  ;;  %3235 = vmatprep.mubr.f32.mxu0 %v7011_v17  ;;  %3992 = vmatprep.subr.bf16.mxu1 %v6926_v7  ;;  %9048 = vst [vmem:[#allocation127_spill] sm:$0xff] %v7147_v39  ;;  %v9051_v7 = vand.u32 4294901760, %v9050_v55  ;;  %v9062_v55 = vld [vmem:[#allocation42_spill] sm:$0xff] }
 0x2ab   :  { %4448 = vmatprep.subr.bf16.mxu0 %v7130_v3  ;;  %v7166_v30 = vpack.c.bf16 %v9058_v1, %v9056_v12  ;;  %v9067_v12 = vld [vmem:[#allocation48_spill] sm:$0xff]  ;;  %v9069_v1 = vld [vmem:[#allocation51_spill] sm:$0xff] }
 0x2ac   :  { %v7160_v10 = vpack.c.bf16 %v9053_v37, %v9051_v7  ;;  %v9063_v7 = vand.u32 4294901760, %v9062_v55  ;;  %v9065_v37 = vand.u32 4294901760, %v9064_v25  ;;  %v9068_v44 = vand.u32 4294901760, %v9067_v12  ;;  %v9075_v55 = vld [vmem:[#allocation54_spill] sm:$0xff] }
 0x2ad   :  { %3994 = vmatpush1.bf16.msra.mxu1 %v6932_v28  ;;  %4450 = vmatpush1.bf16.msra.mxu0 %v7139_v14  ;;  %9059 = vst [vmem:[#allocation141_spill] sm:$0xff] %v7166_v30  ;;  %v9060_v28 = vpack.c.bf16 %v5646_v58, %v5644_v52  ;;  %v9082_v12 = vld [vmem:[#allocation62_spill] sm:$0xff] }
 0x2ae   :  { %3996 = vmatprep.subr.bf16.mxu1 %v9049_v43  ;;  %4452 = vmatprep.subr.bf16.mxu0 %v7147_v39  ;;  %9054 = vst [vmem:[#allocation138_spill] sm:$0xff] %v7160_v10  ;;  %v9061_v43 = vpack.c.bf16 %v5676_v41, %v5663_v40  ;;  %v7181_v60 = vpack.c.bf16 %v9065_v37, %v9063_v7  ;;  %v9077_v7 = vld [vmem:[#allocation55_spill] sm:$0xff]  ;;  %v9079_v37 = vld [vmem:[#allocation56_spill] sm:$0xff] }
 0x2af   :  { %v9078_v25 = vand.u32 4294901760, %v9077_v7  ;;  %v9091_v7 = vld [vmem:[#allocation68_spill] sm:$0xff] }
 0x2b0   :  { %1611 = vmatmul.mubr.f32.vlgmr.msra.gmra.mrb[2].mxu1 %v6984_v4  ;;  %9066 = vst [vmem:[#allocation145_spill] sm:$0xff] %v7181_v60 }
 0x2b1   :  { %3998 = vmatpush1.bf16.msra.mxu1 %v9060_v28  ;;  %1811 = vmatprep.mubr.f32.mxu1 %v6999_v29  ;;  %v9070_v28 = vand.u32 4294901760, %v9069_v1  ;;  %v9072_v29 = vld [vmem:[#allocation47_spill] sm:$0xff] }
 0x2b2   :  { %4454 = vmatpush1.bf16.msra.mxu0 %v7160_v10  ;;  %4000 = vmatprep.subr.bf16.mxu1 %v9061_v43  ;;  %v9073_v10 = vpack.c.bf16 %v5712_v5, %v9072_v29  ;;  %v9074_v43 = vld [vmem:[#allocation58_spill] sm:$0xff]  ;;  %v9084_v1 = vld [vmem:[#allocation67_spill] sm:$0xff] }
 0x2b3   :  { %4456 = vmatprep.subr.bf16.mxu0 %v7166_v30  ;;  %v7188_v39 = vpack.c.bf16 %v9070_v28, %v9068_v44  ;;  %v9076_v41 = vpack.c.bf16 %v9074_v43, %v9075_v55  ;;  %v9080_v30 = vand.u32 4294901760, %v9079_v37  ;;  %v9083_v44 = vand.u32 4294901760, %v9082_v12  ;;  %v9095_v37 = vld [vmem:[#allocation72_spill] sm:$0xff] }
 0x2b4   :  { %v9085_v28 = vand.u32 4294901760, %v9084_v1  ;;  %v9098_v12 = vld [vmem:[#allocation76_spill] sm:$0xff] }
 0x2b5   :  { %9071 = vst [vmem:[#allocation155_spill] sm:$0xff] %v7188_v39  ;;  %4002 = vmatpush1.bf16.msra.mxu1 %v9073_v10  ;;  %v7201_v40 = vpack.c.bf16 %v9080_v30, %v9078_v25  ;;  %v9087_v10 = vld [vmem:[#allocation64_spill] sm:$0xff]  ;;  %v9093_v30 = vld [vmem:[#allocation69_spill] sm:$0xff] }
 0x2b6   :  { %4458 = vmatpush1.bf16.msra.mxu0 %v7181_v60  ;;  %4004 = vmatprep.subr.bf16.mxu1 %v9076_v41  ;;  %v7208_v5 = vpack.c.bf16 %v9085_v28, %v9083_v44  ;;  %v9088_v60 = vld [vmem:[#allocation61_spill] sm:$0xff]  ;;  %v9090_v41 = vld [vmem:[#allocation71_spill] sm:$0xff]  ;;  %v9094_v25 = vand.u32 4294901760, %v9093_v30  ;;  %v9099_v44 = vand.u32 4294901760, %v9098_v12  ;;  %v9100_v1 = vld [vmem:[#allocation80_spill] sm:$0xff] }
 0x2b7   :  { %9081 = vst [vmem:[#allocation164_spill] sm:$0xff] %v7201_v40  ;;  %4460 = vmatprep.subr.bf16.mxu0 %v7188_v39  ;;  %v9089_v29 = vpack.c.bf16 %v9087_v10, %v9088_v60  ;;  %v9092_v43 = vpack.c.bf16 %v9090_v41, %v9091_v7  ;;  %v9096_v39 = vand.u32 4294901760, %v9095_v37  ;;  %v9101_v28 = vand.u32 4294901760, %v9100_v1  ;;  %v9106_v30 = vld [vmem:[#allocation82_spill] sm:$0xff]  ;;  %v9110_v37 = vld [vmem:[#allocation88_spill] sm:$0xff] }
 0x2b8   :  { %9086 = vst [vmem:[#allocation165_spill] sm:$0xff] %v7208_v5  ;;  %v9113_v12 = vld [vmem:[#allocation90_spill] sm:$0xff] }
 0x2b9   :  { %4006 = vmatpush1.bf16.msra.mxu1 %v9089_v29  ;;  %v7221_v55 = vpack.c.bf16 %v9096_v39, %v9094_v25  ;;  %v7228_v10 = vpack.c.bf16 %v9101_v28, %v9099_v44  ;;  %v9103_v29 = vld [vmem:[#allocation75_spill] sm:$0xff]  ;;  %v9114_v44 = vand.u32 4294901760, %v9113_v12  ;;  %v9115_v1 = vld [vmem:[#allocation94_spill] sm:$0xff]  ;;  %v9127_v12 = vld [vmem:[#allocation104_spill] sm:$0xff] }
 0x2ba   :  { %4462 = vmatpush1.bf16.msra.mxu0 %v7201_v40  ;;  %4008 = vmatprep.subr.bf16.mxu1 %v9092_v43  ;;  %v9104_v40 = vpack.c.bf16 %v5835_v36, %v9103_v29  ;;  %v9105_v43 = vld [vmem:[#allocation85_spill] sm:$0xff]  ;;  %v9108_v39 = vld [vmem:[#allocation83_spill] sm:$0xff]  ;;  %v9116_v28 = vand.u32 4294901760, %v9115_v1 }
 0x2bb   :  { %9097 = vst [vmem:[#allocation226_spill] sm:$0xff] %v7221_v55  ;;  %4464 = vmatprep.subr.bf16.mxu0 %v7208_v5  ;;  %9102 = vst [vmem:[#allocation227_spill] sm:$0xff] %v7228_v10  ;;  %v9107_v41 = vpack.c.bf16 %v9105_v43, %v9106_v30  ;;  %v9109_v25 = vand.u32 4294901760, %v9108_v39  ;;  %v9111_v5 = vand.u32 4294901760, %v9110_v37  ;;  %v9129_v1 = vld [vmem:[#allocation109_spill] sm:$0xff] }
 0x2bc   :  { %v7248_v36 = vpack.c.bf16 %v9116_v28, %v9114_v44  ;;  %v9128_v44 = vand.u32 4294901760, %v9127_v12  ;;  %v9130_v28 = vand.u32 4294901760, %v9129_v1  ;;  %v9141_v12 = vld [vmem:[#allocation118_spill] sm:$0xff] }
 0x2bd   :  { %4010 = vmatpush1.bf16.msra.mxu1 %v9104_v40  ;;  %v7241_v7 = vpack.c.bf16 %v9111_v5, %v9109_v25  ;;  %v9118_v40 = vld [vmem:[#allocation92_spill] sm:$0xff]  ;;  %v9122_v5 = vld [vmem:[#allocation97_spill] sm:$0xff]  ;;  %v9143_v1 = vld [vmem:[#allocation122_spill] sm:$0xff] }
 0x2be   :  { %4466 = vmatpush1.bf16.msra.mxu0 %v7221_v55  ;;  %4012 = vmatprep.subr.bf16.mxu1 %v9107_v41  ;;  %9117 = vst [vmem:[#allocation229_spill] sm:$0xff] %v7248_v36  ;;  %v9119_v55 = vld [vmem:[#allocation89_spill] sm:$0xff]  ;;  %v9121_v41 = vpack.c.bf16 %v8921_v15, %v8920_v13  ;;  %v9123_v39 = vand.u32 4294901760, %v9122_v5  ;;  %v9124_v25 = vld [vmem:[#allocation100_spill] sm:$0xff] }
 0x2bf   :  { %9112 = vst [vmem:[#allocation228_spill] sm:$0xff] %v7241_v7  ;;  %4468 = vmatprep.subr.bf16.mxu0 %v7228_v10  ;;  %v9120_v29 = vpack.c.bf16 %v9118_v40, %v9119_v55  ;;  %v9125_v37 = vand.u32 4294901760, %v9124_v25  ;;  %v7268_v40 = vpack.c.bf16 %v9130_v28, %v9128_v44  ;;  %v9142_v44 = vand.u32 4294901760, %v9141_v12  ;;  %v9155_v12 = vld [vmem:[#allocation132_spill] sm:$0xff] }
 0x2c0   :  { %v9144_v28 = vand.u32 4294901760, %v9143_v1  ;;  %v9157_v1 = vld [vmem:[#allocation136_spill] sm:$0xff] }
 0x2c1   :  { %4014 = vmatpush1.bf16.msra.mxu1 %v9120_v29  ;;  %v7261_v10 = vpack.c.bf16 %v9125_v37, %v9123_v39  ;;  %9131 = vst [vmem:[#allocation231_spill] sm:$0xff] %v7268_v40  ;;  %v9132_v29 = vld [vmem:[#allocation103_spill] sm:$0xff]  ;;  %v9138_v37 = vld [vmem:[#allocation114_spill] sm:$0xff] }
 0x2c2   :  { %4470 = vmatpush1.bf16.msra.mxu0 %v7241_v7  ;;  %4016 = vmatprep.subr.bf16.mxu1 %v9121_v41  ;;  %v9133_v7 = vpack.c.bf16 %v8923_v20, %v9132_v29  ;;  %v9134_v41 = vld [vmem:[#allocation110_spill] sm:$0xff]  ;;  %v9136_v39 = vld [vmem:[#allocation111_spill] sm:$0xff]  ;;  %v7288_v20 = vpack.c.bf16 %v9144_v28, %v9142_v44  ;;  %v9156_v44 = vand.u32 4294901760, %v9155_v12  ;;  %v9158_v28 = vand.u32 4294901760, %v9157_v1 }
 0x2c3   :  { %9126 = vst [vmem:[#allocation230_spill] sm:$0xff] %v7261_v10  ;;  %4472 = vmatprep.subr.bf16.mxu0 %v7248_v36  ;;  %v9135_v5 = vpack.c.bf16 %v8925_v0, %v9134_v41  ;;  %v9137_v25 = vand.u32 4294901760, %v9136_v39  ;;  %v9139_v36 = vand.u32 4294901760, %v9138_v37  ;;  %v9169_v12 = vld [vmem:[#allocation146_spill] sm:$0xff]  ;;  %v9171_v1 = vld [vmem:[#allocation151_spill] sm:$0xff] }
 0x2c4   :  { %9145 = vst [vmem:[#allocation233_spill] sm:$0xff] %v7288_v20 }
 0x2c5   :  { %4018 = vmatpush1.bf16.msra.mxu1 %v9133_v7  ;;  %v7281_v15 = vpack.c.bf16 %v9139_v36, %v9137_v25  ;;  %v9146_v7 = vld [vmem:[#allocation120_spill] sm:$0xff]  ;;  %v9150_v36 = vld [vmem:[#allocation125_spill] sm:$0xff]  ;;  %v9152_v25 = vld [vmem:[#allocation130_spill] sm:$0xff] }
 0x2c6   :  { %4474 = vmatpush1.bf16.msra.mxu0 %v7261_v10  ;;  %4020 = vmatprep.subr.bf16.mxu1 %v9135_v5  ;;  %v9147_v10 = vld [vmem:[#allocation117_spill] sm:$0xff]  ;;  %v9149_v5 = vpack.c.bf16 %v8929_v35, %v8928_v32  ;;  %v9151_v39 = vand.u32 4294901760, %v9150_v36  ;;  %v9153_v37 = vand.u32 4294901760, %v9152_v25  ;;  %v9164_v36 = vld [vmem:[#allocation139_spill] sm:$0xff]  ;;  %v9166_v25 = vld [vmem:[#allocation142_spill] sm:$0xff] }
 0x2c7   :  { %9140 = vst [vmem:[#allocation232_spill] sm:$0xff] %v7281_v15  ;;  %4476 = vmatprep.subr.bf16.mxu0 %v7268_v40  ;;  %v9148_v29 = vpack.c.bf16 %v9146_v7, %v9147_v10  ;;  %v7308_v7 = vpack.c.bf16 %v9158_v28, %v9156_v44  ;;  %v9170_v44 = vand.u32 4294901760, %v9169_v12  ;;  %v9172_v28 = vand.u32 4294901760, %v9171_v1  ;;  %v9181_v12 = vld [vmem:[#allocation166_spill] sm:$0xff]  ;;  %v9183_v1 = vld [vmem:[#allocation167_spill] sm:$0xff] }
 0x2c8   :  { %v7301_v40 = vpack.c.bf16 %v9153_v37, %v9151_v39  ;;  %v9165_v39 = vand.u32 4294901760, %v9164_v36  ;;  %v9167_v37 = vand.u32 4294901760, %v9166_v25  ;;  %v9176_v36 = vld [vmem:[#allocation153_spill] sm:$0xff]  ;;  %v9178_v25 = vld [vmem:[#allocation156_spill] sm:$0xff] }
 0x2c9   :  { %4022 = vmatpush1.bf16.msra.mxu1 %v9148_v29  ;;  %9159 = vst [vmem:[#allocation235_spill] sm:$0xff] %v7308_v7  ;;  %v9160_v29 = vld [vmem:[#allocation134_spill] sm:$0xff] }
 0x2ca   :  { %4478 = vmatpush1.bf16.msra.mxu0 %v7281_v15  ;;  %4024 = vmatprep.subr.bf16.mxu1 %v9149_v5  ;;  %9154 = vst [vmem:[#allocation234_spill] sm:$0xff] %v7301_v40  ;;  %v9161_v15 = vld [vmem:[#allocation131_spill] sm:$0xff]  ;;  %v9163_v5 = vpack.c.bf16 %v8932_v33, %v8931_v54 }
 0x2cb   :  { %4480 = vmatprep.subr.bf16.mxu0 %v7288_v20  ;;  %v9162_v10 = vpack.c.bf16 %v9160_v29, %v9161_v15  ;;  %v7321_v20 = vpack.c.bf16 %v9167_v37, %v9165_v39  ;;  %v7328_v29 = vpack.c.bf16 %v9172_v28, %v9170_v44  ;;  %v9177_v39 = vand.u32 4294901760, %v9176_v36  ;;  %v9188_v36 = vld [vmem:[#allocation168_spill] sm:$0xff] }
 0x2cc   :  { %v9179_v37 = vand.u32 4294901760, %v9178_v25  ;;  %v9182_v44 = vand.u32 4294901760, %v9181_v12  ;;  %v9184_v28 = vand.u32 4294901760, %v9183_v1  ;;  %v9190_v25 = vld [vmem:[#allocation169_spill] sm:$0xff]  ;;  %v9193_v12 = vld [vmem:[#allocation174_spill] sm:$0xff]  ;;  %v9195_v1 = vld [vmem:[#allocation175_spill] sm:$0xff] }
 0x2cd   :  { %4026 = vmatpush1.bf16.msra.mxu1 %v9162_v10  ;;  %9168 = vst [vmem:[#allocation236_spill] sm:$0xff] %v7321_v20  ;;  %9173 = vst [vmem:[#allocation237_spill] sm:$0xff] %v7328_v29  ;;  %v9174_v10 = vpack.c.bf16 %v8900_v57, %v8933_v48 }
 0x2ce   :  { %4482 = vmatpush1.bf16.msra.mxu0 %v7301_v40  ;;  %4028 = vmatprep.subr.bf16.mxu1 %v9163_v5  ;;  %v9175_v5 = vpack.c.bf16 %v8934_v51, %v8901_v53  ;;  %v7348_v40 = vpack.c.bf16 %v9184_v28, %v9182_v44  ;;  %v9194_v44 = vand.u32 4294901760, %v9193_v12  ;;  %v9196_v28 = vand.u32 4294901760, %v9195_v1  ;;  %v9205_v12 = vld [vmem:[#allocation184_spill] sm:$0xff]  ;;  %v9207_v1 = vld [vmem:[#allocation185_spill] sm:$0xff] }
 0x2cf   :  { %4484 = vmatprep.subr.bf16.mxu0 %v7308_v7  ;;  %v7341_v7 = vpack.c.bf16 %v9179_v37, %v9177_v39  ;;  %v9189_v39 = vand.u32 4294901760, %v9188_v36  ;;  %v9191_v37 = vand.u32 4294901760, %v9190_v25  ;;  %v9200_v36 = vld [vmem:[#allocation176_spill] sm:$0xff]  ;;  %v9202_v25 = vld [vmem:[#allocation177_spill] sm:$0xff] }
 0x2d0   :  { %9185 = vst [vmem:[#allocation239_spill] sm:$0xff] %v7348_v40 }
 0x2d1   :  { %4030 = vmatpush1.bf16.msra.mxu1 %v9174_v10  ;;  %9180 = vst [vmem:[#allocation238_spill] sm:$0xff] %v7341_v7  ;;  %v9186_v10 = vpack.c.bf16 %v8905_v34, %v8904_v59 }
 0x2d2   :  { %4486 = vmatpush1.bf16.msra.mxu0 %v7321_v20  ;;  %4032 = vmatprep.subr.bf16.mxu1 %v9175_v5  ;;  %v9187_v5 = vpack.c.bf16 %v6506_v50, %v6501_v56  ;;  %v7368_v20 = vpack.c.bf16 %v9196_v28, %v9194_v44  ;;  %v9206_v44 = vand.u32 4294901760, %v9205_v12  ;;  %v9208_v28 = vand.u32 4294901760, %v9207_v1  ;;  %v9217_v12 = vld [vmem:[#allocation190_spill] sm:$0xff]  ;;  %v9219_v1 = vld [vmem:[#allocation192_spill] sm:$0xff] }
 0x2d3   :  { %4488 = vmatprep.subr.bf16.mxu0 %v7328_v29  ;;  %v7361_v29 = vpack.c.bf16 %v9191_v37, %v9189_v39  ;;  %v9201_v39 = vand.u32 4294901760, %v9200_v36  ;;  %v9203_v37 = vand.u32 4294901760, %v9202_v25  ;;  %v9212_v36 = vld [vmem:[#allocation187_spill] sm:$0xff]  ;;  %v9214_v25 = vld [vmem:[#allocation188_spill] sm:$0xff] }
 0x2d4   :  { %9197 = vst [vmem:[#allocation152_spill] sm:$0xff] %v7368_v20 }
 0x2d5   :  { %4034 = vmatpush1.bf16.msra.mxu1 %v9186_v10  ;;  %9192 = vst [vmem:[#allocation148_spill] sm:$0xff] %v7361_v29  ;;  %v9198_v10 = vpack.c.bf16 %v6516_v2, %v6511_v45 }
 0x2d6   :  { %4490 = vmatpush1.bf16.msra.mxu0 %v7341_v7  ;;  %4036 = vmatprep.subr.bf16.mxu1 %v9187_v5  ;;  %v9199_v5 = vpack.c.bf16 %v6526_v6, %v6521_v61  ;;  %v7388_v7 = vpack.c.bf16 %v9208_v28, %v9206_v44  ;;  %v9218_v44 = vand.u32 4294901760, %v9217_v12  ;;  %v9220_v28 = vand.u32 4294901760, %v9219_v1  ;;  %v9230_v12 = vld [vmem:[#allocation20_spill] sm:$0xff]  ;;  %v9232_v1 = vld [vmem:[#allocation21_spill] sm:$0xff] }
 0x2d7   :  { %4492 = vmatprep.subr.bf16.mxu0 %v7348_v40  ;;  %v7381_v40 = vpack.c.bf16 %v9203_v37, %v9201_v39  ;;  %v9213_v39 = vand.u32 4294901760, %v9212_v36  ;;  %v9215_v37 = vand.u32 4294901760, %v9214_v25  ;;  %v9225_v36 = vld [vmem:[#allocation200_spill] sm:$0xff]  ;;  %v9227_v25 = vld [vmem:[#allocation201_spill] sm:$0xff] }
 0x2d8   :  { %9209 = vst [vmem:[#allocation161_spill] sm:$0xff] %v7388_v7 }
 0x2d9   :  { %4038 = vmatpush1.bf16.msra.mxu1 %v9198_v10  ;;  %9204 = vst [vmem:[#allocation159_spill] sm:$0xff] %v7381_v40  ;;  %v9210_v10 = vpack.c.bf16 %v6536_v47, %v6531_v62 }
 0x2da   :  { %4494 = vmatpush1.bf16.msra.mxu0 %v7361_v29  ;;  %4040 = vmatprep.subr.bf16.mxu1 %v9199_v5  ;;  %v9211_v5 = vpack.c.bf16 %v6547_v63, %v6542_v24  ;;  %v7408_v29 = vpack.c.bf16 %v9220_v28, %v9218_v44  ;;  %v9231_v44 = vand.u32 4294901760, %v9230_v12  ;;  %v9233_v28 = vand.u32 4294901760, %v9232_v1  ;;  %v9244_v12 = vld [vmem:[#allocation24_spill] sm:$0xff]  ;;  %v9246_v1 = vld [vmem:[#allocation25_spill] sm:$0xff] }
 0x2db   :  { %4496 = vmatprep.subr.bf16.mxu0 %v7368_v20  ;;  %v7401_v20 = vpack.c.bf16 %v9215_v37, %v9213_v39  ;;  %v9226_v39 = vand.u32 4294901760, %v9225_v36  ;;  %v9228_v37 = vand.u32 4294901760, %v9227_v25  ;;  %v9240_v25 = vld [vmem:[#allocation22_spill] sm:$0xff]  ;;  %v9245_v63 = vand.u32 4294901760, %v9244_v12 }
 0x2dc   :  { %9221 = vst [vmem:[#allocation241_spill] sm:$0xff] %v7408_v29 }
 0x2dd   :  { %4042 = vmatpush1.bf16.msra.mxu1 %v9210_v10  ;;  %9216 = vst [vmem:[#allocation240_spill] sm:$0xff] %v7401_v20  ;;  %v9222_v10 = vld [vmem:[#allocation207_spill] sm:$0xff] }
 0x2de   :  { %4498 = vmatpush1.bf16.msra.mxu0 %v7381_v40  ;;  %4044 = vmatprep.subr.bf16.mxu1 %v9211_v5  ;;  %v9223_v40 = vpack.c.bf16 %v6553_v49, %v9222_v10  ;;  %v9224_v5 = vpack.c.bf16 %v6557_v22, %v6555_v42  ;;  %v4507_v49 = vpack.c.bf16 %v9233_v28, %v9231_v44  ;;  %v9235_v10 = vld [vmem:[#allocation211_spill] sm:$0xff]  ;;  %v9247_v44 = vand.u32 4294901760, %v9246_v1 }
 0x2df   :  { %4500 = vmatprep.subr.bf16.mxu0 %v7388_v7  ;;  %v7421_v7 = vpack.c.bf16 %v9228_v37, %v9226_v39  ;;  %v9238_v22 = vld [vmem:[#allocation215_spill] sm:$0xff]  ;;  %v9241_v39 = vand.u32 4294901760, %v9240_v25 }
 0x2e0   :  { %v9242_v37 = vld [vmem:[#allocation23_spill] sm:$0xff]  ;;  %v4511_v28 = vpack.c.bf16 %v9247_v44, %v9245_v63  ;;  %v9258_v63 = vld [vmem:[#allocation33_spill] sm:$0xff]  ;;  %v9260_v44 = vld [vmem:[#allocation34_spill] sm:$0xff] }
 0x2e1   :  { %4046 = vmatpush1.bf16.msra.mxu1 %v9223_v40  ;;  %9229 = vst [vmem:[#allocation178_spill] sm:$0xff] %v7421_v7  ;;  %v9234_v40 = vld [vmem:[#allocation212_spill] sm:$0xff]  ;;  %v9243_v42 = vand.u32 4294901760, %v9242_v37  ;;  %v9259_v1 = vand.u32 4294901760, %v9258_v63 }
 0x2e2   :  { %4502 = vmatpush1.bf16.msra.mxu0 %v7401_v20  ;;  %4048 = vmatprep.subr.bf16.mxu1 %v9224_v5  ;;  %v9236_v20 = vpack.c.bf16 %v9234_v40, %v9235_v10  ;;  %v9237_v5 = vld [vmem:[#allocation216_spill] sm:$0xff]  ;;  %v9249_v40 = vld [vmem:[#allocation218_spill] sm:$0xff] }
 0x2e3   :  { %4504 = vmatprep.subr.bf16.mxu0 %v7408_v29  ;;  %v9239_v36 = vpack.c.bf16 %v9237_v5, %v9238_v22  ;;  %v4509_v29 = vpack.c.bf16 %v9243_v42, %v9241_v39  ;;  %v9253_v5 = vld [vmem:[#allocation27_spill] sm:$0xff]  ;;  %v9256_v39 = vld [vmem:[#allocation221_spill] sm:$0xff]  ;;  %v9261_v22 = vand.u32 4294901760, %v9260_v44 }
 0x2e4   :  { %v9254_v37 = vand.u32 4294901760, %v9253_v5 }
 0x2e5   :  { %4050 = vmatpush1.bf16.msra.mxu1 %v9236_v20  ;;  %v9248_v20 = vld [vmem:[#allocation219_spill] sm:$0xff]  ;;  %v4515_v10 = vpack.c.bf16 %v9261_v22, %v9259_v1  ;;  %v9274_v22 = vld [vmem:[#allocation37_spill] sm:$0xff]  ;;  %v9276_v1 = vld [vmem:[#allocation52_spill] sm:$0xff] }
 0x2e6   :  { %4506 = vmatpush1.bf16.msra.mxu0 %v7421_v7  ;;  %4052 = vmatprep.subr.bf16.mxu1 %v9239_v36  ;;  %v9250_v7 = vpack.c.bf16 %v9248_v20, %v9249_v40  ;;  %v9251_v36 = vld [vmem:[#allocation26_spill] sm:$0xff]  ;;  %v9262_v20 = vld [vmem:[#allocation225_spill] sm:$0xff]  ;;  %v9265_v40 = vld [vmem:[#allocation32_spill] sm:$0xff]  ;;  %v9277_v44 = vand.u32 4294901760, %v9276_v1 }
 0x2e7   :  { %4508 = vmatprep.subr.bf16.mxu0 %v4507_v49  ;;  %v9252_v25 = vand.u32 4294901760, %v9251_v36  ;;  %v9255_v49 = vld [vmem:[#allocation222_spill] sm:$0xff]  ;;  %v9290_v1 = vld [vmem:[#allocation73_spill] sm:$0xff] }
 0x2e8   :  { %v9257_v12 = vpack.c.bf16 %v9255_v49, %v9256_v39  ;;  %v9266_v36 = vld [vmem:[#allocation38_spill] sm:$0xff]  ;;  %v9272_v49 = vld [vmem:[#allocation45_spill] sm:$0xff] }
 0x2e9   :  { %3239 = vmatmul.mubr.f32.vlgmr.msra.gmra.mrb[2].mxu0 %v7003_v16  ;;  %4054 = vmatpush1.bf16.msra.mxu1 %v9250_v7  ;;  %v4513_v42 = vpack.c.bf16 %v9254_v37, %v9252_v25  ;;  %v9263_v7 = vld [vmem:[#allocation224_spill] sm:$0xff]  ;;  %v9267_v5 = vand.u32 4294901760, %v9266_v36  ;;  %v9268_v25 = vld [vmem:[#allocation39_spill] sm:$0xff]  ;;  %v9273_v63 = vand.u32 4294901760, %v9272_v49 }
 0x2ea   :  { %4510 = vmatpush1.bf16.msra.mxu0 %v4509_v29  ;;  %3502 = vmatprep.mubr.f32.mxu0 %v6986_v23  ;;  %v9264_v29 = vpack.c.bf16 %v9262_v20, %v9263_v7  ;;  %v9269_v37 = vand.u32 4294901760, %v9268_v25 }
 0x2eb   :  { %4056 = vmatprep.subr.bf16.mxu1 %v9257_v12  ;;  %4512 = vmatprep.subr.bf16.mxu0 %v4511_v28  ;;  %v9270_v12 = vld [vmem:[#allocation44_spill] sm:$0xff] }
 0x2ec   :  { %v4517_v24 = vpack.c.bf16 %v9269_v37, %v9267_v5  ;;  %v9271_v28 = vand.u32 4294901760, %v9270_v12  ;;  %v9282_v37 = vld [vmem:[#allocation60_spill] sm:$0xff] }
 0x2ed   :  { %4058 = vmatpush1.bf16.msra.mxu1 %v9264_v29  ;;  %v9278_v29 = vld [vmem:[#allocation53_spill] sm:$0xff]  ;;  %v9283_v49 = vand.u32 4294901760, %v9282_v37  ;;  %v9296_v37 = vld [vmem:[#allocation79_spill] sm:$0xff] }
 0x2ee   :  { %4514 = vmatpush1.bf16.msra.mxu0 %v4513_v42  ;;  %4060 = vmatprep.subr.bf16.mxu1 %v9265_v40  ;;  %v4519_v39 = vpack.c.bf16 %v9273_v63, %v9271_v28  ;;  %v9275_v42 = vld [vmem:[#allocation41_spill] sm:$0xff]  ;;  %v9279_v36 = vand.u32 4294901760, %v9278_v29  ;;  %v9288_v63 = vld [vmem:[#allocation66_spill] sm:$0xff]  ;;  %v9291_v29 = vand.u32 4294901760, %v9290_v1 }
 0x2ef   :  { %4516 = vmatprep.subr.bf16.mxu0 %v4515_v10  ;;  %v9280_v10 = vld [vmem:[#allocation59_spill] sm:$0xff]  ;;  %v9284_v28 = vld [vmem:[#allocation49_spill] sm:$0xff] }
 0x2f0   :  { %1814 = vmatmul.mubr.f32.vlgmr.msra.gmra.mrb[2].mxu1 %v6991_v31  ;;  %v4521_v5 = vpack.c.bf16 %v9279_v36, %v9277_v44  ;;  %v9281_v25 = vand.u32 4294901760, %v9280_v10  ;;  %v9285_v31 = vld [vmem:[#allocation57_spill] sm:$0xff]  ;;  %v9292_v44 = vld [vmem:[#allocation74_spill] sm:$0xff]  ;;  %v9294_v10 = vld [vmem:[#allocation63_spill] sm:$0xff] }
 0x2f1   :  { %4062 = vmatpush1.bf16.msra.mxu1 %v9274_v22  ;;  %1951 = vmatprep.mubr.f32.mxu1 %v7011_v17  ;;  %v9286_v17 = vld [vmem:[#allocation65_spill] sm:$0xff] }
 0x2f2   :  { %4518 = vmatpush1.bf16.msra.mxu0 %v4517_v24  ;;  %4064 = vmatprep.subr.bf16.mxu1 %v9275_v42  ;;  %v4523_v12 = vpack.c.bf16 %v9283_v49, %v9281_v25  ;;  %v9287_v24 = vand.u32 4294901760, %v9286_v17  ;;  %v9289_v42 = vand.u32 4294901760, %v9288_v63  ;;  %v9295_v25 = vld [vmem:[#allocation70_spill] sm:$0xff]  ;;  %v9298_v49 = vld [vmem:[#allocation81_spill] sm:$0xff] }
 0x2f3   :  { %4520 = vmatprep.subr.bf16.mxu0 %v4519_v39  ;;  %v9293_v39 = vand.u32 4294901760, %v9292_v44  ;;  %v9300_v17 = vld [vmem:[#allocation86_spill] sm:$0xff]  ;;  %v9304_v1 = vld [vmem:[#allocation77_spill] sm:$0xff] }
 0x2f4   :  { %v4525_v22 = vpack.c.bf16 %v9289_v42, %v9287_v24  ;;  %v9301_v63 = vand.u32 4294901760, %v9300_v17  ;;  %v9302_v42 = vld [vmem:[#allocation87_spill] sm:$0xff]  ;;  %v9306_v44 = vld [vmem:[#allocation93_spill] sm:$0xff] }
 0x2f5   :  { %4066 = vmatpush1.bf16.msra.mxu1 %v9284_v28  ;;  %v4527_v36 = vpack.c.bf16 %v9293_v39, %v9291_v29  ;;  %v9305_v29 = vld [vmem:[#allocation84_spill] sm:$0xff]  ;;  %v9308_v39 = vld [vmem:[#allocation95_spill] sm:$0xff] }
 0x2f6   :  { %4522 = vmatpush1.bf16.msra.mxu0 %v4521_v5  ;;  %4068 = vmatprep.subr.bf16.mxu1 %v9285_v31  ;;  %v9297_v5 = vand.u32 4294901760, %v9296_v37  ;;  %v9299_v31 = vand.u32 4294901760, %v9298_v49  ;;  %v9310_v37 = vld [vmem:[#allocation101_spill] sm:$0xff]  ;;  %v9314_v17 = vld [vmem:[#allocation91_spill] sm:$0xff] }
 0x2f7   :  { %4524 = vmatprep.subr.bf16.mxu0 %v4523_v12  ;;  %v9303_v12 = vand.u32 4294901760, %v9302_v42  ;;  %v9311_v49 = vand.u32 4294901760, %v9310_v37  ;;  %v9316_v42 = vld [vmem:[#allocation107_spill] sm:$0xff]  ;;  %v9324_v37 = vld [vmem:[#allocation105_spill] sm:$0xff] }
 0x2f8   :  { %v4529_v28 = vpack.c.bf16 %v9299_v31, %v9297_v5  ;;  %v9312_v31 = vld [vmem:[#allocation102_spill] sm:$0xff] }
 0x2f9   :  { %4070 = vmatpush1.bf16.msra.mxu1 %v9294_v10  ;;  %v4531_v24 = vpack.c.bf16 %v9303_v12, %v9301_v63  ;;  %v9315_v63 = vld [vmem:[#allocation98_spill] sm:$0xff]  ;;  %v9318_v12 = vld [vmem:[#allocation108_spill] sm:$0xff] }
 0x2fa   :  { %4526 = vmatpush1.bf16.msra.mxu0 %v4525_v22  ;;  %4072 = vmatprep.subr.bf16.mxu1 %v9295_v25  ;;  %v9307_v22 = vand.u32 4294901760, %v9306_v44  ;;  %v9309_v25 = vand.u32 4294901760, %v9308_v39  ;;  %v9320_v44 = vld [vmem:[#allocation115_spill] sm:$0xff] }
 0x2fb   :  { %4528 = vmatprep.subr.bf16.mxu0 %v4527_v36  ;;  %v9313_v36 = vand.u32 4294901760, %v9312_v31  ;;  %v9321_v39 = vand.u32 4294901760, %v9320_v44  ;;  %v9326_v31 = vld [vmem:[#allocation121_spill] sm:$0xff]  ;;  %v9334_v44 = vld [vmem:[#allocation119_spill] sm:$0xff] }
 0x2fc   :  { %v4533_v10 = vpack.c.bf16 %v9309_v25, %v9307_v22  ;;  %v9322_v25 = vld [vmem:[#allocation116_spill] sm:$0xff] }
 0x2fd   :  { %4074 = vmatpush1.bf16.msra.mxu1 %v9304_v1  ;;  %v4535_v5 = vpack.c.bf16 %v9313_v36, %v9311_v49  ;;  %v9325_v49 = vld [vmem:[#allocation112_spill] sm:$0xff]  ;;  %v9328_v36 = vld [vmem:[#allocation123_spill] sm:$0xff] }
 0x2fe   :  { %4530 = vmatpush1.bf16.msra.mxu0 %v4529_v28  ;;  %4076 = vmatprep.subr.bf16.mxu1 %v9305_v29  ;;  %v9317_v28 = vand.u32 4294901760, %v9316_v42  ;;  %v9319_v29 = vand.u32 4294901760, %v9318_v12  ;;  %v9330_v42 = vld [vmem:[#allocation128_spill] sm:$0xff] }
 0x2ff   :  { %4532 = vmatprep.subr.bf16.mxu0 %v4531_v24  ;;  %v9323_v24 = vand.u32 4294901760, %v9322_v25  ;;  %v9331_v12 = vand.u32 4294901760, %v9330_v42  ;;  %v9336_v25 = vld [vmem:[#allocation135_spill] sm:$0xff]  ;;  %v9344_v42 = vld [vmem:[#allocation133_spill] sm:$0xff] }
 0x300   :  { %v4537_v1 = vpack.c.bf16 %v9319_v29, %v9317_v28  ;;  %v9332_v29 = vld [vmem:[#allocation129_spill] sm:$0xff] }
 0x301   :  { %4078 = vmatpush1.bf16.msra.mxu1 %v9314_v17  ;;  %v4539_v22 = vpack.c.bf16 %v9323_v24, %v9321_v39  ;;  %v9335_v39 = vld [vmem:[#allocation126_spill] sm:$0xff]  ;;  %v9338_v24 = vld [vmem:[#allocation137_spill] sm:$0xff] }
 0x302   :  { %4534 = vmatpush1.bf16.msra.mxu0 %v4533_v10  ;;  %4080 = vmatprep.subr.bf16.mxu1 %v9315_v63  ;;  %v9327_v10 = vand.u32 4294901760, %v9326_v31  ;;  %v9329_v63 = vand.u32 4294901760, %v9328_v36  ;;  %v9340_v31 = vld [vmem:[#allocation143_spill] sm:$0xff] }
 0x303   :  { %4536 = vmatprep.subr.bf16.mxu0 %v4535_v5  ;;  %v9333_v5 = vand.u32 4294901760, %v9332_v29  ;;  %v9341_v36 = vand.u32 4294901760, %v9340_v31  ;;  %v9346_v29 = vld [vmem:[#allocation149_spill] sm:$0xff]  ;;  %v9354_v31 = vld [vmem:[#allocation147_spill] sm:$0xff] }
 0x304   :  { %v4541_v17 = vpack.c.bf16 %v9329_v63, %v9327_v10  ;;  %v9342_v63 = vld [vmem:[#allocation144_spill] sm:$0xff] }
 0x305   :  { %4082 = vmatpush1.bf16.msra.mxu1 %v9324_v37  ;;  %v4543_v28 = vpack.c.bf16 %v9333_v5, %v9331_v12  ;;  %v9345_v12 = vld [vmem:[#allocation140_spill] sm:$0xff]  ;;  %v9348_v5 = vld [vmem:[#allocation150_spill] sm:$0xff] }
 0x306   :  { %4538 = vmatpush1.bf16.msra.mxu0 %v4537_v1  ;;  %4084 = vmatprep.subr.bf16.mxu1 %v9325_v49  ;;  %v9337_v1 = vand.u32 4294901760, %v9336_v25  ;;  %v9339_v49 = vand.u32 4294901760, %v9338_v24  ;;  %v9350_v25 = vld [vmem:[#allocation157_spill] sm:$0xff] }
 0x307   :  { %4540 = vmatprep.subr.bf16.mxu0 %v4539_v22  ;;  %v9343_v22 = vand.u32 4294901760, %v9342_v63  ;;  %v9351_v24 = vand.u32 4294901760, %v9350_v25  ;;  %v9356_v63 = vld [vmem:[#allocation162_spill] sm:$0xff]  ;;  %v9364_v25 = vld [vmem:[#allocation160_spill] sm:$0xff] }
 0x308   :  { %v4545_v37 = vpack.c.bf16 %v9339_v49, %v9337_v1  ;;  %v9352_v49 = vld [vmem:[#allocation158_spill] sm:$0xff] }
 0x309   :  { %4086 = vmatpush1.bf16.msra.mxu1 %v9334_v44  ;;  %v4547_v10 = vpack.c.bf16 %v9343_v22, %v9341_v36  ;;  %v9355_v36 = vld [vmem:[#allocation154_spill] sm:$0xff]  ;;  %v9358_v22 = vld [vmem:[#allocation163_spill] sm:$0xff] }
 0x30a   :  { %4542 = vmatpush1.bf16.msra.mxu0 %v4541_v17  ;;  %4088 = vmatprep.subr.bf16.mxu1 %v9335_v39  ;;  %v9347_v17 = vand.u32 4294901760, %v9346_v29  ;;  %v9349_v39 = vand.u32 4294901760, %v9348_v5  ;;  %v9360_v29 = vld [vmem:[#allocation170_spill] sm:$0xff] }
 0x30b   :  { %4544 = vmatprep.subr.bf16.mxu0 %v4543_v28  ;;  %v9353_v28 = vand.u32 4294901760, %v9352_v49  ;;  %v9361_v5 = vand.u32 4294901760, %v9360_v29  ;;  %v9366_v49 = vld [vmem:[#allocation172_spill] sm:$0xff]  ;;  %v9374_v29 = vld [vmem:[#allocation186_spill] sm:$0xff] }
 0x30c   :  { %v4549_v44 = vpack.c.bf16 %v9349_v39, %v9347_v17  ;;  %v9362_v39 = vld [vmem:[#allocation171_spill] sm:$0xff] }
 0x30d   :  { %4090 = vmatpush1.bf16.msra.mxu1 %v9344_v42  ;;  %v4551_v1 = vpack.c.bf16 %v9353_v28, %v9351_v24  ;;  %v9365_v24 = vld [vmem:[#allocation182_spill] sm:$0xff]  ;;  %v9368_v28 = vld [vmem:[#allocation173_spill] sm:$0xff] }
 0x30e   :  { %4546 = vmatpush1.bf16.msra.mxu0 %v4545_v37  ;;  %4092 = vmatprep.subr.bf16.mxu1 %v9345_v12  ;;  %v9357_v37 = vand.u32 4294901760, %v9356_v63  ;;  %v9359_v12 = vand.u32 4294901760, %v9358_v22  ;;  %v9370_v63 = vand.u32 4294901760, %v9009_v11  ;;  %v9373_v22 = vld [vmem:[#allocation183_spill] sm:$0xff]  ;;  %v9380_v11 = vld [vmem:[#allocation189_spill] sm:$0xff] }
 0x30f   :  { %4548 = vmatprep.subr.bf16.mxu0 %v4547_v10  ;;  %v9363_v10 = vand.u32 4294901760, %v9362_v39 }
 0x310   :  { %v4553_v42 = vpack.c.bf16 %v9359_v12, %v9357_v37  ;;  %v9371_v12 = vld [vmem:[#allocation179_spill] sm:$0xff] }
 0x311   :  { %4094 = vmatpush1.bf16.msra.mxu1 %v9354_v31  ;;  %v4555_v17 = vpack.c.bf16 %v9363_v10, %v9361_v5  ;;  %v9376_v5 = vand.u32 4294901760, %v9013_v26  ;;  %v9377_v10 = vand.u32 4294901760, %v9015_v38  ;;  %v9390_v38 = vld [vmem:[#allocation195_spill] sm:$0xff] }
 0x312   :  { %4550 = vmatpush1.bf16.msra.mxu0 %v4549_v44  ;;  %4096 = vmatprep.subr.bf16.mxu1 %v9355_v36  ;;  %v9367_v44 = vand.u32 4294901760, %v9366_v49  ;;  %v9369_v36 = vand.u32 4294901760, %v9368_v28  ;;  %v9382_v28 = vld [vmem:[#allocation196_spill] sm:$0xff] }
 0x313   :  { %4552 = vmatprep.subr.bf16.mxu0 %v4551_v1  ;;  %v9372_v1 = vand.u32 4294901760, %v9371_v12 }
 0x314   :  { %v4557_v31 = vpack.c.bf16 %v9369_v36, %v9367_v44  ;;  %v9378_v36 = vld [vmem:[#allocation193_spill] sm:$0xff]  ;;  %v9381_v44 = vld [vmem:[#allocation194_spill] sm:$0xff] }
 0x315   :  { %4098 = vmatpush1.bf16.msra.mxu1 %v9364_v25  ;;  %v4559_v37 = vpack.c.bf16 %v9372_v1, %v9370_v63  ;;  %v9384_v63 = vld [vmem:[#allocation197_spill] sm:$0xff] }
 0x316   :  { %4554 = vmatpush1.bf16.msra.mxu0 %v4553_v42  ;;  %4100 = vmatprep.subr.bf16.mxu1 %v9365_v24  ;;  %v9375_v42 = vand.u32 4294901760, %v9012_v8  ;;  %v9385_v12 = vand.u32 4294901760, %v9384_v63  ;;  %v9386_v8 = vld [vmem:[#allocation198_spill] sm:$0xff] }
 0x317   :  { %4556 = vmatprep.subr.bf16.mxu0 %v4555_v17  ;;  %v9379_v17 = vand.u32 4294901760, %v9378_v36  ;;  %v9387_v26 = vand.u32 4294901760, %v9386_v8  ;;  %v9393_v36 = vand.u32 4294901760, %v9027_v18  ;;  %v9398_v18 = vand.u32 4294901760, %v5621_v27 }
 0x318   :  { %v4561_v39 = vpack.c.bf16 %v9376_v5, %v9375_v42  ;;  %v9388_v42 = vld [vmem:[#allocation199_spill] sm:$0xff]  ;;  %v9401_v8 = vand.u32 4294901760, %v5644_v52 }
 0x319   :  { %4102 = vmatpush1.bf16.msra.mxu1 %v9373_v22  ;;  %v4563_v49 = vpack.c.bf16 %v9379_v17, %v9377_v10  ;;  %v9391_v10 = vld [vmem:[#allocation202_spill] sm:$0xff] }
 0x31a   :  { %4558 = vmatpush1.bf16.msra.mxu0 %v4557_v31  ;;  %4104 = vmatprep.subr.bf16.mxu1 %v9374_v29  ;;  %v9383_v31 = vand.u32 4294901760, %v9382_v28  ;;  %v9394_v28 = vld [vmem:[#allocation203_spill] sm:$0xff] }
 0x31b   :  { %4560 = vmatprep.subr.bf16.mxu0 %v4559_v37  ;;  %v9389_v37 = vand.u32 4294901760, %v9388_v42 }
 0x31c   :  { %v4565_v1 = vpack.c.bf16 %v9385_v12, %v9383_v31  ;;  %v9396_v31 = vld [vmem:[#allocation217_spill] sm:$0xff]  ;;  %v9399_v12 = vld [vmem:[#allocation220_spill] sm:$0xff] }
 0x31d   :  { %4106 = vmatpush1.bf16.msra.mxu1 %v9380_v11  ;;  %v4567_v5 = vpack.c.bf16 %v9389_v37, %v9387_v26  ;;  %v9402_v26 = vand.u32 4294901760, %v5646_v58  ;;  %v9403_v37 = vld [vmem:[#allocation40_spill] sm:$0xff] }
 0x31e   :  { %4562 = vmatpush1.bf16.msra.mxu0 %v4561_v39  ;;  %4108 = vmatprep.subr.bf16.mxu1 %v9381_v44  ;;  %v9392_v39 = vand.u32 4294901760, %v9028_v9  ;;  %v9397_v9 = vand.u32 4294901760, %v5619_v19  ;;  %v9405_v19 = vld [vmem:[#allocation43_spill] sm:$0xff] }
 0x31f   :  { %4564 = vmatprep.subr.bf16.mxu0 %v4563_v49  ;;  %v9395_v49 = vld [vmem:[#allocation214_spill] sm:$0xff]  ;;  %v4125_v42 = vpack.c.bf16 %v9402_v26, %v9401_v8 }
 0x320   :  { %v4569_v17 = vpack.c.bf16 %v9393_v36, %v9392_v39  ;;  %v4123_v63 = vpack.c.bf16 %v9398_v18, %v9397_v9  ;;  %v9406_v39 = vand.u32 4294901760, %v9405_v19  ;;  %v9407_v36 = vld [vmem:[#allocation127_spill] sm:$0xff]  ;;  %v9410_v9 = vld [vmem:[#allocation50_spill] sm:$0xff] }
 0x321   :  { %4110 = vmatpush1.bf16.msra.mxu1 %v9390_v38  ;;  %v9411_v58 = vand.u32 4294901760, %v9410_v9  ;;  %v9412_v8 = vld [vmem:[#allocation138_spill] sm:$0xff] }
 0x322   :  { %4566 = vmatpush1.bf16.msra.mxu0 %v4565_v1  ;;  %4112 = vmatprep.subr.bf16.mxu1 %v9391_v10  ;;  %v9400_v1 = vld [vmem:[#allocation223_spill] sm:$0xff] }
 0x323   :  { %4568 = vmatprep.subr.bf16.mxu0 %v4567_v5  ;;  %v9404_v5 = vand.u32 4294901760, %v9403_v37  ;;  %v9415_v37 = vld [vmem:[#allocation58_spill] sm:$0xff] }
 0x324   :  { %v9416_v19 = vand.u32 4294901760, %v9415_v37 }
 0x325   :  { %4114 = vmatpush1.bf16.msra.mxu1 %v9394_v28  ;;  %v4127_v27 = vpack.c.bf16 %v9406_v39, %v9404_v5  ;;  %v9417_v39 = vld [vmem:[#allocation141_spill] sm:$0xff] }
 0x326   :  { %4570 = vmatpush1.bf16.msra.mxu0 %v4569_v17  ;;  %4116 = vmatprep.subr.bf16.mxu1 %v9395_v49  ;;  %v9408_v17 = vld [vmem:[#allocation47_spill] sm:$0xff] }
 0x327   :  { %4572 = vmatprep.subr.bf16.mxu0 %v7112_v21  ;;  %v9409_v52 = vand.u32 4294901760, %v9408_v17  ;;  %v9421_v17 = vld [vmem:[#allocation145_spill] sm:$0xff] }
 0x329   :  { %3504 = vmatmul.mubr.f32.vlgmr.msra.gmra.mrb[2].mxu0 %v6984_v4  ;;  %4118 = vmatpush1.bf16.msra.mxu1 %v9396_v31  ;;  %v4129_v18 = vpack.c.bf16 %v9411_v58, %v9409_v52  ;;  %v9422_v52 = vld [vmem:[#allocation68_spill] sm:$0xff]  ;;  %v9424_v58 = vld [vmem:[#allocation71_spill] sm:$0xff] }
 0x32a   :  { %4574 = vmatpush1.bf16.msra.mxu0 %v7122_v46  ;;  %3639 = vmatprep.mubr.f32.mxu0 %v6986_v23  ;;  %v9423_v9 = vand.u32 4294901760, %v9422_v52  ;;  %v9435_v52 = vand.u32 4294901760, %v9119_v55  ;;  %v9447_v55 = vld [vmem:[#allocation228_spill] sm:$0xff] }
 0x32b   :  { %4120 = vmatprep.subr.bf16.mxu1 %v9399_v12  ;;  %4576 = vmatprep.subr.bf16.mxu0 %v7130_v3 }
 0x32d   :  { %4122 = vmatpush1.bf16.msra.mxu1 %v9400_v1 }
 0x32e   :  { %4578 = vmatpush1.bf16.msra.mxu0 %v7139_v14  ;;  %4124 = vmatprep.subr.bf16.mxu1 %v4123_v63  ;;  %v9413_v63 = vld [vmem:[#allocation54_spill] sm:$0xff] }
 0x32f   :  { %4580 = vmatprep.subr.bf16.mxu0 %v9407_v36  ;;  %v9414_v26 = vand.u32 4294901760, %v9413_v63  ;;  %v9426_v63 = vld [vmem:[#allocation155_spill] sm:$0xff] }
 0x330   :  { %1955 = vmatmul.mubr.f32.vlgmr.msra.gmra.mrb[2].mxu1 %v7003_v16  ;;  %v9418_v16 = vand.u32 4294901760, %v9088_v60  ;;  %v9431_v60 = vld [vmem:[#allocation164_spill] sm:$0xff] }
 0x331   :  { %4126 = vmatpush1.bf16.msra.mxu1 %v4125_v42  ;;  %2218 = vmatprep.mubr.f32.mxu1 %v6986_v23  ;;  %v4131_v5 = vpack.c.bf16 %v9416_v19, %v9414_v26  ;;  %v9419_v42 = vld [vmem:[#allocation64_spill] sm:$0xff]  ;;  %v9427_v26 = vld [vmem:[#allocation75_spill] sm:$0xff]  ;;  %v9429_v19 = vld [vmem:[#allocation78_spill] sm:$0xff] }
 0x332   :  { %4582 = vmatpush1.bf16.msra.mxu0 %v9412_v8  ;;  %4128 = vmatprep.subr.bf16.mxu1 %v4127_v27  ;;  %v9420_v36 = vand.u32 4294901760, %v9419_v42  ;;  %v9425_v27 = vand.u32 4294901760, %v9424_v58  ;;  %v9428_v37 = vand.u32 4294901760, %v9427_v26  ;;  %v9434_v42 = vld [vmem:[#allocation165_spill] sm:$0xff]  ;;  %v9439_v26 = vand.u32 4294901760, %v8920_v13 }
 0x333   :  { %4584 = vmatprep.subr.bf16.mxu0 %v9417_v39  ;;  %v9450_v13 = vld [vmem:[#allocation229_spill] sm:$0xff] }
 0x334   :  { %v4133_v14 = vpack.c.bf16 %v9420_v36, %v9418_v16  ;;  %v4135_v8 = vpack.c.bf16 %v9425_v27, %v9423_v9  ;;  %v9432_v36 = vand.u32 4294901760, %v9106_v30  ;;  %v9436_v9 = vld [vmem:[#allocation92_spill] sm:$0xff]  ;;  %v9438_v27 = vld [vmem:[#allocation226_spill] sm:$0xff]  ;;  %v9442_v30 = vld [vmem:[#allocation227_spill] sm:$0xff] }
 0x335   :  { %4130 = vmatpush1.bf16.msra.mxu1 %v4129_v18  ;;  %v9430_v18 = vand.u32 4294901760, %v9429_v19 }
 0x336   :  { %4586 = vmatpush1.bf16.msra.mxu0 %v9421_v17  ;;  %4132 = vmatprep.subr.bf16.mxu1 %v4131_v5  ;;  %v9433_v5 = vand.u32 4294901760, %v9105_v43  ;;  %v9443_v43 = vld [vmem:[#allocation103_spill] sm:$0xff] }
 0x337   :  { %4588 = vmatprep.subr.bf16.mxu0 %v9426_v63  ;;  %v4137_v39 = vpack.c.bf16 %v9430_v18, %v9428_v37  ;;  %v9440_v37 = vld [vmem:[#allocation99_spill] sm:$0xff]  ;;  %v9444_v18 = vand.u32 4294901760, %v9443_v43  ;;  %v9455_v43 = vld [vmem:[#allocation230_spill] sm:$0xff] }
 0x338   :  { %v4139_v16 = vpack.c.bf16 %v9433_v5, %v9432_v36  ;;  %v9445_v36 = vld [vmem:[#allocation106_spill] sm:$0xff] }
 0x339   :  { %4134 = vmatpush1.bf16.msra.mxu1 %v4133_v14  ;;  %v9437_v14 = vand.u32 4294901760, %v9436_v9 }
 0x33a   :  { %4590 = vmatpush1.bf16.msra.mxu0 %v9431_v60  ;;  %4136 = vmatprep.subr.bf16.mxu1 %v4135_v8  ;;  %v9441_v8 = vand.u32 4294901760, %v9440_v37  ;;  %v9453_v37 = vld [vmem:[#allocation120_spill] sm:$0xff] }
 0x33b   :  { %4592 = vmatprep.subr.bf16.mxu0 %v9434_v42  ;;  %v4141_v58 = vpack.c.bf16 %v9437_v14, %v9435_v52  ;;  %v9448_v52 = vand.u32 4294901760, %v9134_v41  ;;  %v9451_v14 = vld [vmem:[#allocation117_spill] sm:$0xff]  ;;  %v9458_v41 = vld [vmem:[#allocation231_spill] sm:$0xff] }
 0x33c   :  { %v4143_v19 = vpack.c.bf16 %v9441_v8, %v9439_v26  ;;  %v9452_v26 = vand.u32 4294901760, %v9451_v14  ;;  %v9463_v14 = vand.u32 4294901760, %v8931_v54  ;;  %v9471_v54 = vld [vmem:[#allocation235_spill] sm:$0xff] }
 0x33d   :  { %4138 = vmatpush1.bf16.msra.mxu1 %v4137_v39  ;;  %v9446_v39 = vand.u32 4294901760, %v9445_v36 }
 0x33e   :  { %4594 = vmatpush1.bf16.msra.mxu0 %v9438_v27  ;;  %4140 = vmatprep.subr.bf16.mxu1 %v4139_v16  ;;  %v9449_v16 = vand.u32 4294901760, %v8925_v0  ;;  %v9459_v0 = vand.u32 4294901760, %v9161_v15  ;;  %v9468_v15 = vld [vmem:[#allocation234_spill] sm:$0xff] }
 0x33f   :  { %4596 = vmatprep.subr.bf16.mxu0 %v9442_v30  ;;  %v4145_v5 = vpack.c.bf16 %v9446_v39, %v9444_v18  ;;  %v9456_v18 = vand.u32 4294901760, %v8928_v32  ;;  %v9460_v39 = vld [vmem:[#allocation134_spill] sm:$0xff]  ;;  %v9465_v32 = vld [vmem:[#allocation233_spill] sm:$0xff] }
 0x340   :  { %v4147_v9 = vpack.c.bf16 %v9449_v16, %v9448_v52  ;;  %v9462_v16 = vld [vmem:[#allocation232_spill] sm:$0xff] }
 0x341   :  { %4142 = vmatpush1.bf16.msra.mxu1 %v4141_v58  ;;  %v9454_v58 = vand.u32 4294901760, %v9453_v37  ;;  %v9467_v37 = vand.u32 4294901760, %v8900_v57  ;;  %v9475_v57 = vand.u32 4294901760, %v6501_v56  ;;  %v9483_v56 = vld [vmem:[#allocation239_spill] sm:$0xff] }
 0x342   :  { %4598 = vmatpush1.bf16.msra.mxu0 %v9447_v55  ;;  %4144 = vmatprep.subr.bf16.mxu1 %v4143_v19  ;;  %v9457_v19 = vand.u32 4294901760, %v8929_v35  ;;  %v9466_v35 = vand.u32 4294901760, %v8933_v48  ;;  %v9474_v48 = vld [vmem:[#allocation236_spill] sm:$0xff] }
 0x343   :  { %4600 = vmatprep.subr.bf16.mxu0 %v9450_v13  ;;  %v4149_v8 = vpack.c.bf16 %v9454_v58, %v9452_v26 }
 0x344   :  { %v4151_v36 = vpack.c.bf16 %v9457_v19, %v9456_v18  ;;  %v4157_v58 = vpack.c.bf16 %v9467_v37, %v9466_v35  ;;  %v9470_v18 = vand.u32 4294901760, %v8934_v51  ;;  %v9478_v51 = vand.u32 4294901760, %v6511_v45  ;;  %v9486_v45 = vld [vmem:[#allocation148_spill] sm:$0xff] }
 0x345   :  { %4146 = vmatpush1.bf16.msra.mxu1 %v4145_v5  ;;  %v9461_v5 = vand.u32 4294901760, %v9460_v39  ;;  %v9476_v39 = vand.u32 4294901760, %v6506_v50  ;;  %v9484_v50 = vand.u32 4294901760, %v6531_v62  ;;  %v9485_v35 = vand.u32 4294901760, %v6536_v47  ;;  %v9496_v62 = vld [vmem:[#allocation159_spill] sm:$0xff]  ;;  %v9497_v47 = vld [vmem:[#allocation209_spill] sm:$0xff] }
 0x346   :  { %4602 = vmatpush1.bf16.msra.mxu0 %v9455_v43  ;;  %4148 = vmatprep.subr.bf16.mxu1 %v4147_v9  ;;  %v9464_v9 = vand.u32 4294901760, %v8932_v33  ;;  %v9472_v33 = vand.u32 4294901760, %v8904_v59  ;;  %v9480_v59 = vld [vmem:[#allocation238_spill] sm:$0xff] }
 0x347   :  { %4604 = vmatprep.subr.bf16.mxu0 %v9458_v41  ;;  %v4153_v52 = vpack.c.bf16 %v9461_v5, %v9459_v0  ;;  %v4163_v5 = vpack.c.bf16 %v9476_v39, %v9475_v57  ;;  %v4169_v37 = vpack.c.bf16 %v9485_v35, %v9484_v50  ;;  %v9498_v39 = vand.u32 4294901760, %v9497_v47 }
 0x348   :  { %v4155_v26 = vpack.c.bf16 %v9464_v9, %v9463_v14  ;;  %v9482_v9 = vand.u32 4294901760, %v6526_v6  ;;  %v9492_v6 = vld [vmem:[#allocation207_spill] sm:$0xff] }
 0x349   :  { %4150 = vmatpush1.bf16.msra.mxu1 %v4149_v8  ;;  %v9469_v8 = vand.u32 4294901760, %v8901_v53  ;;  %v9477_v53 = vld [vmem:[#allocation237_spill] sm:$0xff] }
 0x34a   :  { %4606 = vmatpush1.bf16.msra.mxu0 %v9462_v16  ;;  %4152 = vmatprep.subr.bf16.mxu1 %v4151_v36  ;;  %v9473_v36 = vand.u32 4294901760, %v8905_v34  ;;  %v9481_v34 = vand.u32 4294901760, %v6521_v61  ;;  %v9491_v61 = vld [vmem:[#allocation152_spill] sm:$0xff] }
 0x34b   :  { %4608 = vmatprep.subr.bf16.mxu0 %v9465_v32  ;;  %v4159_v19 = vpack.c.bf16 %v9470_v18, %v9469_v8  ;;  %v9489_v8 = vld [vmem:[#allocation206_spill] sm:$0xff] }
 0x34c   :  { %v4161_v0 = vpack.c.bf16 %v9473_v36, %v9472_v33  ;;  %v9490_v18 = vand.u32 4294901760, %v9489_v8  ;;  %v9493_v33 = vand.u32 4294901760, %v9492_v6  ;;  %v9494_v36 = vld [vmem:[#allocation208_spill] sm:$0xff]  ;;  %v9511_v6 = vld [vmem:[#allocation241_spill] sm:$0xff] }
 0x34d   :  { %4154 = vmatpush1.bf16.msra.mxu1 %v4153_v52  ;;  %v9479_v52 = vand.u32 4294901760, %v6516_v2  ;;  %v9487_v2 = vld [vmem:[#allocation205_spill] sm:$0xff]  ;;  %v9509_v8 = vld [vmem:[#allocation216_spill] sm:$0xff] }
 0x34e   :  { %4610 = vmatpush1.bf16.msra.mxu0 %v9468_v15  ;;  %4156 = vmatprep.subr.bf16.mxu1 %v4155_v26  ;;  %v4167_v26 = vpack.c.bf16 %v9482_v9, %v9481_v34  ;;  %v9502_v34 = vld [vmem:[#allocation211_spill] sm:$0xff] }
 0x34f   :  { %4612 = vmatprep.subr.bf16.mxu0 %v9471_v54  ;;  %v4165_v14 = vpack.c.bf16 %v9479_v52, %v9478_v51  ;;  %v9503_v9 = vand.u32 4294901760, %v9502_v34  ;;  %v9519_v34 = vld [vmem:[#allocation222_spill] sm:$0xff] }
 0x351   :  { %4158 = vmatpush1.bf16.msra.mxu1 %v4157_v58  ;;  %v9488_v58 = vand.u32 4294901760, %v9487_v2  ;;  %v9507_v2 = vld [vmem:[#allocation215_spill] sm:$0xff] }
 0x352   :  { %4614 = vmatpush1.bf16.msra.mxu0 %v9474_v48  ;;  %4160 = vmatprep.subr.bf16.mxu1 %v4159_v19 }
 0x353   :  { %4616 = vmatprep.subr.bf16.mxu0 %v9477_v53  ;;  %v4171_v19 = vpack.c.bf16 %v9490_v18, %v9488_v58  ;;  %v9508_v58 = vand.u32 4294901760, %v9507_v2  ;;  %v9510_v18 = vand.u32 4294901760, %v9509_v8  ;;  %v9523_v2 = vld [vmem:[#allocation37_spill] sm:$0xff] }
 0x354   :  { %v9525_v8 = vld [vmem:[#allocation49_spill] sm:$0xff] }
 0x355   :  { %4162 = vmatpush1.bf16.msra.mxu1 %v4161_v0  ;;  %v9495_v0 = vand.u32 4294901760, %v9494_v36 }
 0x356   :  { %4618 = vmatpush1.bf16.msra.mxu0 %v9480_v59  ;;  %4164 = vmatprep.subr.bf16.mxu1 %v4163_v5  ;;  %v9499_v5 = vld [vmem:[#allocation210_spill] sm:$0xff] }
 0x357   :  { %4620 = vmatprep.subr.bf16.mxu0 %v9483_v56  ;;  %v4173_v57 = vpack.c.bf16 %v9495_v0, %v9493_v33  ;;  %v9500_v51 = vand.u32 4294901760, %v9499_v5  ;;  %v9512_v33 = vld [vmem:[#allocation218_spill] sm:$0xff]  ;;  %v9514_v0 = vld [vmem:[#allocation219_spill] sm:$0xff]  ;;  %v9517_v5 = vld [vmem:[#allocation221_spill] sm:$0xff] }
 0x358   :  { %v9513_v36 = vand.u32 4294901760, %v9512_v33  ;;  %v9530_v33 = vld [vmem:[#allocation84_spill] sm:$0xff] }
 0x359   :  { %4166 = vmatpush1.bf16.msra.mxu1 %v4165_v14  ;;  %v4175_v52 = vpack.c.bf16 %v9500_v51, %v9498_v39  ;;  %v9501_v14 = vld [vmem:[#allocation161_spill] sm:$0xff]  ;;  %v9516_v39 = vld [vmem:[#allocation178_spill] sm:$0xff]  ;;  %v9518_v51 = vand.u32 4294901760, %v9517_v5 }
 0x35a   :  { %4622 = vmatpush1.bf16.msra.mxu0 %v9486_v45  ;;  %4168 = vmatprep.subr.bf16.mxu1 %v4167_v26  ;;  %v9504_v26 = vld [vmem:[#allocation212_spill] sm:$0xff]  ;;  %v9537_v5 = vld [vmem:[#allocation133_spill] sm:$0xff] }
 0x35b   :  { %4624 = vmatprep.subr.bf16.mxu0 %v9491_v61  ;;  %v9505_v50 = vand.u32 4294901760, %v9504_v26  ;;  %v9521_v26 = vand.u32 4294901760, %v9263_v7  ;;  %v9527_v7 = vld [vmem:[#allocation63_spill] sm:$0xff] }
 0x35d   :  { %4170 = vmatpush1.bf16.msra.mxu1 %v4169_v37  ;;  %v4177_v35 = vpack.c.bf16 %v9505_v50, %v9503_v9  ;;  %v9506_v37 = vld [vmem:[#allocation240_spill] sm:$0xff]  ;;  %v9522_v50 = vand.u32 4294901760, %v9262_v20  ;;  %v9528_v20 = vld [vmem:[#allocation70_spill] sm:$0xff] }
 0x35e   :  { %4626 = vmatpush1.bf16.msra.mxu0 %v9496_v62  ;;  %4172 = vmatprep.subr.bf16.mxu1 %v4171_v19  ;;  %v4179_v19 = vpack.c.bf16 %v9510_v18, %v9508_v58  ;;  %v9524_v58 = vld [vmem:[#allocation41_spill] sm:$0xff] }
 0x35f   :  { %4628 = vmatprep.subr.bf16.mxu0 %v9501_v14  ;;  %v9526_v18 = vld [vmem:[#allocation57_spill] sm:$0xff] }
 0x361   :  { %4174 = vmatpush1.bf16.msra.mxu1 %v4173_v57  ;;  %v9515_v57 = vand.u32 4294901760, %v9514_v0  ;;  %v9533_v0 = vld [vmem:[#allocation105_spill] sm:$0xff] }
 0x362   :  { %4630 = vmatpush1.bf16.msra.mxu0 %v9506_v37  ;;  %4176 = vmatprep.subr.bf16.mxu1 %v4175_v52  ;;  %v9520_v52 = vand.u32 4294901760, %v9519_v34  ;;  %v9539_v34 = vld [vmem:[#allocation147_spill] sm:$0xff] }
 0x363   :  { %4632 = vmatprep.subr.bf16.mxu0 %v9511_v6  ;;  %v4181_v47 = vpack.c.bf16 %v9515_v57, %v9513_v36  ;;  %v9532_v36 = vld [vmem:[#allocation98_spill] sm:$0xff]  ;;  %v9535_v57 = vld [vmem:[#allocation119_spill] sm:$0xff] }
 0x364   :  { %v4183_v9 = vpack.c.bf16 %v9520_v52, %v9518_v51  ;;  %v9538_v51 = vld [vmem:[#allocation140_spill] sm:$0xff]  ;;  %v9540_v52 = vld [vmem:[#allocation154_spill] sm:$0xff] }
 0x365   :  { %4178 = vmatpush1.bf16.msra.mxu1 %v4177_v35  ;;  %v4185_v35 = vpack.c.bf16 %v9522_v50, %v9521_v26 }
 0x366   :  { %4634 = vmatpush1.bf16.msra.mxu0 %v9516_v39  ;;  %4180 = vmatprep.subr.bf16.mxu1 %v4179_v19  ;;  %v9529_v19 = vld [vmem:[#allocation77_spill] sm:$0xff] }
 0x369   :  { %3641 = vmatmul.mubr.f32.vlgmr.msra.gmra.mrb[2].mxu0 %v6984_v4  ;;  %4182 = vmatpush1.bf16.msra.mxu1 %v4181_v47  ;;  %v9536_v47 = vld [vmem:[#allocation126_spill] sm:$0xff] }
 0x36a   :  { %4184 = vmatprep.subr.bf16.mxu1 %v4183_v9 }
 0x36d   :  { %4186 = vmatpush1.bf16.msra.mxu1 %v4185_v35 }
 0x36e   :  { %4188 = vmatprep.subr.bf16.mxu1 %v9265_v40  ;;  %v9531_v40 = vld [vmem:[#allocation91_spill] sm:$0xff] }
 0x370   :  { %2220 = vmatmul.mubr.f32.vlgmr.msra.gmra.mrb[2].mxu1 %v6984_v4 }
 0x371   :  { %4190 = vmatpush1.bf16.msra.mxu1 %v9523_v2  ;;  %2355 = vmatprep.mubr.f32.mxu1 %v6986_v23  ;;  %v9534_v23 = vld [vmem:[#allocation112_spill] sm:$0xff] }
 0x372   :  { %4192 = vmatprep.subr.bf16.mxu1 %v9524_v58 }
 0x375   :  { %4194 = vmatpush1.bf16.msra.mxu1 %v9525_v8 }
 0x376   :  { %4196 = vmatprep.subr.bf16.mxu1 %v9526_v18 }
 0x379   :  { %4198 = vmatpush1.bf16.msra.mxu1 %v9527_v7 }
 0x37a   :  { %4200 = vmatprep.subr.bf16.mxu1 %v9528_v20 }
 0x37d   :  { %4202 = vmatpush1.bf16.msra.mxu1 %v9529_v19 }
 0x37e   :  { %4204 = vmatprep.subr.bf16.mxu1 %v9530_v33 }
 0x381   :  { %4206 = vmatpush1.bf16.msra.mxu1 %v9531_v40 }
 0x382   :  { %4208 = vmatprep.subr.bf16.mxu1 %v9532_v36 }
 0x385   :  { %4210 = vmatpush1.bf16.msra.mxu1 %v9533_v0 }
 0x386   :  { %4212 = vmatprep.subr.bf16.mxu1 %v9534_v23 }
 0x389   :  { %4214 = vmatpush1.bf16.msra.mxu1 %v9535_v57 }
 0x38a   :  { %4216 = vmatprep.subr.bf16.mxu1 %v9536_v47 }
 0x38d   :  { %4218 = vmatpush1.bf16.msra.mxu1 %v9537_v5 }
 0x38e   :  { %4220 = vmatprep.subr.bf16.mxu1 %v9538_v51 }
 0x391   :  { %4222 = vmatpush1.bf16.msra.mxu1 %v9539_v34 }
 0x392   :  { %4224 = vmatprep.subr.bf16.mxu1 %v9540_v52 }
 0x395   :  { %4226 = vmatpush1.bf16.msra.mxu1 %v9364_v25  ;;  %v9541_v25 = vld [vmem:[#allocation113_spill] sm:$0xff] }
 0x396   :  { %4228 = vmatprep.subr.bf16.mxu1 %v9365_v24  ;;  %v9542_v24 = vld [vmem:[#allocation124_spill] sm:$0xff] }
 0x399   :  { %4230 = vmatpush1.bf16.msra.mxu1 %v9373_v22  ;;  %v9543_v22 = vld [vmem:[#allocation127_spill] sm:$0xff] }
 0x39a   :  { %4232 = vmatprep.subr.bf16.mxu1 %v9374_v29  ;;  %v9544_v29 = vld [vmem:[#allocation138_spill] sm:$0xff] }
 0x39d   :  { %4234 = vmatpush1.bf16.msra.mxu1 %v9380_v11  ;;  %v9545_v11 = vld [vmem:[#allocation141_spill] sm:$0xff] }
 0x39e   :  { %4236 = vmatprep.subr.bf16.mxu1 %v9381_v44 }
 0x3a1   :  { %4238 = vmatpush1.bf16.msra.mxu1 %v9390_v38 }
 0x3a2   :  { %4240 = vmatprep.subr.bf16.mxu1 %v9391_v10 }
 0x3a5   :  { %4242 = vmatpush1.bf16.msra.mxu1 %v9394_v28 }
 0x3a6   :  { %4244 = vmatprep.subr.bf16.mxu1 %v9395_v49 }
 0x3a9   :  { %4246 = vmatpush1.bf16.msra.mxu1 %v9396_v31 }
 0x3aa   :  { %4248 = vmatprep.subr.bf16.mxu1 %v9399_v12 }
 0x3ad   :  { %4250 = vmatpush1.bf16.msra.mxu1 %v9400_v1 }
 0x3ae   :  { %4252 = vmatprep.subr.bf16.mxu1 %v7112_v21 }
 0x3b0   :  { %2357 = vmatmul.mubr.f32.vlgmr.msra.gmra.mrb[2].mxu1 %v6984_v4  ;;  %v9546_v4 = vld [vmem:[#allocation96_spill] sm:$0xff] }
 0x3b1   :  { %4254 = vmatpush1.bf16.msra.mxu1 %v7122_v46  ;;  %2496 = vmatprep.mubr.f32.mxu1 %v9541_v25 }
 0x3b2   :  { %4256 = vmatprep.subr.bf16.mxu1 %v7130_v3 }
 0x3b5   :  { %4258 = vmatpush1.bf16.msra.mxu1 %v9542_v24 }
 0x3b6   :  { %4260 = vmatprep.subr.bf16.mxu1 %v9543_v22 }
 0x3b9   :  { %4262 = vmatpush1.bf16.msra.mxu1 %v9544_v29 }
 0x3ba   :  { %4264 = vmatprep.subr.bf16.mxu1 %v9545_v11 }
 0x3bd   :  { %4266 = vmatpush1.bf16.msra.mxu1 %v9421_v17 }
 0x3be   :  { %4268 = vmatprep.subr.bf16.mxu1 %v9426_v63 }
 0x3c1   :  { %4270 = vmatpush1.bf16.msra.mxu1 %v9431_v60 }
 0x3c2   :  { %4272 = vmatprep.subr.bf16.mxu1 %v9434_v42 }
 0x3c5   :  { %4274 = vmatpush1.bf16.msra.mxu1 %v9438_v27 }
 0x3c6   :  { %4276 = vmatprep.subr.bf16.mxu1 %v9442_v30 }
 0x3c9   :  { %4278 = vmatpush1.bf16.msra.mxu1 %v9447_v55 }
 0x3ca   :  { %4280 = vmatprep.subr.bf16.mxu1 %v9450_v13 }
 0x3cd   :  { %4282 = vmatpush1.bf16.msra.mxu1 %v9455_v43 }
 0x3ce   :  { %4284 = vmatprep.subr.bf16.mxu1 %v9458_v41 }
 0x3d1   :  { %4286 = vmatpush1.bf16.msra.mxu1 %v9462_v16 }
 0x3d2   :  { %4288 = vmatprep.subr.bf16.mxu1 %v9465_v32 }
 0x3d5   :  { %4290 = vmatpush1.bf16.msra.mxu1 %v9468_v15 }
 0x3d6   :  { %4292 = vmatprep.subr.bf16.mxu1 %v9471_v54 }
 0x3d9   :  { %4294 = vmatpush1.bf16.msra.mxu1 %v9474_v48 }
 0x3da   :  { %4296 = vmatprep.subr.bf16.mxu1 %v9477_v53 }
 0x3dd   :  { %4298 = vmatpush1.bf16.msra.mxu1 %v9480_v59 }
 0x3de   :  { %4300 = vmatprep.subr.bf16.mxu1 %v9483_v56 }
 0x3e1   :  { %4302 = vmatpush1.bf16.msra.mxu1 %v9486_v45 }
 0x3e2   :  { %4304 = vmatprep.subr.bf16.mxu1 %v9491_v61 }
 0x3e5   :  { %4306 = vmatpush1.bf16.msra.mxu1 %v9496_v62 }
 0x3e6   :  { %4308 = vmatprep.subr.bf16.mxu1 %v9501_v14 }
 0x3e9   :  { %4310 = vmatpush1.bf16.msra.mxu1 %v9506_v37 }
 0x3ea   :  { %4312 = vmatprep.subr.bf16.mxu1 %v9511_v6 }
 0x3ed   :  { %4314 = vmatpush1.bf16.msra.mxu1 %v9516_v39 }
 0x3f0   :  { %2502 = vmatmul.mubr.f32.vlgmr.msra.gmra.mrb[4].mxu1 %v9546_v4 }
 0x43c   :  { %v3642_v21 = vpop.f32.mrb[2].mxu0 }
 0x43d   :  { %v3644_v46 = vpop.f32.mrb[3].mxu0 }
 0x483   :  { %v2358_v3 = vpop.f32.mrb[2].mxu1 }
 0x484   :  { %v2360_v44 = vpop.f32.mrb[3].mxu1 }
 0x4c3   :  { %v2503_v38 = vpop.f32.mrb[4].mxu1 }
 0x4c4   :  { %v4637_v10 = vadd.f32 %v3642_v21, %v2503_v38  ;;  %v2505_v28 = vpop.f32.mrb[5].mxu1 }
 0x4c5   :  { %v4638_v49 = vadd.f32 %v3644_v46, %v2505_v28 }
 0x4c6   :  { %4678 = vrcp.f32 %v4637_v10 }
 0x4c7   :  { %4680 = vrcp.f32 %v4638_v49 }
 0x4d0   :  { %v4679_v31 = vpop.eup %4678 }
 0x4d1   :  { %v4681_v12 = vpop.eup %4680  ;;  %v3649_v1 = vmul.f32 %v4679_v31, %v4637_v10 }
 0x4d2   :  { %v3650_v17 = vmul.f32 %v4681_v12, %v4638_v49 }
 0x4d3   :  { %v3651_v63 = vsub.f32 2.0, %v3649_v1 }
 0x4d4   :  { %v3652_v60 = vsub.f32 2.0, %v3650_v17 }
 0x4d5   :  { %v3653_v42 = vmul.f32 %v4679_v31, %v3651_v63 }
 0x4d6   :  { %v3654_v27 = vmul.f32 %v4681_v12, %v3652_v60 }
 0x4d7   :  { %v3655_v30 = vmul.f32 %v3653_v42, %v2358_v3 }
 0x4d8   :  { %v3656_v55 = vmul.f32 %v3654_v27, %v2360_v44 }
 0x4d9   :  { %3657 = vst [vmem:[#allocation8] sm:$0xff] %v3655_v30 }
 0x4da   :  { %3658 = vst [vmem:[#allocation8 + $0x8] sm:$0xff] %v3656_v55 }
 0x4db   :  { %4759 = shalt.err (!%p4756_p0)
}
 0x4dc   :  { %s4760_s27 = scalar_lea.hbm %s7853_s3, 256 }
 0x4dd   :  { %p4761_p1 = scmp.ne.s32.totalorder %s7853_s3, %s4760_s27  ;;  %p4764_p2 = scmp.lt.u32.totalorder %s4760_s27, %s7853_s3 }
 0x4df   :  { %p4766_p3 = pnand %p4764_p2, %p4761_p1 }
 0x4e1   :  { %4769 = shalt.err (!%p4766_p3)
}
 0x4e2   :  { %3668 = dma.vmem_to_hbm [thread:$0]  %s3666_s23, 256, %s7853_s3, [#allocation4]  }
 0x4e3   :  { %4774 = dma.done.wait [#allocation4], 256  }
 0x4e4   :  { %4775 = vsyncadd [#allocation4], 4294967040 }
 0x4e5   :  { %3672 = vsyncpa [#allocation3], 1 }
 0x4e6   :  { %3673 = vsyncpa [#allocation6], 1 }
 0x4e7   :  { %3674 = vsyncpa [#allocation4], 1 }

</bundles_post_ra>
